<compile_context>
chip_gen: v7x
topology: tpu7x:2x2x1
jax: 0.10.0
libtpu: 0.0.40
codegen_flags: <defaults>
</compile_context>

<pallas_src>
import jax
import jax.numpy as jnp
from jax import lax
from jax.experimental import pallas as pl
from jax.experimental.pallas import tpu as pltpu

# ----------------------------- configuration ---------------------------------
B = 2
TIME_POINTS = 8            # W (small stand-in for the hard-coded 155)
N_REGIONS = 16             # R (small stand-in for the default 100)
FEAT = 16                  # T  per-timestep feature width fed to the LSTM
LSTM_HIDDEN = 16
LSTM_OUT = 2 * LSTM_HIDDEN                 # bidirectional -> lstm.output_dim
N_HEADS = 4
ATT_EMBED = 64 * N_HEADS                   # attention_embedding = 256
HEAD_DIM = ATT_EMBED // N_HEADS
F_DIM = N_REGIONS * N_REGIONS              # n_regions ** 2
GTA_E1 = round(0.05 * F_DIM)               # upscale  * R*R  (13, logical)
GTA_E1_PAD = 128                           # zero-padded to a full lane tile
GTA_E2 = round(0.5 * F_DIM)                # upscale2 * R*R  (128)
N_CLASSES = 2
BN_EPS = 1e-5


# ------------------ Pallas kernel: multi-head attention weights --------------
def _mha_weights_kernel(x_ref, wqk_ref, bqk_ref, attw_ref):
    f32 = jnp.float32
    nb, r, d = x_ref.shape
    x2 = x_ref[...].reshape(nb * r, d).astype(jnp.bfloat16)
    # fused (key/query Linear -> MHA in-projection), Q and K packed in one matmul
    proj = jnp.dot(x2, wqk_ref[...], preferred_element_type=f32) + bqk_ref[...]
    scale = 1.0 / (HEAD_DIM ** 0.5)
    w_acc = jnp.zeros((nb, r, r), dtype=f32)
    for h in range(N_HEADS):                                  # unrolled, 4 heads
        q = proj[:, h * HEAD_DIM:(h + 1) * HEAD_DIM] * scale
        k = proj[:, ATT_EMBED + h * HEAD_DIM:ATT_EMBED + (h + 1) * HEAD_DIM]
        qh = q.reshape(nb, r, HEAD_DIM).astype(jnp.bfloat16)
        kh = k.reshape(nb, r, HEAD_DIM).astype(jnp.bfloat16)
        s = jnp.einsum("nrd,nsd->nrs", qh, kh, preferred_element_type=f32)
        w_acc = w_acc + jax.nn.softmax(s, axis=-1)
    # head-averaged (nn.MultiheadAttention default average_attn_weights=True)
    attw_ref[...] = (w_acc * (1.0 / N_HEADS)).astype(attw_ref.dtype)


def multi_head_attention_weights(x, p):
    """x: (N, R, D) in (B*W) order -> head-averaged attention weights (N, R, R).

    The attn_output branch of nn.MultiheadAttention (value / out projection) is
    never consumed by combinedModel.forward, so it is not computed.
    """
    n, r, d = x.shape
    # Fuse the chained linears at trace time:
    #   (x @ Wq + bq) @ Wiq + biq == x @ (Wq @ Wiq) + (bq @ Wiq + biq)
    wq = p["wq"] @ p["wiq"]
    bq = p["bq"] @ p["wiq"] + p["biq"]
    wk = p["wk"] @ p["wik"]
    bk = p["bk"] @ p["wik"] + p["bik"]
    wqk = jnp.concatenate([wq, wk], axis=1).astype(jnp.bfloat16)   # (D, 2E)
    bqk = jnp.concatenate([bq, bk], axis=1).astype(jnp.float32)    # (1, 2E)

    grid = 2 if n % 2 == 0 else 1      # 2-way parallel axis for v7x's two TCs
    nb = n // grid
    return pl.pallas_call(
        _mha_weights_kernel,
        out_shape=jax.ShapeDtypeStruct((n, r, r), jnp.float32),
        grid=(grid,),
        in_specs=[pl.BlockSpec((nb, r, d), lambda i: (i, 0, 0)),
                  pl.BlockSpec(wqk.shape, lambda i: (0, 0)),
                  pl.BlockSpec(bqk.shape, lambda i: (0, 0))],
        out_specs=pl.BlockSpec((nb, r, r), lambda i: (i, 0, 0)),
        compiler_params=pltpu.CompilerParams(
            dimension_semantics=("parallel",)),
    )(x, wqk, bqk)


# --------------- Pallas kernel: gta_attention + encoder (fused) --------------
def _gta_encoder_kernel(x_ref, w1_ref, b1_ref, gamma_ref, beta_ref,
                        w2_ref, b2_ref, w3_ref, b3_ref, we_ref, be_ref,
                        fc_ref, fcsum_ref, logits_ref, g_ref):
    f32 = jnp.float32
    x = x_ref[...]                                            # (B, W, F)
    bb, ww, ff = x.shape
    x_mean = jnp.mean(x, axis=1, keepdims=True)               # (B, 1, F)
    xr = (x * x_mean).reshape(bb * ww, ff)                    # (B*W, F)
    # gta_embed: Linear(F, E1) (E1 zero-padded to 128 lanes -> exact result)
    h = jnp.dot(xr, w1_ref[...], preferred_element_type=f32) + b1_ref[...]
    # gta_norm: BatchNorm1d + ReLU
    # TODO(synk): training-mode batch statistics only (eval running stats not modeled).
    mu = jnp.mean(h, axis=0, keepdims=True)
    var = jnp.mean(jnp.square(h - mu), axis=0, keepdims=True)
    h = (h - mu) * lax.rsqrt(var + BN_EPS)
    h = jnp.maximum(h * gamma_ref[...] + beta_ref[...], 0.0)
    # gta_attend: Linear(E1,E2) + ReLU + Linear(E2,1) (last column as lane reduce)
    h2 = jnp.maximum(
        jnp.dot(h, w2_ref[...], preferred_element_type=f32) + b2_ref[...], 0.0)
    a = jnp.sum(h2 * w3_ref[...], axis=-1, keepdims=True) + b3_ref[...]  # (B*W,1)
    # Hardswish
    g = a * jnp.clip(a + 3.0, 0.0, 6.0) * (1.0 / 6.0)
    xw = x.reshape(bb * ww, ff) * g                           # (B*W, F)
    fc = jnp.mean(xw.reshape(bb, ww, ff), axis=1)             # weighted mean over W
    fc_ref[...] = fc
    fcsum_ref[...] = jnp.mean(x, axis=1)                      # plain mean over W
    # fused encoder stand-in: flatten(FC) @ We + be while FC is still in VMEM
    logits_ref[...] = (jnp.dot(fc, we_ref[...], preferred_element_type=f32)
                       + be_ref[...]).astype(logits_ref.dtype)
    g_ref[...] = g


def gta_attention_and_encode(x, gta_p, enc_p):
    """x: (B, W, F) -> (FC (B,F), FC_sum (B,F), logits (B,C), time_weights (B,W))."""
    b, w, f = x.shape
    args = [x, gta_p["w1"], gta_p["b1"], gta_p["gamma"], gta_p["beta"],
            gta_p["w2"], gta_p["b2"], gta_p["w3"], gta_p["b3"],
            enc_p["we"], enc_p["be"]]
    vmem = pl.BlockSpec(memory_space=pltpu.MemorySpace.VMEM)
    # TODO(synk): at real dims (R=100, W=155 -> F=10000) tile this kernel over W
    # (reduction axis last + pl.when accumulator) instead of a full-block spec,
    # to stay inside v7x's 64 MiB VMEM.
    fc, fc_sum, logits, g = pl.pallas_call(
        _gta_encoder_kernel,
        out_shape=(jax.ShapeDtypeStruct((b, f), jnp.float32),
                   jax.ShapeDtypeStruct((b, f), jnp.float32),
                   jax.ShapeDtypeStruct((b, N_CLASSES), jnp.float32),
                   jax.ShapeDtypeStruct((b * w, 1), jnp.float32)),
        in_specs=[vmem] * len(args),
        out_specs=(vmem, vmem, vmem, vmem),
    )(*args)
    return fc, fc_sum, logits, g.reshape(b, w)


# ------------------------- injected bi-LSTM (plain JAX) -----------------------
# TODO(synk): LSTM is a constructor-injected sub-module with an inherently
# sequential recurrence; it is kept in plain JAX. Both directions run in ONE
# lax.scan, stacked along a direction axis (halves the sequential depth).
def bilstm(x, p):
    """x: (N, W, T) -> (N, W, 2H). PyTorch gate order (i, f, g, o)."""
    n, w, t = x.shape
    hid = p["whh"].shape[-1]
    wih_t = jnp.swapaxes(p["wih"], 1, 2)             # (2, T, 4H)
    whh_t = jnp.swapaxes(p["whh"], 1, 2)             # (2, H, 4H)
    bias = (p["bih"] + p["bhh"])[:, None, :]         # (2, 1, 4H)
    xs = jnp.stack([x, x[:, ::-1, :]], axis=0)       # (2, N, W, T)
    xs = jnp.moveaxis(xs, 2, 0)                      # (W, 2, N, T)

    def step(carry, xt):
        h, c = carry
        gates = (jnp.einsum("dnt,dtg->dng", xt, wih_t)
                 + jnp.einsum("dnh,dhg->dng", h, whh_t) + bias)
        i, f, g, o = jnp.split(gates, 4, axis=-1)
        i, f, o = jax.nn.sigmoid(i), jax.nn.sigmoid(f), jax.nn.sigmoid(o)
        c = f * c + i * jnp.tanh(g)
        h = o * jnp.tanh(c)
        return (h, c), h

    init = (jnp.zeros((2, n, hid), x.dtype), jnp.zeros((2, n, hid), x.dtype))
    _, hs = lax.scan(step, init, xs)                 # (W, 2, N, H)
    fwd = jnp.moveaxis(hs[:, 0], 0, 1)               # (N, W, H)
    bwd = jnp.moveaxis(hs[::-1, 1], 0, 1)            # (N, W, H), time-aligned
    return jnp.concatenate([fwd, bwd], axis=-1)      # (N, W, 2H)


# ------------------------- parameter initialization ---------------------------
def init_params(key):
    keys = iter(jax.random.split(key, 24))

    def dense(n_in, n_out, scale=0.05):
        return scale * jax.random.normal(next(keys), (n_in, n_out), jnp.float32)

    def lstm_stacked(in_dim, hid):
        # direction-stacked (fwd, bwd) weights for the single-scan bi-LSTM
        return dict(
            wih=0.1 * jax.random.normal(next(keys), (2, 4 * hid, in_dim), jnp.float32),
            whh=0.1 * jax.random.normal(next(keys), (2, 4 * hid, hid), jnp.float32),
            bih=jnp.zeros((2, 4 * hid), jnp.float32),
            bhh=jnp.zeros((2, 4 * hid), jnp.float32))

    # GTA weights: logical E1 = 13, zero-padded to 128 lanes (numerically exact).
    w1 = jnp.pad(dense(F_DIM, GTA_E1), ((0, 0), (0, GTA_E1_PAD - GTA_E1)))
    w2 = jnp.pad(dense(GTA_E1, GTA_E2), ((0, GTA_E1_PAD - GTA_E1), (0, 0)))
    w3 = dense(GTA_E2, 1).T                          # stored as a (1, E2) row

    params = dict(
        lstm=lstm_stacked(FEAT, LSTM_HIDDEN),
        # value/out projections of nn.MultiheadAttention omitted: the forward
        # pass only consumes attn_output_weights.
        mha=dict(
            wq=dense(LSTM_OUT, ATT_EMBED), bq=jnp.zeros((1, ATT_EMBED)),
            wk=dense(LSTM_OUT, ATT_EMBED), bk=jnp.zeros((1, ATT_EMBED)),
            wiq=dense(ATT_EMBED, ATT_EMBED), biq=jnp.zeros((1, ATT_EMBED)),
            wik=dense(ATT_EMBED, ATT_EMBED), bik=jnp.zeros((1, ATT_EMBED)),
        ),
        gta=dict(
            w1=w1, b1=jnp.zeros((1, GTA_E1_PAD)),
            gamma=jnp.ones((1, GTA_E1_PAD)), beta=jnp.zeros((1, GTA_E1_PAD)),
            w2=w2, b2=jnp.zeros((1, GTA_E2)),
            w3=w3, b3=jnp.zeros((1, 1)),
        ),
        enc=dict(we=dense(F_DIM, N_CLASSES), be=jnp.zeros((1, N_CLASSES))),
    )
    return params


# ------------------------- combinedModel.forward ------------------------------
def _forward_arrays(params, x):
    """Array-only forward (jitted). Mirrors combinedModel.forward (train mode)."""
    b, w, r, t = x.shape
    # input.reshape(B,1,time_points,R,T).permute(1,0,2,3,4)[0]
    sx = x.reshape(b, 1, TIME_POINTS, r, t).transpose(1, 0, 2, 3, 4)[0]   # (B,W,R,T)

    # per-region time series through the (injected) bi-LSTM
    lstm_in = sx.transpose(0, 2, 1, 3).reshape(b * r, w, t)               # (B*R,W,T)
    lstm_out = bilstm(lstm_in, params["lstm"])                            # (B*R,W,D)
    d = lstm_out.shape[-1]

    # feed sequences in (B*W) order: per-sequence attention is batch-order
    # independent and the weights reshape directly to (B, W, R*R), no transpose.
    inputs = (lstm_out.reshape(b, r, w, d)
              .transpose(0, 2, 1, 3)
              .reshape(b * w, r, d))                                      # (B*W,R,D)

    attn_w = multi_head_attention_weights(inputs, params["mha"])          # (B*W,R,R)
    attn_w = attn_w.reshape(b, w, r * r)                                  # free reshape

    fc, fc_sum, logits, tw = gta_attention_and_encode(
        attn_w, params["gta"], params["enc"])
    FC = fc.reshape(b, r, r)
    FC_sum = fc_sum.reshape(b, r, r)
    return logits, FC, FC_sum, tw


_jitted_forward = jax.jit(_forward_arrays)


def combined_model_forward(params, x):
    """Full return signature of combinedModel.forward (train mode)."""
    logits, FC, FC_sum, tw = _jitted_forward(params, x)
    return logits, FC, "FC2", FC_sum, tw, "attn_weights"


# ------------------------------- main ------------------------------------------
if __name__ == "__main__":
    key = jax.random.PRNGKey(0)
    k_param, k_x = jax.random.split(key)
    params = init_params(k_param)
    x = jax.random.normal(k_x, (B, TIME_POINTS, N_REGIONS, FEAT), jnp.float32)

    logits, FC, FC2, FC_sum, tw, aw_tag = combined_model_forward(params, x)
    jax.block_until_ready((logits, FC, FC_sum, tw))

    assert logits.shape == (B, N_CLASSES)
    assert FC.shape == (B, N_REGIONS, N_REGIONS)
    assert FC_sum.shape == (B, N_REGIONS, N_REGIONS)
    assert tw.shape == (B, TIME_POINTS)
    assert FC2 == "FC2" and aw_tag == "attn_weights"
    assert bool(jnp.isfinite(logits).all()) and bool(jnp.isfinite(FC).all())
    print("KERNEL_OK")
</pallas_src>

<mosaic_0001>
module attributes {stable_mosaic.version = 11 : i64} {
  func.func @_mha_weights_kernel(%arg0: i32, %arg1: memref<8x16x32xf32, #tpu.memory_space<vmem>>, %arg2: memref<32x512xbf16, #tpu.memory_space<vmem>>, %arg3: memref<1x512xf32, #tpu.memory_space<vmem>>, %arg4: memref<8x16x16xf32, #tpu.memory_space<vmem>>) attributes {dimension_semantics = [#tpu.dimension_semantics<parallel>], iteration_bounds = array<i64: 2>, scalar_prefetch = 0 : i64, scratch_operands = 0 : i64, tpu.core_type = #tpu.core_type<tc>, window_params = [{transform_indices = @transform_0, window_bounds = array<i64: 8, 16, 32>}, {pipeline_mode = #tpu.pipeline_mode<synchronous>, transform_indices = @transform_1, window_bounds = array<i64: 32, 512>}, {pipeline_mode = #tpu.pipeline_mode<synchronous>, transform_indices = @transform_2, window_bounds = array<i64: 1, 512>}, {transform_indices = @transform_3, window_bounds = array<i64: 8, 16, 16>}]} {
    %c0 = arith.constant 0 : index
    %c0_0 = arith.constant 0 : index
    %c0_1 = arith.constant 0 : index
    %0 = vector.load %arg1[%c0, %c0_0, %c0_1] : memref<8x16x32xf32, #tpu.memory_space<vmem>>, vector<8x16x32xf32>
    %1 = vector.shape_cast %0 : vector<8x16x32xf32> to vector<128x32xf32>
    %2 = arith.truncf %1 : vector<128x32xf32> to vector<128x32xbf16>
    %c0_2 = arith.constant 0 : index
    %c0_3 = arith.constant 0 : index
    %3 = vector.load %arg2[%c0_2, %c0_3] : memref<32x512xbf16, #tpu.memory_space<vmem>>, vector<32x512xbf16>
    %cst = arith.constant dense<0.000000e+00> : vector<128x512xf32>
    %4 = tpu.matmul %2, %3, %cst {dimension_numbers = #tpu.dot_dimension_numbers<[1], [0], [0], [1], [0, 0, 1, 1], [], []>} : vector<128x32xbf16>, vector<32x512xbf16>, vector<128x512xf32> -> vector<128x512xf32>
    %c0_4 = arith.constant 0 : index
    %c0_5 = arith.constant 0 : index
    %5 = vector.load %arg3[%c0_4, %c0_5] : memref<1x512xf32, #tpu.memory_space<vmem>>, vector<1x512xf32>
    %6 = vector.broadcast %5 : vector<1x512xf32> to vector<128x512xf32>
    %7 = arith.addf %4, %6 : vector<128x512xf32>
    %cst_6 = arith.constant 0.000000e+00 : f32
    %8 = vector.broadcast %cst_6 : f32 to vector<8x16x16xf32>
    %9 = vector.extract_strided_slice %7 {offsets = [0, 0], sizes = [128, 64], strides = [1, 1]} : vector<128x512xf32> to vector<128x64xf32>
    %cst_7 = arith.constant 1.250000e-01 : f32
    %10 = vector.broadcast %cst_7 : f32 to vector<128x64xf32>
    %11 = arith.mulf %9, %10 : vector<128x64xf32>
    %12 = vector.extract_strided_slice %7 {offsets = [0, 256], sizes = [128, 64], strides = [1, 1]} : vector<128x512xf32> to vector<128x64xf32>
    %13 = vector.shape_cast %11 : vector<128x64xf32> to vector<8x16x64xf32>
    %14 = arith.truncf %13 : vector<8x16x64xf32> to vector<8x16x64xbf16>
    %15 = vector.shape_cast %12 : vector<128x64xf32> to vector<8x16x64xf32>
    %16 = arith.truncf %15 : vector<8x16x64xf32> to vector<8x16x64xbf16>
    "tpu.trace_start"() <{level = 10 : i32, message = "nrd,nsd->nrs"}> : () -> ()
    %cst_8 = arith.constant dense<0.000000e+00> : vector<8x16x16xf32>
    %17 = tpu.matmul %14, %16, %cst_8 {dimension_numbers = #tpu.dot_dimension_numbers<[2], [2], [1], [1], [0, 0, 0, 1, 1, 1], [0], [0]>} : vector<8x16x64xbf16>, vector<8x16x64xbf16>, vector<8x16x16xf32> -> vector<8x16x16xf32>
    "tpu.trace_stop"() : () -> ()
    %cst_9 = arith.constant dense<0xFF800000> : vector<8x16xf32>
    %18 = vector.multi_reduction <maximumf>, %17, %cst_9 [2] : vector<8x16x16xf32> to vector<8x16xf32>
    %cst_10 = arith.constant 0xFF800000 : f32
    %19 = vector.broadcast %cst_10 : f32 to vector<8x16xf32>
    %20 = arith.maximumf %19, %18 : vector<8x16xf32>
    %21 = vector.shape_cast %20 : vector<8x16xf32> to vector<8x16x1xf32>
    %22 = vector.broadcast %21 : vector<8x16x1xf32> to vector<8x16x16xf32>
    %23 = arith.subf %17, %22 : vector<8x16x16xf32>
    %24 = math.exp %23 : vector<8x16x16xf32>
    %cst_11 = arith.constant dense<0.000000e+00> : vector<8x16xf32>
    %25 = vector.multi_reduction <add>, %24, %cst_11 [2] : vector<8x16x16xf32> to vector<8x16xf32>
    %26 = vector.shape_cast %25 : vector<8x16xf32> to vector<8x16x1xf32>
    %27 = vector.broadcast %26 : vector<8x16x1xf32> to vector<8x16x16xf32>
    %28 = arith.divf %24, %27 : vector<8x16x16xf32>
    %29 = arith.addf %8, %28 : vector<8x16x16xf32>
    %30 = vector.extract_strided_slice %7 {offsets = [0, 64], sizes = [128, 64], strides = [1, 1]} : vector<128x512xf32> to vector<128x64xf32>
    %cst_12 = arith.constant 1.250000e-01 : f32
    %31 = vector.broadcast %cst_12 : f32 to vector<128x64xf32>
    %32 = arith.mulf %30, %31 : vector<128x64xf32>
    %33 = vector.extract_strided_slice %7 {offsets = [0, 320], sizes = [128, 64], strides = [1, 1]} : vector<128x512xf32> to vector<128x64xf32>
    %34 = vector.shape_cast %32 : vector<128x64xf32> to vector<8x16x64xf32>
    %35 = arith.truncf %34 : vector<8x16x64xf32> to vector<8x16x64xbf16>
    %36 = vector.shape_cast %33 : vector<128x64xf32> to vector<8x16x64xf32>
    %37 = arith.truncf %36 : vector<8x16x64xf32> to vector<8x16x64xbf16>
    "tpu.trace_start"() <{level = 10 : i32, message = "nrd,nsd->nrs"}> : () -> ()
    %cst_13 = arith.constant dense<0.000000e+00> : vector<8x16x16xf32>
    %38 = tpu.matmul %35, %37, %cst_13 {dimension_numbers = #tpu.dot_dimension_numbers<[2], [2], [1], [1], [0, 0, 0, 1, 1, 1], [0], [0]>} : vector<8x16x64xbf16>, vector<8x16x64xbf16>, vector<8x16x16xf32> -> vector<8x16x16xf32>
    "tpu.trace_stop"() : () -> ()
    %cst_14 = arith.constant dense<0xFF800000> : vector<8x16xf32>
    %39 = vector.multi_reduction <maximumf>, %38, %cst_14 [2] : vector<8x16x16xf32> to vector<8x16xf32>
    %cst_15 = arith.constant 0xFF800000 : f32
    %40 = vector.broadcast %cst_15 : f32 to vector<8x16xf32>
    %41 = arith.maximumf %40, %39 : vector<8x16xf32>
    %42 = vector.shape_cast %41 : vector<8x16xf32> to vector<8x16x1xf32>
    %43 = vector.broadcast %42 : vector<8x16x1xf32> to vector<8x16x16xf32>
    %44 = arith.subf %38, %43 : vector<8x16x16xf32>
    %45 = math.exp %44 : vector<8x16x16xf32>
    %cst_16 = arith.constant dense<0.000000e+00> : vector<8x16xf32>
    %46 = vector.multi_reduction <add>, %45, %cst_16 [2] : vector<8x16x16xf32> to vector<8x16xf32>
    %47 = vector.shape_cast %46 : vector<8x16xf32> to vector<8x16x1xf32>
    %48 = vector.broadcast %47 : vector<8x16x1xf32> to vector<8x16x16xf32>
    %49 = arith.divf %45, %48 : vector<8x16x16xf32>
    %50 = arith.addf %29, %49 : vector<8x16x16xf32>
    %51 = vector.extract_strided_slice %7 {offsets = [0, 128], sizes = [128, 64], strides = [1, 1]} : vector<128x512xf32> to vector<128x64xf32>
    %cst_17 = arith.constant 1.250000e-01 : f32
    %52 = vector.broadcast %cst_17 : f32 to vector<128x64xf32>
    %53 = arith.mulf %51, %52 : vector<128x64xf32>
    %54 = vector.extract_strided_slice %7 {offsets = [0, 384], sizes = [128, 64], strides = [1, 1]} : vector<128x512xf32> to vector<128x64xf32>
    %55 = vector.shape_cast %53 : vector<128x64xf32> to vector<8x16x64xf32>
    %56 = arith.truncf %55 : vector<8x16x64xf32> to vector<8x16x64xbf16>
    %57 = vector.shape_cast %54 : vector<128x64xf32> to vector<8x16x64xf32>
    %58 = arith.truncf %57 : vector<8x16x64xf32> to vector<8x16x64xbf16>
    "tpu.trace_start"() <{level = 10 : i32, message = "nrd,nsd->nrs"}> : () -> ()
    %cst_18 = arith.constant dense<0.000000e+00> : vector<8x16x16xf32>
    %59 = tpu.matmul %56, %58, %cst_18 {dimension_numbers = #tpu.dot_dimension_numbers<[2], [2], [1], [1], [0, 0, 0, 1, 1, 1], [0], [0]>} : vector<8x16x64xbf16>, vector<8x16x64xbf16>, vector<8x16x16xf32> -> vector<8x16x16xf32>
    "tpu.trace_stop"() : () -> ()
    %cst_19 = arith.constant dense<0xFF800000> : vector<8x16xf32>
    %60 = vector.multi_reduction <maximumf>, %59, %cst_19 [2] : vector<8x16x16xf32> to vector<8x16xf32>
    %cst_20 = arith.constant 0xFF800000 : f32
    %61 = vector.broadcast %cst_20 : f32 to vector<8x16xf32>
    %62 = arith.maximumf %61, %60 : vector<8x16xf32>
    %63 = vector.shape_cast %62 : vector<8x16xf32> to vector<8x16x1xf32>
    %64 = vector.broadcast %63 : vector<8x16x1xf32> to vector<8x16x16xf32>
    %65 = arith.subf %59, %64 : vector<8x16x16xf32>
    %66 = math.exp %65 : vector<8x16x16xf32>
    %cst_21 = arith.constant dense<0.000000e+00> : vector<8x16xf32>
    %67 = vector.multi_reduction <add>, %66, %cst_21 [2] : vector<8x16x16xf32> to vector<8x16xf32>
    %68 = vector.shape_cast %67 : vector<8x16xf32> to vector<8x16x1xf32>
    %69 = vector.broadcast %68 : vector<8x16x1xf32> to vector<8x16x16xf32>
    %70 = arith.divf %66, %69 : vector<8x16x16xf32>
    %71 = arith.addf %50, %70 : vector<8x16x16xf32>
    %72 = vector.extract_strided_slice %7 {offsets = [0, 192], sizes = [128, 64], strides = [1, 1]} : vector<128x512xf32> to vector<128x64xf32>
    %cst_22 = arith.constant 1.250000e-01 : f32
    %73 = vector.broadcast %cst_22 : f32 to vector<128x64xf32>
    %74 = arith.mulf %72, %73 : vector<128x64xf32>
    %75 = vector.extract_strided_slice %7 {offsets = [0, 448], sizes = [128, 64], strides = [1, 1]} : vector<128x512xf32> to vector<128x64xf32>
    %76 = vector.shape_cast %74 : vector<128x64xf32> to vector<8x16x64xf32>
    %77 = arith.truncf %76 : vector<8x16x64xf32> to vector<8x16x64xbf16>
    %78 = vector.shape_cast %75 : vector<128x64xf32> to vector<8x16x64xf32>
    %79 = arith.truncf %78 : vector<8x16x64xf32> to vector<8x16x64xbf16>
    "tpu.trace_start"() <{level = 10 : i32, message = "nrd,nsd->nrs"}> : () -> ()
    %cst_23 = arith.constant dense<0.000000e+00> : vector<8x16x16xf32>
    %80 = tpu.matmul %77, %79, %cst_23 {dimension_numbers = #tpu.dot_dimension_numbers<[2], [2], [1], [1], [0, 0, 0, 1, 1, 1], [0], [0]>} : vector<8x16x64xbf16>, vector<8x16x64xbf16>, vector<8x16x16xf32> -> vector<8x16x16xf32>
    "tpu.trace_stop"() : () -> ()
    %cst_24 = arith.constant dense<0xFF800000> : vector<8x16xf32>
    %81 = vector.multi_reduction <maximumf>, %80, %cst_24 [2] : vector<8x16x16xf32> to vector<8x16xf32>
    %cst_25 = arith.constant 0xFF800000 : f32
    %82 = vector.broadcast %cst_25 : f32 to vector<8x16xf32>
    %83 = arith.maximumf %82, %81 : vector<8x16xf32>
    %84 = vector.shape_cast %83 : vector<8x16xf32> to vector<8x16x1xf32>
    %85 = vector.broadcast %84 : vector<8x16x1xf32> to vector<8x16x16xf32>
    %86 = arith.subf %80, %85 : vector<8x16x16xf32>
    %87 = math.exp %86 : vector<8x16x16xf32>
    %cst_26 = arith.constant dense<0.000000e+00> : vector<8x16xf32>
    %88 = vector.multi_reduction <add>, %87, %cst_26 [2] : vector<8x16x16xf32> to vector<8x16xf32>
    %89 = vector.shape_cast %88 : vector<8x16xf32> to vector<8x16x1xf32>
    %90 = vector.broadcast %89 : vector<8x16x1xf32> to vector<8x16x16xf32>
    %91 = arith.divf %87, %90 : vector<8x16x16xf32>
    %92 = arith.addf %71, %91 : vector<8x16x16xf32>
    %cst_27 = arith.constant 2.500000e-01 : f32
    %93 = vector.broadcast %cst_27 : f32 to vector<8x16x16xf32>
    %94 = arith.mulf %92, %93 : vector<8x16x16xf32>
    %c0_28 = arith.constant 0 : index
    %c0_29 = arith.constant 0 : index
    %c0_30 = arith.constant 0 : index
    %95 = vector.load %arg4[%c0_28, %c0_29, %c0_30] : memref<8x16x16xf32, #tpu.memory_space<vmem>>, vector<8x16x16xf32>
    tpu.vector_store %arg4[%c0_28, %c0_29, %c0_30], %94 {strides = array<i32>} : memref<8x16x16xf32, #tpu.memory_space<vmem>>, vector<8x16x16xf32>,
    return
  }
  func.func @transform_0(%arg0: i32) -> (i32, i32, i32) {
    %c0_i32 = arith.constant 0 : i32
    %c0_i32_0 = arith.constant 0 : i32
    %c0_i32_1 = arith.constant 0 : i32
    return %arg0, %c0_i32, %c0_i32_0 : i32, i32, i32
  }
  func.func @transform_1(%arg0: i32) -> (i32, i32) {
    %c0_i32 = arith.constant 0 : i32
    %c0_i32_0 = arith.constant 0 : i32
    %c0_i32_1 = arith.constant 0 : i32
    return %c0_i32, %c0_i32_0 : i32, i32
  }
  func.func @transform_2(%arg0: i32) -> (i32, i32) {
    %c0_i32 = arith.constant 0 : i32
    %c0_i32_0 = arith.constant 0 : i32
    %c0_i32_1 = arith.constant 0 : i32
    return %c0_i32, %c0_i32_0 : i32, i32
  }
  func.func @transform_3(%arg0: i32) -> (i32, i32, i32) {
    %c0_i32 = arith.constant 0 : i32
    %c0_i32_0 = arith.constant 0 : i32
    %c0_i32_1 = arith.constant 0 : i32
    return %arg0, %c0_i32, %c0_i32_0 : i32, i32, i32
  }
}

module attributes {stable_mosaic.version = 11 : i64} {
  func.func @_gta_encoder_kernel(%arg0: memref<2x8x256xf32, #tpu.memory_space<vmem>>, %arg1: memref<256x128xf32, #tpu.memory_space<vmem>>, %arg2: memref<1x128xf32, #tpu.memory_space<vmem>>, %arg3: memref<1x128xf32, #tpu.memory_space<vmem>>, %arg4: memref<1x128xf32, #tpu.memory_space<vmem>>, %arg5: memref<128x128xf32, #tpu.memory_space<vmem>>, %arg6: memref<1x128xf32, #tpu.memory_space<vmem>>, %arg7: memref<1x128xf32, #tpu.memory_space<vmem>>, %arg8: memref<1x1xf32, #tpu.memory_space<vmem>>, %arg9: memref<256x2xf32, #tpu.memory_space<vmem>>, %arg10: memref<1x2xf32, #tpu.memory_space<vmem>>, %arg11: memref<2x256xf32, #tpu.memory_space<vmem>>, %arg12: memref<2x256xf32, #tpu.memory_space<vmem>>, %arg13: memref<2x2xf32, #tpu.memory_space<vmem>>, %arg14: memref<16x1xf32, #tpu.memory_space<vmem>>) attributes {dimension_semantics = [], scalar_prefetch = 0 : i64, scratch_operands = 0 : i64, tpu.core_type = #tpu.core_type<tc>} {
    %c0 = arith.constant 0 : index
    %c0_0 = arith.constant 0 : index
    %c0_1 = arith.constant 0 : index
    %0 = vector.load %arg0[%c0, %c0_0, %c0_1] : memref<2x8x256xf32, #tpu.memory_space<vmem>>, vector<2x8x256xf32>
    %cst = arith.constant dense<0.000000e+00> : vector<2x256xf32>
    %1 = vector.multi_reduction <add>, %0, %cst [1] : vector<2x8x256xf32> to vector<2x256xf32>
    %2 = vector.shape_cast %1 : vector<2x256xf32> to vector<2x1x256xf32>
    %cst_2 = arith.constant 8.000000e+00 : f32
    %3 = vector.broadcast %cst_2 : f32 to vector<2x1x256xf32>
    %4 = arith.divf %2, %3 : vector<2x1x256xf32>
    %5 = vector.broadcast %4 : vector<2x1x256xf32> to vector<2x8x256xf32>
    %6 = arith.mulf %0, %5 : vector<2x8x256xf32>
    %7 = vector.shape_cast %6 : vector<2x8x256xf32> to vector<16x256xf32>
    %c0_3 = arith.constant 0 : index
    %c0_4 = arith.constant 0 : index
    %8 = vector.load %arg1[%c0_3, %c0_4] : memref<256x128xf32, #tpu.memory_space<vmem>>, vector<256x128xf32>
    %cst_5 = arith.constant dense<0.000000e+00> : vector<16x128xf32>
    %9 = tpu.matmul %7, %8, %cst_5 {dimension_numbers = #tpu.dot_dimension_numbers<[1], [0], [0], [1], [0, 0, 1, 1], [], []>} : vector<16x256xf32>, vector<256x128xf32>, vector<16x128xf32> -> vector<16x128xf32>
    %c0_6 = arith.constant 0 : index
    %c0_7 = arith.constant 0 : index
    %10 = vector.load %arg2[%c0_6, %c0_7] : memref<1x128xf32, #tpu.memory_space<vmem>>, vector<1x128xf32>
    %11 = vector.broadcast %10 : vector<1x128xf32> to vector<16x128xf32>
    %12 = arith.addf %9, %11 : vector<16x128xf32>
    %cst_8 = arith.constant dense<0.000000e+00> : vector<128xf32>
    %13 = vector.multi_reduction <add>, %12, %cst_8 [0] : vector<16x128xf32> to vector<128xf32>
    %14 = vector.shape_cast %13 : vector<128xf32> to vector<1x128xf32>
    %cst_9 = arith.constant 1.600000e+01 : f32
    %15 = vector.broadcast %cst_9 : f32 to vector<1x128xf32>
    %16 = arith.divf %14, %15 : vector<1x128xf32>
    %17 = vector.broadcast %16 : vector<1x128xf32> to vector<16x128xf32>
    %18 = arith.subf %12, %17 : vector<16x128xf32>
    %19 = arith.mulf %18, %18 : vector<16x128xf32>
    %cst_10 = arith.constant dense<0.000000e+00> : vector<128xf32>
    %20 = vector.multi_reduction <add>, %19, %cst_10 [0] : vector<16x128xf32> to vector<128xf32>
    %21 = vector.shape_cast %20 : vector<128xf32> to vector<1x128xf32>
    %cst_11 = arith.constant 1.600000e+01 : f32
    %22 = vector.broadcast %cst_11 : f32 to vector<1x128xf32>
    %23 = arith.divf %21, %22 : vector<1x128xf32>
    %24 = vector.broadcast %16 : vector<1x128xf32> to vector<16x128xf32>
    %25 = arith.subf %12, %24 : vector<16x128xf32>
    %cst_12 = arith.constant 9.99999974E-6 : f32
    %26 = vector.broadcast %cst_12 : f32 to vector<1x128xf32>
    %27 = arith.addf %23, %26 : vector<1x128xf32>
    %28 = math.rsqrt %27 : vector<1x128xf32>
    %29 = vector.broadcast %28 : vector<1x128xf32> to vector<16x128xf32>
    %30 = arith.mulf %25, %29 : vector<16x128xf32>
    %c0_13 = arith.constant 0 : index
    %c0_14 = arith.constant 0 : index
    %31 = vector.load %arg3[%c0_13, %c0_14] : memref<1x128xf32, #tpu.memory_space<vmem>>, vector<1x128xf32>
    %32 = vector.broadcast %31 : vector<1x128xf32> to vector<16x128xf32>
    %33 = arith.mulf %30, %32 : vector<16x128xf32>
    %c0_15 = arith.constant 0 : index
    %c0_16 = arith.constant 0 : index
    %34 = vector.load %arg4[%c0_15, %c0_16] : memref<1x128xf32, #tpu.memory_space<vmem>>, vector<1x128xf32>
    %35 = vector.broadcast %34 : vector<1x128xf32> to vector<16x128xf32>
    %36 = arith.addf %33, %35 : vector<16x128xf32>
    %cst_17 = arith.constant 0.000000e+00 : f32
    %37 = vector.broadcast %cst_17 : f32 to vector<16x128xf32>
    %38 = arith.maximumf %36, %37 : vector<16x128xf32>
    %c0_18 = arith.constant 0 : index
    %c0_19 = arith.constant 0 : index
    %39 = vector.load %arg5[%c0_18, %c0_19] : memref<128x128xf32, #tpu.memory_space<vmem>>, vector<128x128xf32>
    %cst_20 = arith.constant dense<0.000000e+00> : vector<16x128xf32>
    %40 = tpu.matmul %38, %39, %cst_20 {dimension_numbers = #tpu.dot_dimension_numbers<[1], [0], [0], [1], [0, 0, 1, 1], [], []>} : vector<16x128xf32>, vector<128x128xf32>, vector<16x128xf32> -> vector<16x128xf32>
    %c0_21 = arith.constant 0 : index
    %c0_22 = arith.constant 0 : index
    %41 = vector.load %arg6[%c0_21, %c0_22] : memref<1x128xf32, #tpu.memory_space<vmem>>, vector<1x128xf32>
    %42 = vector.broadcast %41 : vector<1x128xf32> to vector<16x128xf32>
    %43 = arith.addf %40, %42 : vector<16x128xf32>
    %cst_23 = arith.constant 0.000000e+00 : f32
    %44 = vector.broadcast %cst_23 : f32 to vector<16x128xf32>
    %45 = arith.maximumf %43, %44 : vector<16x128xf32>
    %c0_24 = arith.constant 0 : index
    %c0_25 = arith.constant 0 : index
    %46 = vector.load %arg7[%c0_24, %c0_25] : memref<1x128xf32, #tpu.memory_space<vmem>>, vector<1x128xf32>
    %47 = vector.broadcast %46 : vector<1x128xf32> to vector<16x128xf32>
    %48 = arith.mulf %45, %47 : vector<16x128xf32>
    %cst_26 = arith.constant dense<0.000000e+00> : vector<16xf32>
    %49 = vector.multi_reduction <add>, %48, %cst_26 [1] : vector<16x128xf32> to vector<16xf32>
    %50 = vector.shape_cast %49 : vector<16xf32> to vector<16x1xf32>
    %c0_27 = arith.constant 0 : index
    %c0_28 = arith.constant 0 : index
    %51 = vector.load %arg8[%c0_27, %c0_28] : memref<1x1xf32, #tpu.memory_space<vmem>>, vector<1x1xf32>
    %52 = vector.broadcast %51 : vector<1x1xf32> to vector<16x1xf32>
    %53 = arith.addf %50, %52 : vector<16x1xf32>
    %cst_29 = arith.constant 3.000000e+00 : f32
    %54 = vector.broadcast %cst_29 : f32 to vector<16x1xf32>
    %55 = arith.addf %53, %54 : vector<16x1xf32>
    %cst_30 = arith.constant 0.000000e+00 : f32
    %cst_31 = arith.constant 6.000000e+00 : f32
    %56 = vector.broadcast %cst_30 : f32 to vector<16x1xf32>
    %57 = arith.maximumf %56, %55 : vector<16x1xf32>
    %58 = vector.broadcast %cst_31 : f32 to vector<16x1xf32>
    %59 = arith.minimumf %58, %57 : vector<16x1xf32>
    %60 = arith.mulf %53, %59 : vector<16x1xf32>
    %cst_32 = arith.constant 0.166666672 : f32
    %61 = vector.broadcast %cst_32 : f32 to vector<16x1xf32>
    %62 = arith.mulf %60, %61 : vector<16x1xf32>
    %63 = vector.shape_cast %0 : vector<2x8x256xf32> to vector<16x256xf32>
    %64 = vector.broadcast %62 : vector<16x1xf32> to vector<16x256xf32>
    %65 = arith.mulf %63, %64 : vector<16x256xf32>
    %66 = vector.shape_cast %65 : vector<16x256xf32> to vector<2x8x256xf32>
    %cst_33 = arith.constant dense<0.000000e+00> : vector<2x256xf32>
    %67 = vector.multi_reduction <add>, %66, %cst_33 [1] : vector<2x8x256xf32> to vector<2x256xf32>
    %cst_34 = arith.constant 8.000000e+00 : f32
    %68 = vector.broadcast %cst_34 : f32 to vector<2x256xf32>
    %69 = arith.divf %67, %68 : vector<2x256xf32>
    %c0_35 = arith.constant 0 : index
    %c0_36 = arith.constant 0 : index
    %70 = vector.load %arg11[%c0_35, %c0_36] : memref<2x256xf32, #tpu.memory_space<vmem>>, vector<2x256xf32>
    tpu.vector_store %arg11[%c0_35, %c0_36], %69 {strides = array<i32>} : memref<2x256xf32, #tpu.memory_space<vmem>>, vector<2x256xf32>,
    %cst_37 = arith.constant dense<0.000000e+00> : vector<2x256xf32>
    %71 = vector.multi_reduction <add>, %0, %cst_37 [1] : vector<2x8x256xf32> to vector<2x256xf32>
    %cst_38 = arith.constant 8.000000e+00 : f32
    %72 = vector.broadcast %cst_38 : f32 to vector<2x256xf32>
    %73 = arith.divf %71, %72 : vector<2x256xf32>
    %c0_39 = arith.constant 0 : index
    %c0_40 = arith.constant 0 : index
    %74 = vector.load %arg12[%c0_39, %c0_40] : memref<2x256xf32, #tpu.memory_space<vmem>>, vector<2x256xf32>
    tpu.vector_store %arg12[%c0_39, %c0_40], %73 {strides = array<i32>} : memref<2x256xf32, #tpu.memory_space<vmem>>, vector<2x256xf32>,
    %c0_41 = arith.constant 0 : index
    %c0_42 = arith.constant 0 : index
    %75 = vector.load %arg9[%c0_41, %c0_42] : memref<256x2xf32, #tpu.memory_space<vmem>>, vector<256x2xf32>
    %cst_43 = arith.constant dense<0.000000e+00> : vector<2x2xf32>
    %76 = tpu.matmul %69, %75, %cst_43 {dimension_numbers = #tpu.dot_dimension_numbers<[1], [0], [0], [1], [0, 0, 1, 1], [], []>} : vector<2x256xf32>, vector<256x2xf32>, vector<2x2xf32> -> vector<2x2xf32>
    %c0_44 = arith.constant 0 : index
    %c0_45 = arith.constant 0 : index
    %77 = vector.load %arg10[%c0_44, %c0_45] : memref<1x2xf32, #tpu.memory_space<vmem>>, vector<1x2xf32>
    %78 = vector.broadcast %77 : vector<1x2xf32> to vector<2x2xf32>
    %79 = arith.addf %76, %78 : vector<2x2xf32>
    %c0_46 = arith.constant 0 : index
    %c0_47 = arith.constant 0 : index
    %80 = vector.load %arg13[%c0_46, %c0_47] : memref<2x2xf32, #tpu.memory_space<vmem>>, vector<2x2xf32>
    tpu.vector_store %arg13[%c0_46, %c0_47], %79 {strides = array<i32>} : memref<2x2xf32, #tpu.memory_space<vmem>>, vector<2x2xf32>,
    %c0_48 = arith.constant 0 : index
    %c0_49 = arith.constant 0 : index
    %81 = vector.load %arg14[%c0_48, %c0_49] : memref<16x1xf32, #tpu.memory_space<vmem>>, vector<16x1xf32>
    tpu.vector_store %arg14[%c0_48, %c0_49], %62 {strides = array<i32>} : memref<16x1xf32, #tpu.memory_space<vmem>>, vector<16x1xf32>,
    return
  }
}

</mosaic_0001>

<bundles_post_ra>
// kernel: custom-call.2
= control target key start
LH: loop header
LB: loop body
LE: loop exit
PB: predicated region body
PF: predicated region fallthrough
CT: control target
= control target key end

     0   :  { %s6_s0 = inlined_call_operand.vmem [shape: f32[8,2,32,16], index: 0, kind: output, shape index: {}]  }

// kernel: custom-call.1
= control target key start
LH: loop header
LB: loop body
LE: loop exit
PB: predicated region body
PF: predicated region fallthrough
CT: control target
= control target key end

     0   :  { %s6_s0 = inlined_call_operand.vmem [shape: f32[2,32,16], index: 0, kind: output, shape index: {}]  }

// kernel: custom-call
= control target key start
LH: loop header
LB: loop body
LE: loop exit
PB: predicated region body
PF: predicated region fallthrough
CT: control target
= control target key end

     0   :  { %s6_s0 = inlined_call_operand.vmem [shape: bf16[2,32,16], index: 0, kind: output, shape index: {}]  }

// kernel: _forward_arrays.3
= control target key start
LH: loop header
LB: loop body
LE: loop exit
PB: predicated region body
PF: predicated region fallthrough
CT: control target
= control target key end

     0   :  { %s1316_s0 = inlined_call_operand.vmem [shape: f32[2,8,256], index: 0, kind: input, shape index: {}]   ;;  %s1317_s1 = inlined_call_operand.vmem [shape: f32[256,128], index: 1, kind: input, shape index: {}]   ;;  %s1318_s2 = inlined_call_operand.vmem [shape: f32[1,128], index: 2, kind: input, shape index: {}]   ;;  %s1319_s3 = inlined_call_operand.vmem [shape: f32[1,128], index: 3, kind: input, shape index: {}]   ;;  %s1320_s4 = inlined_call_operand.vmem [shape: f32[1,128], index: 4, kind: input, shape index: {}]   ;;  %s1321_s5 = inlined_call_operand.vmem [shape: f32[128,128], index: 5, kind: input, shape index: {}]   ;;  %s1322_s6 = inlined_call_operand.vmem [shape: f32[1,128], index: 6, kind: input, shape index: {}]   ;;  %s1323_s7 = inlined_call_operand.vmem [shape: f32[1,128], index: 7, kind: input, shape index: {}]   ;;  %s1324_s8 = inlined_call_operand.<no memory space> [shape: f32[1,1], index: 8, kind: input, shape index: {}]   ;;  %s1325_s9 = inlined_call_operand.vmem [shape: f32[256,2], index: 9, kind: input, shape index: {}]   ;;  %s1326_s10 = inlined_call_operand.vmem [shape: f32[1,2], index: 10, kind: input, shape index: {}]   ;;  %s1327_s11 = inlined_call_operand.vmem [shape: f32[2,256], index: 11, kind: output, shape index: {0}]   ;;  %s1328_s12 = inlined_call_operand.vmem [shape: f32[2,256], index: 12, kind: output, shape index: {1}]   ;;  %s1329_s13 = inlined_call_operand.hbm [shape: f32[2,2], index: 13, kind: output, shape index: {2}]   ;;  %s1330_s14 = inlined_call_operand.vmem [shape: f32[16,1], index: 14, kind: output, shape index: {3}]  }
   0x1   :  { %v20_v0 = vstv %s1324_s8 }
   0x2   :  { %21 = vst [vmem:[#allocation2] sm:$0x1] %v20_v0 }
   0x3   :  { %v98_v1 = vld [vmem:[%s1317_s1 + $0x80] sm:$0xff]  ;;  %v99_v2 = vld [vmem:[%s1317_s1 + $0x88] sm:$0xff]  ;;  %v100_v6 = vld [vmem:[%s1317_s1 + $0x90] sm:$0xff] }
   0x4   :  { %v82_v3 = vld [vmem:[%s1317_s1] sm:$0xff]  ;;  %v756_v4 = vpack.c.bf16 %v99_v2, %v98_v1  ;;  %v83_v5 = vld [vmem:[%s1317_s1 + $0x8] sm:$0xff]  ;;  %v101_v7 = vld [vmem:[%s1317_s1 + $0x98] sm:$0xff] }
   0x5   :  { %v758_v8 = vpack.c.bf16 %v83_v5, %v82_v3  ;;  %v760_v9 = vpack.c.bf16 %v101_v7, %v100_v6  ;;  %v84_v10 = vld [vmem:[%s1317_s1 + $0x10] sm:$0xff]  ;;  %v85_v11 = vld [vmem:[%s1317_s1 + $0x18] sm:$0xff]  ;;  %v102_v12 = vld [vmem:[%s1317_s1 + $0xa0] sm:$0xff] }
   0x6   :  { %757 = vmatprep.subr.bf16.mxu0 %v756_v4  ;;  %v103_v13 = vld [vmem:[%s1317_s1 + $0xa8] sm:$0xff]  ;;  %v762_v14 = vpack.c.bf16 %v85_v11, %v84_v10  ;;  %v86_v16 = vld [vmem:[%s1317_s1 + $0x20] sm:$0xff]  ;;  %v104_v18 = vld [vmem:[%s1317_s1 + $0xb0] sm:$0xff] }
   0x7   :  { %759 = vmatpush3.bf16.msra.mxu0 %v758_v8  ;;  %v764_v15 = vpack.c.bf16 %v103_v13, %v102_v12  ;;  %v87_v17 = vld [vmem:[%s1317_s1 + $0x28] sm:$0xff]  ;;  %v105_v19 = vld [vmem:[%s1317_s1 + $0xb8] sm:$0xff]  ;;  %v88_v22 = vld [vmem:[%s1317_s1 + $0x30] sm:$0xff] }
   0x8   :  { %761 = vmatprep.subr.bf16.mxu0 %v760_v9  ;;  %v766_v20 = vpack.c.bf16 %v87_v17, %v86_v16  ;;  %v768_v21 = vpack.c.bf16 %v105_v19, %v104_v18  ;;  %v89_v23 = vld [vmem:[%s1317_s1 + $0x38] sm:$0xff]  ;;  %v106_v24 = vld [vmem:[%s1317_s1 + $0xc0] sm:$0xff]  ;;  %v107_v25 = vld [vmem:[%s1317_s1 + $0xc8] sm:$0xff] }
   0x9   :  { %v1021_v26 = vld [vmem:[%s1316_s0] sm:$0xff]  ;;  %v1026_v27 = vld [vmem:[%s1316_s0 + $0x8] sm:$0xff]  ;;  %v1032_v29 = vld [vmem:[%s1316_s0 + $0x18] sm:$0xff]  ;;  %v770_v31 = vpack.c.bf16 %v89_v23, %v88_v22 }
   0xa   :  { %v49_v28 = vrot.slane %v1021_v26, 4  ;;  %v1037_v30 = vld [vmem:[%s1316_s0 + $0x10] sm:$0xff]  ;;  %v55_v32 = vrot.slane %v1026_v27, 4  ;;  %v67_v33 = vrot.slane %v1032_v29, 4 }
   0xb   :  { %763 = vmatpush3.bf16.msra.mxu0 %v762_v14  ;;  %v61_v34 = vrot.slane %v1037_v30, 4 }
   0xc   :  { %765 = vmatprep.subr.bf16.mxu0 %v764_v15 }
   0xf   :  { %767 = vmatpush3.bf16.msra.mxu0 %v766_v20 }
  0x10   :  { %22 = vsyncpa [#allocation4], 0  ;;  %769 = vmatprep.subr.bf16.mxu0 %v768_v21  ;;  %v772_v35 = vpack.c.bf16 %v107_v25, %v106_v24  ;;  %v90_v36 = vld [vmem:[%s1317_s1 + $0x40] sm:$0xff]  ;;  %v91_v37 = vld [vmem:[%s1317_s1 + $0x48] sm:$0xff]  ;;  %v50_v38 = vadd.f32 %v49_v28, %v1021_v26  ;;  %v56_v41 = vadd.f32 %v55_v32, %v1026_v27  ;;  %v68_v42 = vadd.f32 %v67_v33, %v1032_v29  ;;  %s885_s15 = smov [#allocation3]  }
  0x11   :  { %v108_v39 = vld [vmem:[%s1317_s1 + $0xd0] sm:$0xff]  ;;  %v109_v40 = vld [vmem:[%s1317_s1 + $0xd8] sm:$0xff]  ;;  %v62_v43 = vadd.f32 %v61_v34, %v1037_v30  ;;  %v774_v45 = vpack.c.bf16 %v91_v37, %v90_v36  ;;  %v110_v53 = vld [vmem:[%s1317_s1 + $0xe0] sm:$0xff]  ;;  %vm594_vm0 = vcmask 7168   ;;  %vm440_vm1 = vcmask 1041409   ;;  %s607_s16 = sshll.u32 %s885_s15, 4  ;;  %s608_s16 = int_to_ptr.vmem [resolvable:$true] %s607_s16 }
  0x12   :  { %v51_v44 = vrot.slane %v50_v38, 2  ;;  %v57_v46 = vrot.slane %v56_v41, 2  ;;  %v69_v47 = vrot.slane %v68_v42, 2  ;;  %v776_v49 = vpack.c.bf16 %v109_v40, %v108_v39  ;;  %v92_v50 = vld [vmem:[%s1317_s1 + $0x50] sm:$0xff]  ;;  %v93_v51 = vld [vmem:[%s1317_s1 + $0x58] sm:$0xff]  ;;  %v111_v54 = vld [vmem:[%s1317_s1 + $0xe8] sm:$0xff]  ;;  %p864_p1 = scmp.lt.s32.totalorder %s608_s16, %s608_s16 }
  0x13   :  { %771 = vmatpush3.bf16.msra.mxu0 %v770_v31  ;;  %v63_v48 = vrot.slane %v62_v43, 2  ;;  %v778_v59 = vpack.c.bf16 %v93_v51, %v92_v50  ;;  %v780_v63 = vpack.c.bf16 %v111_v54, %v110_v53  ;;  %v94_v0 = vld [vmem:[%s1317_s1 + $0x60] sm:$0xff]  ;;  %v95_v1 = vld [vmem:[%s1317_s1 + $0x68] sm:$0xff]  ;;  %v112_v3 = vld [vmem:[%s1317_s1 + $0xf0] sm:$0xff]  ;;  %vm442_vm2 = vcmask 1043459  }
  0x14   :  { %773 = vmatprep.subr.bf16.mxu0 %v772_v35  ;;  %v52_v52 = vadd.f32 %v51_v44, %v50_v38  ;;  %v58_v55 = vadd.f32 %v57_v46, %v56_v41  ;;  %v70_v56 = vadd.f32 %v69_v47, %v68_v42  ;;  %v113_v4 = vld [vmem:[%s1317_s1 + $0xf8] sm:$0xff]  ;;  %v782_v8 = vpack.c.bf16 %v95_v1, %v94_v0  ;;  %v96_v12 = vld [vmem:[%s1317_s1 + $0x70] sm:$0xff]  ;;  %v241_v23 = vld [vmem:[%s1321_s5] sm:$0xff] }
  0x15   :  { %v64_v57 = vadd.f32 %v63_v48, %v62_v43  ;;  %v784_v11 = vpack.c.bf16 %v113_v4, %v112_v3  ;;  %v97_v13 = vld [vmem:[%s1317_s1 + $0x78] sm:$0xff]  ;;  %v242_v24 = vld [vmem:[%s1321_s5 + $0x8] sm:$0xff]  ;;  %v243_v25 = vld [vmem:[%s1321_s5 + $0x10] sm:$0xff]  ;;  %vm444_vm3 = vcmask 1045509   ;;  %vm446_vm4 = vcmask 1047559  }
  0x16   :  { %v53_v58 = vrot.slane %v52_v52, 1  ;;  %v59_v60 = vrot.slane %v58_v55, 1  ;;  %v71_v61 = vrot.slane %v70_v56, 1  ;;  %v786_v19 = vpack.c.bf16 %v97_v13, %v96_v12  ;;  %v244_v31 = vld [vmem:[%s1321_s5 + $0x18] sm:$0xff]  ;;  %v245_v33 = vld [vmem:[%s1321_s5 + $0x20] sm:$0xff]  ;;  %v246_v34 = vld [vmem:[%s1321_s5 + $0x28] sm:$0xff] }
  0x17   :  { %775 = vmatpush3.bf16.msra.mxu0 %v774_v45  ;;  %v65_v62 = vrot.slane %v64_v57, 1  ;;  %v788_v28 = vpack.c.bf16 %v242_v24, %v241_v23  ;;  %v792_v32 = vpack.c.bf16 %v244_v31, %v243_v25  ;;  %v796_v35 = vpack.c.bf16 %v246_v34, %v245_v33  ;;  %v247_v36 = vld [vmem:[%s1321_s5 + $0x30] sm:$0xff]  ;;  %v248_v37 = vld [vmem:[%s1321_s5 + $0x38] sm:$0xff]  ;;  %v249_v39 = vld [vmem:[%s1321_s5 + $0x40] sm:$0xff] }
  0x18   :  { %777 = vmatprep.subr.bf16.mxu0 %v776_v49  ;;  %v54_v2 = vadd.f32 %v53_v58, %v52_v52  ;;  %v60_v5 = vadd.f32 %v59_v60, %v58_v55  ;;  %v72_v6 = vadd.f32 %v71_v61, %v70_v56  ;;  %v800_v38 = vpack.c.bf16 %v248_v37, %v247_v36  ;;  %v250_v40 = vld [vmem:[%s1321_s5 + $0x48] sm:$0xff]  ;;  %v251_v42 = vld [vmem:[%s1321_s5 + $0x50] sm:$0xff]  ;;  %v252_v43 = vld [vmem:[%s1321_s5 + $0x58] sm:$0xff] }
  0x19   :  { %v66_v7 = vadd.f32 %v65_v62, %v64_v57  ;;  %789 = vmatprep.subr.bf16.mxu1 %v788_v28  ;;  %v804_v41 = vpack.c.bf16 %v250_v40, %v249_v39  ;;  %v808_v44 = vpack.c.bf16 %v252_v43, %v251_v42  ;;  %v253_v45 = vld [vmem:[%s1321_s5 + $0x60] sm:$0xff]  ;;  %v254_v46 = vld [vmem:[%s1321_s5 + $0x68] sm:$0xff]  ;;  %v255_v48 = vld [vmem:[%s1321_s5 + $0x70] sm:$0xff]  ;;  %vm592_vm5 = vcmask 9216  }
  0x1a   :  { %v1082_v9 = vmul.f32 0.125, %v54_v2  ;;  %v1084_v10 = vmul.f32 0.125, %v60_v5  ;;  %v1092_v14 = vmul.f32 0.125, %v72_v6  ;;  %791 = vmatpush3.bf16.msra.mxu1 %v788_v28  ;;  %v812_v47 = vpack.c.bf16 %v254_v46, %v253_v45  ;;  %v256_v49 = vld [vmem:[%s1321_s5 + $0x78] sm:$0xff]  ;;  %v623_v55 = vld [vmem:[%s1318_s2] ss:$0 sm:$0xff] }
  0x1b   :  { %779 = vmatpush3.bf16.msra.mxu0 %v778_v59  ;;  %v1094_v15 = vmul.f32 0.125, %v66_v7  ;;  %793 = vmatprep.subr.bf16.mxu1 %v792_v32  ;;  %v816_v50 = vpack.c.bf16 %v256_v49, %v255_v48  ;;  %v624_v24 = vld [vmem:[%s1319_s3] ss:$0 sm:$0xff]  ;;  %v883_v48 = vmov 0  }
  0x1c   :  { %781 = vmatprep.subr.bf16.mxu0 %v780_v63  ;;  %v79_v16 = vmul.f32 %v1084_v10, %v1026_v27  ;;  %v454_v17 = vcombine.low %v1082_v9, %v1084_v10  ;;  %v78_v20 = vmul.f32 %v1082_v9, %v1021_v26  ;;  %v81_v21 = vmul.f32 %v1092_v14, %v1032_v29  ;;  %v625_v31 = vld [vmem:[%s1320_s4] ss:$0 sm:$0xff] }
  0x1d   :  { %v462_v18 = vcombine.low %v1094_v15, %v1092_v14  ;;  %v80_v22 = vmul.f32 %v1094_v15, %v1037_v30  ;;  %v627_v43 = vld [vmem:[%s1323_s7] ss:$0 sm:$0xff]  ;;  %855 = vset.pattern.permute.xlu1 %v883_v48  ;;  %856 = vset.pattern.permute.xlu0 %v883_v48  ;;  %v884_v48 = vmov 1983009808  }
  0x1e   :  { %185 = vmatprep.mubr.f32.mxu0 %v79_v16  ;;  %795 = vmatpush3.bf16.msra.mxu1 %v792_v32  ;;  %v495_v49 = vld [vmem:[%s1325_s9 + $0x80] sm:$0xff] }
  0x1f   :  { %783 = vmatpush3.bf16.msra.mxu0 %v782_v8  ;;  %797 = vmatprep.subr.bf16.mxu1 %v796_v35 }
  0x20   :  { %785 = vmatprep.subr.bf16.mxu0 %v784_v11 }
  0x22   :  { %799 = vmatpush3.bf16.msra.mxu1 %v796_v35 }
  0x23   :  { %787 = vmatpush3.bf16.msra.mxu0 %v786_v19  ;;  %801 = vmatprep.subr.bf16.mxu1 %v800_v38 }
  0x26   :  { %186 = vmatmul.mubr.f32.vlgmr.msra.gmra.mrb[0].mxu0 %v78_v20  ;;  %803 = vmatpush3.bf16.msra.mxu1 %v800_v38  ;;  %v626_v38 = vld [vmem:[%s1322_s6] ss:$0 sm:$0xff] }
  0x27   :  { %190 = vmatprep.mubr.f32.mxu0 %v81_v21  ;;  %805 = vmatprep.subr.bf16.mxu1 %v804_v41 }
  0x2a   :  { %191 = vmatmul.mubr.f32.gmra.mrb[2].mxu0 %v80_v22  ;;  %807 = vmatpush3.bf16.msra.mxu1 %v804_v41 }
  0x2b   :  { %809 = vmatprep.subr.bf16.mxu1 %v808_v44 }
  0x2e   :  { %811 = vmatpush3.bf16.msra.mxu1 %v808_v44 }
  0x2f   :  { %813 = vmatprep.subr.bf16.mxu1 %v812_v47 }
  0x32   :  { %815 = vmatpush3.bf16.msra.mxu1 %v812_v47 }
  0x33   :  { %817 = vmatprep.subr.bf16.mxu1 %v816_v50 }
  0x36   :  { %819 = vmatpush3.bf16.msra.mxu1 %v816_v50  ;;  %v496_v50 = vld [vmem:[%s1325_s9 + $0x88] sm:$0xff] }
  0xf9   :  { %v662_v51 = vpop.f32.mrb[0].mxu0 }
  0xfa   :  { %v663_v52 = vpop.f32.mrb[1].mxu0 }
  0xfb   :  { %v664_v53 = vadd.f32 %v663_v52, %v662_v51  ;;  %v479_v51 = vld [vmem:[%s1325_s9] sm:$0xff]  ;;  %v820_v52 = vpack.c.bf16 %v496_v50, %v495_v49  ;;  %v421_v49 = vunpack.c.l.s4 %v884_v48  ;;  %v423_v50 = vlaneseq }
  0xfd   :  { %v665_v54 = vpop.f32.mrb[2].mxu0  ;;  %v188_v58 = vadd.f32 %v664_v53, %v623_v55  ;;  %v480_v53 = vld [vmem:[%s1325_s9 + $0x8] sm:$0xff]  ;;  %821 = vmatprep.subr.bf16.mxu0 %v820_v52  ;;  %v491_v52 = vld [vmem:[%s1325_s9 + $0x60] sm:$0xff] }
  0xfe   :  { %v666_v56 = vpop.f32.mrb[3].mxu0 }
  0xff   :  { %v667_v57 = vadd.f32 %v666_v56, %v665_v54  ;;  %v497_v54 = vld [vmem:[%s1325_s9 + $0x90] sm:$0xff]  ;;  %v822_v56 = vpack.c.bf16 %v480_v53, %v479_v51  ;;  %v492_v53 = vld [vmem:[%s1325_s9 + $0x68] sm:$0xff] }
 0x101   :  { %v193_v59 = vadd.f32 %v667_v57, %v623_v55  ;;  %v498_v55 = vld [vmem:[%s1325_s9 + $0x98] sm:$0xff]  ;;  %823 = vmatpush3.bf16.msra.mxu0 %v822_v56 }
 0x102   :  { %v824_v57 = vpack.c.bf16 %v498_v55, %v497_v54  ;;  %v846_v54 = vpack.c.bf16 %v492_v53, %v491_v52  ;;  %v509_v55 = vld [vmem:[%s1325_s9 + $0xf0] sm:$0xff]  ;;  %v510_v56 = vld [vmem:[%s1325_s9 + $0xf8] sm:$0xff]  ;;  %v629_v53 = vld [vmem:[%s1326_s10] ss:$0 sm:$0xff] }
 0x103   :  { %v196_v60 = vadd.f32 %v193_v59, %v188_v58 }
 0x104   :  { %825 = vmatprep.subr.bf16.mxu0 %v824_v57  ;;  %v422_v57 = vunpack.c.0.s8 %v421_v49 }
 0x105   :  { %v197_v61 = vrot.slane %v196_v60, 4 }
 0x107   :  { %v198_v62 = vadd.f32 %v197_v61, %v196_v60  ;;  %v499_v60 = vld [vmem:[%s1325_s9 + $0xa0] sm:$0xff]  ;;  %v500_v61 = vld [vmem:[%s1325_s9 + $0xa8] sm:$0xff] }
 0x109   :  { %v199_v63 = vrot.slane %v198_v62, 2 }
 0x10b   :  { %v200_v0 = vadd.f32 %v199_v63, %v198_v62  ;;  %v828_v63 = vpack.c.bf16 %v500_v61, %v499_v60  ;;  %v493_v60 = vld [vmem:[%s1325_s9 + $0x70] sm:$0xff]  ;;  %v494_v61 = vld [vmem:[%s1325_s9 + $0x78] sm:$0xff] }
 0x10d   :  { %v201_v1 = vrot.slane %v200_v0, 1 }
 0x10f   :  { %v202_v2 = vadd.f32 %v201_v1, %v200_v0  ;;  %v483_v0 = vld [vmem:[%s1325_s9 + $0x20] sm:$0xff]  ;;  %v484_v1 = vld [vmem:[%s1325_s9 + $0x28] sm:$0xff] }
 0x111   :  { %v204_v3 = vmul.f32 0.0625, %v202_v2  ;;  %v830_v2 = vpack.c.bf16 %v484_v1, %v483_v0 }
 0x113   :  { %v206_v4 = vsub.f32 %v193_v59, %v204_v3  ;;  %v205_v5 = vsub.f32 %v188_v58, %v204_v3  ;;  %v481_v58 = vld [vmem:[%s1325_s9 + $0x10] sm:$0xff]  ;;  %v482_v59 = vld [vmem:[%s1325_s9 + $0x18] sm:$0xff]  ;;  %v628_v3 = vld [vmem:[#allocation2] ss:$0 sm:$0xff] }
 0x114   :  { %v826_v62 = vpack.c.bf16 %v482_v59, %v481_v58  ;;  %v424_v58 = vshrl.u32 %v423_v50, 7  ;;  %v848_v59 = vpack.c.bf16 %v510_v56, %v509_v55 }
 0x115   :  { %v208_v6 = vmul.f32 %v206_v4, %v206_v4  ;;  %v207_v7 = vmul.f32 %v205_v5, %v205_v5 }
 0x116   :  { %827 = vmatpush3.bf16.msra.mxu0 %v826_v62  ;;  %v850_v62 = vpack.c.bf16 %v494_v61, %v493_v60 }
 0x117   :  { %v209_v8 = vadd.f32 %v208_v6, %v207_v7  ;;  %829 = vmatprep.subr.bf16.mxu0 %v828_v63  ;;  %v425_v63 = vsub.s32 %v422_v57, %v424_v58 }
 0x119   :  { %v210_v11 = vrot.slane %v209_v8, 4  ;;  %v469_v0 = vrot.slane %v462_v18, %v425_v63  ;;  %v461_v1 = vrot.slane %v454_v17, %v425_v63 }
 0x11a   :  { %831 = vmatpush3.bf16.msra.mxu0 %v830_v2 }
 0x11b   :  { %v211_v12 = vadd.f32 %v210_v11, %v209_v8  ;;  %v472_v2 = vrot.slane %v469_v0, 7 }
 0x11d   :  { %v212_v13 = vrot.slane %v211_v12, 2 }
 0x11f   :  { %v213_v16 = vadd.f32 %v212_v13, %v211_v12 }
 0x121   :  { %v214_v19 = vrot.slane %v213_v16, 1 }
 0x123   :  { %v215_v20 = vadd.f32 %v214_v19, %v213_v16 }
 0x125   :  { %v216_v21 = vmul.f32 0.0625, %v215_v20 }
 0x127   :  { %v217_v22 = vadd.f32 1e-05, %v216_v21 }
 0x129   :  { %857 = vrsqrt.f32 %v217_v22  ;;  %v501_v22 = vld [vmem:[%s1325_s9 + $0xb0] sm:$0xff] }
 0x133   :  { %v858_v23 = vpop.eup %857 }
 0x134   :  { %v219_v25 = vmul.f32 %v858_v23, %v205_v5  ;;  %v220_v28 = vmul.f32 %v858_v23, %v206_v4  ;;  %v502_v23 = vld [vmem:[%s1325_s9 + $0xb8] sm:$0xff] }
 0x136   :  { %v228_v32 = vmul.f32 %v624_v24, %v219_v25  ;;  %v229_v33 = vmul.f32 %v624_v24, %v220_v28  ;;  %v832_v25 = vpack.c.bf16 %v502_v23, %v501_v22  ;;  %v485_v28 = vld [vmem:[%s1325_s9 + $0x30] sm:$0xff] }
 0x138   :  { %v237_v34 = vadd.f32 %v625_v31, %v228_v32  ;;  %v238_v35 = vadd.f32 %v625_v31, %v229_v33  ;;  %v486_v31 = vld [vmem:[%s1325_s9 + $0x38] sm:$0xff]  ;;  %833 = vmatprep.subr.bf16.mxu0 %v832_v25 }
 0x139   :  { %v834_v32 = vpack.c.bf16 %v486_v31, %v485_v28 }
 0x13a   :  { %v239_v36 = vmax.f32 %v237_v34, 0.0  ;;  %v240_v37 = vmax.f32 %v238_v35, 0.0  ;;  %v503_v34 = vld [vmem:[%s1325_s9 + $0xc0] sm:$0xff]  ;;  %v504_v35 = vld [vmem:[%s1325_s9 + $0xc8] sm:$0xff] }
 0x13b   :  { %835 = vmatpush3.bf16.msra.mxu0 %v834_v32 }
 0x13c   :  { %753 = vmatprep.mubr.f32.mxu1 %v239_v36  ;;  %v836_v36 = vpack.c.bf16 %v504_v35, %v503_v34 }
 0x13d   :  { %754 = vmatmul.mubr.f32.vlgmr.msra.gmra.mrb[0].mxu1 %v240_v37  ;;  %v487_v37 = vld [vmem:[%s1325_s9 + $0x40] sm:$0xff] }
 0x13e   :  { %837 = vmatprep.subr.bf16.mxu0 %v836_v36 }
 0x210   :  { %v755_v39 = vpop.f32.mrb[0].mxu1 }
 0x211   :  { %v330_v40 = vpop.f32.mrb[1].mxu1  ;;  %v336_v41 = vadd.f32 %v755_v39, %v626_v38 }
 0x212   :  { %v331_v42 = vadd.f32 %v626_v38, %v330_v40  ;;  %v488_v38 = vld [vmem:[%s1325_s9 + $0x48] sm:$0xff]  ;;  %v505_v40 = vld [vmem:[%s1325_s9 + $0xd0] sm:$0xff] }
 0x213   :  { %v340_v45 = vmax.f32 %v336_v41, 0.0  ;;  %v838_v39 = vpack.c.bf16 %v488_v38, %v487_v37  ;;  %v506_v41 = vld [vmem:[%s1325_s9 + $0xd8] sm:$0xff] }
 0x214   :  { %v339_v44 = vmax.f32 %v331_v42, 0.0  ;;  %v840_v42 = vpack.c.bf16 %v506_v41, %v505_v40 }
 0x215   :  { %v349_v47 = vmul.f32 %v627_v43, %v340_v45  ;;  %839 = vmatpush3.bf16.msra.mxu0 %v838_v39 }
 0x216   :  { %v348_v46 = vmul.f32 %v627_v43, %v339_v44  ;;  %v489_v43 = vld [vmem:[%s1325_s9 + $0x50] sm:$0xff]  ;;  %v490_v44 = vld [vmem:[%s1325_s9 + $0x58] sm:$0xff]  ;;  %841 = vmatprep.subr.bf16.mxu0 %v840_v42 }
 0x217   :  { %v842_v45 = vpack.c.bf16 %v490_v44, %v489_v43 }
 0x218   :  { %350 = vadd.xlane.f32.xlu0 %v348_v46  ;;  %v507_v46 = vld [vmem:[%s1325_s9 + $0xe0] sm:$0xff] }
 0x219   :  { %843 = vmatpush3.bf16.msra.mxu0 %v842_v45 }
 0x21c   :  { %352 = vadd.xlane.f32.xlu0 %v349_v47  ;;  %v508_v47 = vld [vmem:[%s1325_s9 + $0xe8] sm:$0xff] }
 0x21d   :  { %v844_v51 = vpack.c.bf16 %v508_v47, %v507_v46 }
 0x21f   :  { %845 = vmatprep.subr.bf16.mxu0 %v844_v51 }
 0x220   :  { %847 = vmatpush3.bf16.msra.mxu0 %v846_v54 }
 0x221   :  { %849 = vmatprep.subr.bf16.mxu0 %v848_v59 }
 0x224   :  { %851 = vmatpush3.bf16.msra.mxu0 %v850_v62 }
 0x2a5   :  { %v351_v4 = vpop.xlane.xlu0 %350 }
 0x2a6   :  { %v361_v5 = vadd.f32 %v628_v3, %v351_v4 }
 0x2a8   :  { %v363_v6 = vadd.f32 3.0, %v361_v5 }
 0x2a9   :  { %v353_v7 = vpop.xlane.xlu0 %352 }
 0x2aa   :  { %v365_v8 = vmax.f32 %v363_v6, 0.0  ;;  %v362_v11 = vadd.f32 %v628_v3, %v353_v7  ;;  %v473_v3 = vsel %vm440_vm1, %v472_v2, %v461_v1 }
 0x2ab   :  { %v474_v4 = vsel %vm442_vm2, %v472_v2, %v473_v3 }
 0x2ac   :  { %v367_v12 = vmin.f32 %v365_v8, 6.0  ;;  %v364_v13 = vadd.f32 3.0, %v362_v11 }
 0x2ae   :  { %v366_v16 = vmax.f32 %v364_v13, 0.0  ;;  %v369_v19 = vmul.f32 %v367_v12, %v361_v5  ;;  %v475_v5 = vsel %vm444_vm3, %v472_v2, %v474_v4 }
 0x2af   :  { %v476_v6 = vsel %vm446_vm4, %v472_v2, %v475_v5 }
 0x2b0   :  { %v368_v20 = vmin.f32 %v366_v16, 6.0  ;;  %v371_v21 = vmul.f32 0.16666667, %v369_v19  ;;  %478 = vst [vmem:[%s1328_s12] sm:$0xf] %v476_v6 }
 0x2b2   :  { %v370_v24 = vmul.f32 %v368_v20, %v362_v11  ;;  %375 = vperm.xlu1 %855, %v371_v21   ;;  %595 = vst.msk [vmem:[%s1330_s14] sm:$0xff] %vm594_vm0, %v371_v21 }
 0x2b4   :  { %v372_v33 = vmul.f32 0.16666667, %v370_v24 }
 0x2b6   :  { %596 = vst.msk [vmem:[%s1330_s14 + $0x8] sm:$0xff] %vm594_vm0, %v372_v33  ;;  %380 = vperm.xlu1 %855, %v372_v33   ;;  %s859_s14 = scalar_lea.vmem %s608_s16, 32 }
 0x2b7   :  { %p860_p0 = scmp.ne.s32.totalorder %s608_s16, %s859_s14  ;;  %p865_p2 = scmp.lt.s32.totalorder %s859_s14, %s859_s14 }
 0x2b9   :  { %p866_p3 = por %p865_p2, %p864_p1 }
 0x2bb   :  { %p867_p4 = pnand %p866_p3, %p860_p0 }
 0x331   :  { %v376_v14 = vpop.permute.xlu1 %375 }
 0x332   :  { %v383_v9 = vmul.f32 %v376_v14, %v1021_v26  ;;  %v384_v10 = vmul.f32 %v376_v14, %v1026_v27 }
 0x334   :  { %v387_v15 = vrot.slane %v383_v9, 4  ;;  %v393_v17 = vrot.slane %v384_v10, 4 }
 0x335   :  { %v381_v18 = vpop.permute.xlu1 %380 }
 0x336   :  { %v388_v7 = vadd.f32 %v387_v15, %v383_v9  ;;  %v394_v8 = vadd.f32 %v393_v17, %v384_v10  ;;  %v385_v11 = vmul.f32 %v381_v18, %v1037_v30  ;;  %v386_v12 = vmul.f32 %v381_v18, %v1032_v29 }
 0x338   :  { %v389_v13 = vrot.slane %v388_v7, 2  ;;  %v395_v16 = vrot.slane %v394_v8, 2  ;;  %v399_v19 = vrot.slane %v385_v11, 4  ;;  %v405_v20 = vrot.slane %v386_v12, 4 }
 0x33a   :  { %v390_v21 = vadd.f32 %v389_v13, %v388_v7  ;;  %v396_v22 = vadd.f32 %v395_v16, %v394_v8  ;;  %v400_v23 = vadd.f32 %v399_v19, %v385_v11  ;;  %v406_v24 = vadd.f32 %v405_v20, %v386_v12 }
 0x33c   :  { %v391_v26 = vrot.slane %v390_v21, 1  ;;  %v397_v25 = vrot.slane %v396_v22, 1  ;;  %v401_v27 = vrot.slane %v400_v23, 2  ;;  %v407_v28 = vrot.slane %v406_v24, 2 }
 0x33e   :  { %v392_v31 = vadd.f32 %v391_v26, %v390_v21  ;;  %v402_v32 = vadd.f32 %v401_v27, %v400_v23  ;;  %v408_v33 = vadd.f32 %v407_v28, %v406_v24  ;;  %v398_v34 = vadd.f32 %v397_v25, %v396_v22 }
 0x340   :  { %v403_v35 = vrot.slane %v402_v32, 1  ;;  %v409_v30 = vrot.slane %v408_v33, 1  ;;  %v411_v36 = vmul.f32 0.125, %v392_v31  ;;  %v412_v38 = vmul.f32 0.125, %v398_v34 }
 0x342   :  { %v404_v29 = vadd.f32 %v403_v35, %v402_v32  ;;  %v410_v37 = vadd.f32 %v409_v30, %v408_v33  ;;  %v419_v41 = vcombine.low %v411_v36, %v412_v38 }
 0x344   :  { %v413_v39 = vmul.f32 0.125, %v404_v29  ;;  %v414_v40 = vmul.f32 0.125, %v410_v37  ;;  %v426_v46 = vrot.slane %v419_v41, %v425_v63 }
 0x346   :  { %v427_v42 = vcombine.low %v413_v39, %v414_v40  ;;  %v519_v43 = vsel %vm440_vm1, %v414_v40, %v412_v38  ;;  %v518_v44 = vsel %vm440_vm1, %v413_v39, %v411_v36 }
 0x347   :  { %586 = vmatprep.mubr.f32.mxu0 %v519_v43 }
 0x348   :  { %v434_v45 = vrot.slane %v427_v42, %v425_v63  ;;  %587 = vmatmul.mubr.f32.vlgmr.msra.gmra.mrb[4].mxu0 %v518_v44 }
 0x34a   :  { %v439_v47 = vrot.slane %v434_v45, 7 }
 0x34c   :  { %v441_v48 = vsel %vm440_vm1, %v439_v47, %v426_v46 }
 0x34d   :  { %v443_v49 = vsel %vm442_vm2, %v439_v47, %v441_v48 }
 0x34e   :  { %v445_v50 = vsel %vm444_vm3, %v439_v47, %v443_v49 }
 0x34f   :  { %v447_v51 = vsel %vm446_vm4, %v439_v47, %v445_v50 }
 0x350   :  { %449 = vst [vmem:[%s1327_s11] sm:$0xf] %v447_v51 }
 0x41b   :  { %v718_v52 = vpop.f32.mrb[4].mxu0 }
 0x41c   :  { %v719_v54 = vpop.f32.mrb[5].mxu0 }
 0x41d   :  { %v720_v55 = vadd.f32 %v719_v54, %v718_v52 }
 0x41f   :  { %v589_v56 = vadd.f32 %v720_v55, %v629_v53 }
 0x421   :  { %593 = vst.msk [vmem:[#allocation3] sm:$0x3] %vm592_vm5, %v589_v56 }
 0x422   :  { %870 = shalt.err (!%p867_p4)
}
 0x423   :  { %s871_s1 = scalar_lea.hbm %s1329_s13, 32 }
 0x424   :  { %p872_p5 = scmp.ne.s32.totalorder %s1329_s13, %s871_s1  ;;  %p875_p6 = scmp.lt.u32.totalorder %s871_s1, %s1329_s13 }
 0x426   :  { %p877_p7 = pnand %p875_p6, %p872_p5 }
 0x428   :  { %880 = shalt.err (!%p877_p7)
}
 0x429   :  { %610 = dma.vmem_to_hbm [thread:$0]  %s608_s16, 32, %s1329_s13, [#allocation4]  }
 0x42a   :  { %881 = dma.done.wait [#allocation4], 32  }
 0x42b   :  { %882 = vsyncadd [#allocation4], 4294967264 }
 0x42c   :  { %622 = vsyncpa [#allocation4], 1 }

// kernel: _forward_arrays.2
= control target key start
LH: loop header
LB: loop body
LE: loop exit
PB: predicated region body
PF: predicated region fallthrough
CT: control target
= control target key end

     0   :  { %s3688_s12 = smov 0   ;;  %s4911_s0 = inlined_call_operand.vmem [shape: f32[16,16,32], index: 0, kind: input, shape index: {}]   ;;  %s4912_s1 = inlined_call_operand.vmem [shape: bf16[32,512], index: 1, kind: input, shape index: {}]   ;;  %s4913_s2 = inlined_call_operand.vmem [shape: f32[1,512], index: 2, kind: input, shape index: {}]   ;;  %s4914_s3 = inlined_call_operand.vmem [shape: f32[16,16,16], index: 3, kind: output, shape index: {}]  }
   0x1 LB: > { %s3049_s13 = sadd.s32 4294967295, %s3662_s12   ;;  %p3053_p0 = scmp.ge.s32.totalorder %s3662_s12, 1  ;;  %s3662_s12 = sphi %s3688_s12, %s13_s12  }
   0x2   : > { %p139_p1 = scmp.lt.s32.totalorder %s3662_s12, 3 }
   0x4   : > { %p140_p2 = pnand %p3053_p0, %p139_p1 }
   0x6   : > { %143 = sbr.rel (%p140_p2) target bundleno = 1042 (0x412), region = 32 }
   0xd   : > { %v3388_v0 = vld [vmem:[%s4912_s1 + $0xc] ss:$16 sps:$4 sm:$0xff]   ;;  %s3054_s16 = sshll.u32 %s3049_s13, 3  ;;  %v3390_v1 = vld [vmem:[%s4912_s1 + $0x8] ss:$16 sps:$4 sm:$0xff]   ;;  %v3664_v2 = vmov 0   ;;  %v214_v34 = vlaneseq }
   0xe   : > { %444 = vmatprep.mubr.bf16.mxu1 %v3664_v2  ;;  %p166_p3 = scmp.lt.s32.totalorder %s3054_s16, 15  ;;  %331 = vmatprep.mubr.bf16.mxu0 %v3664_v2  ;;  %v3391_v3 = vld [vmem:[%s4912_s1 + $0x4] ss:$16 sps:$4 sm:$0xff]   ;;  %v3393_v4 = vld [vmem:[%s4912_s1] ss:$16 sps:$4 sm:$0xff]   ;;  %vm274_vm0 = vcmask 261120  }
   0xf   : > { %412 = vmatprep.subr.bf16.mxu1 %v3388_v0  ;;  %v3394_v5 = vld [vmem:[%s4912_s1 + $0x2c] ss:$16 sps:$4 sm:$0xff]   ;;  %v3396_v6 = vld [vmem:[%s4912_s1 + $0x28] ss:$16 sps:$4 sm:$0xff]   ;;  %299 = vmatprep.subr.bf16.mxu0 %v3391_v3  ;;  %v3397_v7 = vld [vmem:[%s4912_s1 + $0x24] ss:$16 sps:$4 sm:$0xff]  }
  0x10   : > { %413 = vmatpush1.bf16.msra.mxu1 %v3390_v1  ;;  %s5002_s16 = smov (!%p166_p3, %s3054_s16), 15  ;;  %300 = vmatpush1.bf16.msra.mxu0 %v3393_v4  ;;  %v3399_v8 = vld [vmem:[%s4912_s1 + $0x20] ss:$16 sps:$4 sm:$0xff]   ;;  %v3665_v33 = vmov 0.0   ;;  %vm3666_vm1 = vmmov 0   ;;  %v215_v35 = vshrl.u32 %v214_v34, 7 }
  0x11   : > { %414 = vmatprep.subr.bf16.mxu1 %v3394_v5  ;;  %s3118_s4 = sshll.u32 %s5002_s16, 4  ;;  %301 = vmatprep.subr.bf16.mxu0 %v3397_v7  ;;  %v212_v38 = vld [vmem:[%s4913_s2] sm:$0xf]  ;;  %vm557_vm2 = vcmask 523264   ;;  %s3667_s10 = smov 64   ;;  %vm934_vm3 = vcmask 130048  }
  0x12   : > { %s3730_s7 = scalar_lea.vmem %s4911_s0, %s3118_s4  ;;  %v224_v36 = vsub.s32 2, %v215_v35  ;;  %v216_v37 = vsub.s32 0, %v215_v35  ;;  %v228_v39 = vsub.s32 3, %v215_v35  ;;  %v220_v40 = vsub.s32 1, %v215_v35  ;;  %s4823_s14 = scalar_lea.vmem %s4914_s3, %s3118_s4 }
  0x13   : > { %v180_v9 = vld [vmem:[%s3730_s7] sm:$0xff]  ;;  %v181_v10 = vld [vmem:[%s3730_s7 + $0x8] sm:$0xff]  ;;  %v182_v12 = vld [vmem:[%s3730_s7 + $0x10] sm:$0xff] }
  0x14   : > { %415 = vmatpush1.bf16.msra.mxu1 %v3396_v6  ;;  %v196_v11 = vpack.c.bf16 %v181_v10, %v180_v9  ;;  %302 = vmatpush1.bf16.msra.mxu0 %v3399_v8  ;;  %v183_v13 = vld [vmem:[%s3730_s7 + $0x18] sm:$0xff]  ;;  %v184_v15 = vld [vmem:[%s3730_s7 + $0x20] sm:$0xff]  ;;  %v185_v16 = vld [vmem:[%s3730_s7 + $0x28] sm:$0xff]  ;;  %v3787_v41 = vrot.slane %v212_v38, %v224_v36  ;;  %v3789_v42 = vrot.slane %v212_v38, %v216_v37 }
  0x15   : > { %v197_v14 = vpack.c.bf16 %v183_v13, %v182_v12  ;;  %v198_v17 = vpack.c.bf16 %v185_v16, %v184_v15  ;;  %v186_v18 = vld [vmem:[%s3730_s7 + $0x30] sm:$0xff]  ;;  %v187_v19 = vld [vmem:[%s3730_s7 + $0x38] sm:$0xff]  ;;  %v188_v21 = vld [vmem:[%s3730_s7 + $0x40] sm:$0xff]  ;;  %3184 = vmatprep.subr.bf16.mxu0 %v3665_v33  ;;  %3190 = vmatprep.subr.bf16.mxu1 %v3665_v33  ;;  %v3791_v44 = vrot.slane %v212_v38, %v228_v39 }
  0x16   : > { %v199_v20 = vpack.c.bf16 %v187_v19, %v186_v18  ;;  %v189_v22 = vld [vmem:[%s3730_s7 + $0x48] sm:$0xff]  ;;  %v190_v24 = vld [vmem:[%s3730_s7 + $0x50] sm:$0xff]  ;;  %v191_v25 = vld [vmem:[%s3730_s7 + $0x58] sm:$0xff]  ;;  %v3793_v45 = vrot.slane %v212_v38, %v220_v40 }
  0x17   : > { %3076 = vmatmul.mubr.msk.bf16.vlgmr.msra.gmra.mrb[0].mxu1 %vm274_vm0, %v196_v11  ;;  %3068 = vmatmul.mubr.msk.bf16.vlgmr.msra.gmra.mrb[0].mxu0 %vm274_vm0, %v196_v11  ;;  %v200_v23 = vpack.c.bf16 %v189_v22, %v188_v21  ;;  %v201_v26 = vpack.c.bf16 %v191_v25, %v190_v24  ;;  %v192_v27 = vld [vmem:[%s3730_s7 + $0x60] sm:$0xff]  ;;  %v193_v28 = vld [vmem:[%s3730_s7 + $0x68] sm:$0xff]  ;;  %v194_v30 = vld [vmem:[%s3730_s7 + $0x70] sm:$0xff] }
  0x18   : > { %454 = vmatprep.mubr.bf16.mxu1 %v3664_v2  ;;  %341 = vmatprep.mubr.bf16.mxu0 %v3664_v2  ;;  %v202_v29 = vpack.c.bf16 %v193_v28, %v192_v27  ;;  %v195_v31 = vld [vmem:[%s3730_s7 + $0x78] sm:$0xff] }
  0x19   : > { %v203_v32 = vpack.c.bf16 %v195_v31, %v194_v30 }
  0x1f   : > { %3077 = vmatmul.mubr.msk.bf16.gmra.mrb[4].mxu1 %vm274_vm0, %v197_v14  ;;  %3069 = vmatmul.mubr.msk.bf16.gmra.mrb[4].mxu0 %vm274_vm0, %v197_v14 }
  0x20   : > { %464 = vmatprep.mubr.bf16.mxu1 %v3664_v2  ;;  %351 = vmatprep.mubr.bf16.mxu0 %v3664_v2 }
  0x27   : > { %3078 = vmatmul.mubr.msk.bf16.gmra.mrb[8].mxu1 %vm274_vm0, %v198_v17  ;;  %3070 = vmatmul.mubr.msk.bf16.gmra.mrb[8].mxu0 %vm274_vm0, %v198_v17 }
  0x28   : > { %474 = vmatprep.mubr.bf16.mxu1 %v3664_v2  ;;  %361 = vmatprep.mubr.bf16.mxu0 %v3664_v2 }
  0x2f   : > { %3079 = vmatmul.mubr.msk.bf16.gmra.mrb[12].mxu1 %vm274_vm0, %v199_v20  ;;  %3071 = vmatmul.mubr.msk.bf16.gmra.mrb[12].mxu0 %vm274_vm0, %v199_v20 }
  0x30   : > { %484 = vmatprep.mubr.bf16.mxu1 %v3664_v2  ;;  %371 = vmatprep.mubr.bf16.mxu0 %v3664_v2 }
  0x37   : > { %3080 = vmatmul.mubr.msk.bf16.gmra.mrb[16].mxu1 %vm274_vm0, %v200_v23  ;;  %3072 = vmatmul.mubr.msk.bf16.gmra.mrb[16].mxu0 %vm274_vm0, %v200_v23 }
  0x38   : > { %494 = vmatprep.mubr.bf16.mxu1 %v3664_v2  ;;  %381 = vmatprep.mubr.bf16.mxu0 %v3664_v2 }
  0x3f   : > { %3081 = vmatmul.mubr.msk.bf16.gmra.mrb[20].mxu1 %vm274_vm0, %v201_v26  ;;  %3073 = vmatmul.mubr.msk.bf16.gmra.mrb[20].mxu0 %vm274_vm0, %v201_v26 }
  0x40   : > { %504 = vmatprep.mubr.bf16.mxu1 %v3664_v2  ;;  %391 = vmatprep.mubr.bf16.mxu0 %v3664_v2 }
  0x47   : > { %3082 = vmatmul.mubr.msk.bf16.gmra.mrb[24].mxu1 %vm274_vm0, %v202_v29  ;;  %3074 = vmatmul.mubr.msk.bf16.gmra.mrb[24].mxu0 %vm274_vm0, %v202_v29 }
  0x48   : > { %514 = vmatprep.mubr.bf16.mxu1 %v3664_v2  ;;  %401 = vmatprep.mubr.bf16.mxu0 %v3664_v2 }
  0x4f   : > { %3083 = vmatmul.mubr.msk.bf16.gmra.mrb[28].mxu1 %vm274_vm0, %v203_v32  ;;  %3075 = vmatmul.mubr.msk.bf16.gmra.mrb[28].mxu0 %vm274_vm0, %v203_v32 }
  0x50   : > { %3186 = vmatprep.mubr.msk.bf16.mxu0 %vm3666_vm1, %v3665_v33  ;;  %3192 = vmatprep.mubr.msk.bf16.mxu1 %vm3666_vm1, %v3665_v33 }
  0xea   : > { %v446_v43 = vpop.f32.mrb[0].mxu1  ;;  %v333_v48 = vpop.f32.mrb[0].mxu0 }
  0xeb   : > { %v448_v46 = vpop.f32.mrb[1].mxu1  ;;  %v447_v49 = vadd.f32 %v446_v43, %v3787_v41  ;;  %v334_v52 = vadd.f32 %v333_v48, %v3789_v42  ;;  %v335_v53 = vpop.f32.mrb[1].mxu0 }
  0xec   : > { %v450_v47 = vpop.f32.mrb[2].mxu1  ;;  %v449_v54 = vadd.f32 %v448_v46, %v3791_v44  ;;  %v336_v56 = vadd.f32 %v335_v53, %v3793_v45  ;;  %v337_v57 = vpop.f32.mrb[2].mxu0 }
  0xed   : > { %v451_v50 = vadd.f32 %v450_v47, %v3787_v41  ;;  %v452_v51 = vpop.f32.mrb[3].mxu1  ;;  %v525_v58 = vmul.f32 0.125, %v334_v52  ;;  %v338_v60 = vadd.f32 %v337_v57, %v3789_v42  ;;  %v339_v61 = vpop.f32.mrb[3].mxu0 }
  0xee   : > { %v453_v55 = vadd.f32 %v452_v51, %v3791_v44  ;;  %v1743_v63 = vmul.f32 0.125, %v336_v56  ;;  %v340_v0 = vadd.f32 %v339_v61, %v3793_v45 }
  0xef   : > { %v549_v59 = vpack.c.bf16 %v451_v50, %v447_v49  ;;  %v526_v1 = vmul.f32 0.125, %v338_v60 }
  0xf0   : > { %v3802_v62 = vpack.c.bf16 %v453_v55, %v449_v54  ;;  %v1744_v4 = vmul.f32 0.125, %v340_v0 }
  0xf1   : > { %1131 = vrot.lane.b32.xlu0 %v549_v59, %s3667_s10  ;;  %v562_v2 = vsel %vm557_vm2, %v549_v59, 0  ;;  %v541_v6 = vpack.c.bf16 %v526_v1, %v525_v58 }
  0xf2   : > { %v456_v3 = vpop.f32.mrb[4].mxu1  ;;  %3185 = vmatpush3.bf16.xpose.msra.mxu0 %v562_v2  ;;  %v3808_v8 = vpack.c.bf16 %v1744_v4, %v1743_v63  ;;  %v343_v9 = vpop.f32.mrb[4].mxu0 }
  0xf3   : > { %v458_v5 = vpop.f32.mrb[5].mxu1  ;;  %3196 = vmatprep.subr.bf16.mxu0 %v3665_v33  ;;  %v457_v10 = vadd.f32 %v456_v3, %v3787_v41  ;;  %v344_v13 = vadd.f32 %v343_v9, %v3789_v42  ;;  %v345_v14 = vpop.f32.mrb[5].mxu0  ;;  %1128 = vrot.lane.b32.xlu1 %v541_v6, %s3667_s10 }
  0xf4   : > { %v460_v7 = vpop.f32.mrb[6].mxu1  ;;  %v459_v15 = vadd.f32 %v458_v5, %v3791_v44  ;;  %v346_v17 = vadd.f32 %v345_v14, %v3793_v45  ;;  %v347_v18 = vpop.f32.mrb[6].mxu0 }
  0xf5   : > { %v461_v11 = vadd.f32 %v460_v7, %v3787_v41  ;;  %v462_v12 = vpop.f32.mrb[7].mxu1  ;;  %v527_v20 = vmul.f32 0.125, %v344_v13  ;;  %v348_v21 = vadd.f32 %v347_v18, %v3789_v42  ;;  %v349_v22 = vpop.f32.mrb[7].mxu0 }
  0xf6   : > { %v463_v16 = vadd.f32 %v462_v12, %v3791_v44  ;;  %v1745_v24 = vmul.f32 0.125, %v346_v17  ;;  %v350_v25 = vadd.f32 %v349_v22, %v3793_v45 }
  0xf7   : > { %v550_v19 = vpack.c.bf16 %v461_v11, %v457_v10  ;;  %v528_v26 = vmul.f32 0.125, %v348_v21 }
  0xf8   : > { %v3818_v23 = vpack.c.bf16 %v463_v16, %v459_v15  ;;  %v1746_v29 = vmul.f32 0.125, %v350_v25 }
  0xf9   : > { %1184 = vrot.lane.b32.xlu0 %v550_v19, %s3667_s10  ;;  %3187 = vmatmul.mubr.msk.bf16.vlgmr.msra.gmra.mrb[32].mxu0 %vm557_vm2, %v541_v6  ;;  %v609_v27 = vsel %vm557_vm2, %v550_v19, 0  ;;  %v542_v30 = vpack.c.bf16 %v528_v26, %v527_v20 }
  0xfa   : > { %v466_v28 = vpop.f32.mrb[8].mxu1  ;;  %3191 = vmatpush3.bf16.xpose.msra.mxu1 %v609_v27  ;;  %3198 = vmatprep.mubr.msk.bf16.mxu0 %vm3666_vm1, %v3665_v33  ;;  %v3828_v35 = vpack.c.bf16 %v1746_v29, %v1745_v24  ;;  %v353_v36 = vpop.f32.mrb[8].mxu0 }
  0xfb   : > { %v467_v31 = vadd.f32 %v466_v28, %v3787_v41  ;;  %v468_v32 = vpop.f32.mrb[9].mxu1  ;;  %3202 = vmatprep.subr.bf16.mxu1 %v3665_v33  ;;  %v354_v38 = vadd.f32 %v353_v36, %v3789_v42  ;;  %v355_v40 = vpop.f32.mrb[9].mxu0  ;;  %1181 = vrot.lane.b32.xlu1 %v542_v30, %s3667_s10 }
  0xfc   : > { %v470_v34 = vpop.f32.mrb[10].mxu1  ;;  %v469_v43 = vadd.f32 %v468_v32, %v3791_v44  ;;  %v356_v47 = vadd.f32 %v355_v40, %v3793_v45  ;;  %v357_v48 = vpop.f32.mrb[10].mxu0 }
  0xfd   : > { %v471_v37 = vadd.f32 %v470_v34, %v3787_v41  ;;  %v472_v39 = vpop.f32.mrb[11].mxu1  ;;  %v529_v50 = vmul.f32 0.125, %v354_v38  ;;  %v358_v51 = vadd.f32 %v357_v48, %v3789_v42  ;;  %v359_v52 = vpop.f32.mrb[11].mxu0 }
  0xfe   : > { %v473_v46 = vadd.f32 %v472_v39, %v3791_v44  ;;  %v1747_v54 = vmul.f32 0.125, %v356_v47  ;;  %v360_v55 = vadd.f32 %v359_v52, %v3793_v45 }
  0xff   : > { %v551_v49 = vpack.c.bf16 %v471_v37, %v467_v31  ;;  %v530_v56 = vmul.f32 0.125, %v358_v51 }
 0x100   : > { %v3837_v53 = vpack.c.bf16 %v473_v46, %v469_v43  ;;  %v1748_v59 = vmul.f32 0.125, %v360_v55 }
 0x101   : > { %1237 = vrot.lane.b32.xlu0 %v551_v49, %s3667_s10  ;;  %3193 = vmatmul.mubr.msk.bf16.vlgmr.msra.gmra.mrb[32].mxu1 %vm557_vm2, %v542_v30  ;;  %v656_v57 = vsel %vm557_vm2, %v551_v49, 0  ;;  %v543_v60 = vpack.c.bf16 %v530_v56, %v529_v50 }
 0x102   : > { %v476_v58 = vpop.f32.mrb[12].mxu1  ;;  %3197 = vmatpush3.bf16.xpose.msra.mxu0 %v656_v57  ;;  %3204 = vmatprep.mubr.msk.bf16.mxu1 %vm3666_vm1, %v3665_v33  ;;  %v3847_v1 = vpack.c.bf16 %v1748_v59, %v1747_v54  ;;  %v363_v2 = vpop.f32.mrb[12].mxu0 }
 0x103   : > { %v477_v61 = vadd.f32 %v476_v58, %v3787_v41  ;;  %v478_v63 = vpop.f32.mrb[13].mxu1  ;;  %3208 = vmatprep.subr.bf16.mxu0 %v3665_v33  ;;  %v364_v4 = vadd.f32 %v363_v2, %v3789_v42  ;;  %v365_v5 = vpop.f32.mrb[13].mxu0 }
 0x104   : > { %v480_v0 = vpop.f32.mrb[14].mxu1  ;;  %v479_v7 = vadd.f32 %v478_v63, %v3791_v44  ;;  %v366_v9 = vadd.f32 %v365_v5, %v3793_v45  ;;  %v367_v11 = vpop.f32.mrb[14].mxu0 }
 0x105   : > { %v481_v3 = vadd.f32 %v480_v0, %v3787_v41  ;;  %v482_v6 = vpop.f32.mrb[15].mxu1  ;;  %1234 = vrot.lane.b32.xlu0 %v543_v60, %s3667_s10  ;;  %v531_v13 = vmul.f32 0.125, %v364_v4  ;;  %v368_v14 = vadd.f32 %v367_v11, %v3789_v42  ;;  %v369_v15 = vpop.f32.mrb[15].mxu0 }
 0x106   : > { %v483_v10 = vadd.f32 %v482_v6, %v3791_v44  ;;  %v1749_v16 = vmul.f32 0.125, %v366_v9  ;;  %v370_v18 = vadd.f32 %v369_v15, %v3793_v45 }
 0x107   : > { %v552_v12 = vpack.c.bf16 %v481_v3, %v477_v61  ;;  %v532_v19 = vmul.f32 0.125, %v368_v14 }
 0x108   : > { %v3856_v17 = vpack.c.bf16 %v483_v10, %v479_v7  ;;  %v1750_v22 = vmul.f32 0.125, %v370_v18 }
 0x109   : > { %1290 = vrot.lane.b32.xlu1 %v552_v12, %s3667_s10  ;;  %3199 = vmatmul.mubr.msk.bf16.vlgmr.msra.gmra.mrb[36].mxu0 %vm557_vm2, %v543_v60  ;;  %v703_v20 = vsel %vm557_vm2, %v552_v12, 0  ;;  %v544_v24 = vpack.c.bf16 %v532_v19, %v531_v13 }
 0x10a   : > { %v486_v21 = vpop.f32.mrb[16].mxu1  ;;  %3203 = vmatpush3.bf16.xpose.msra.mxu1 %v703_v20  ;;  %3210 = vmatprep.mubr.msk.bf16.mxu0 %vm3666_vm1, %v3665_v33  ;;  %v3866_v28 = vpack.c.bf16 %v1750_v22, %v1749_v16  ;;  %v373_v29 = vpop.f32.mrb[16].mxu0 }
 0x10b   : > { %v487_v25 = vadd.f32 %v486_v21, %v3787_v41  ;;  %v488_v26 = vpop.f32.mrb[17].mxu1  ;;  %3214 = vmatprep.subr.bf16.mxu1 %v3665_v33  ;;  %v374_v31 = vadd.f32 %v373_v29, %v3789_v42  ;;  %v375_v32 = vpop.f32.mrb[17].mxu0 }
 0x10c   : > { %v490_v27 = vpop.f32.mrb[18].mxu1  ;;  %v489_v36 = vadd.f32 %v488_v26, %v3791_v44  ;;  %v376_v37 = vadd.f32 %v375_v32, %v3793_v45  ;;  %v377_v39 = vpop.f32.mrb[18].mxu0 }
 0x10d   : > { %v491_v30 = vadd.f32 %v490_v27, %v3787_v41  ;;  %v492_v34 = vpop.f32.mrb[19].mxu1  ;;  %1287 = vrot.lane.b32.xlu1 %v544_v24, %s3667_s10  ;;  %v533_v43 = vmul.f32 0.125, %v374_v31  ;;  %v378_v46 = vadd.f32 %v377_v39, %v3789_v42  ;;  %v379_v47 = vpop.f32.mrb[19].mxu0 }
 0x10e   : > { %v493_v38 = vadd.f32 %v492_v34, %v3791_v44  ;;  %v1751_v48 = vmul.f32 0.125, %v376_v37  ;;  %v380_v50 = vadd.f32 %v379_v47, %v3793_v45 }
 0x10f   : > { %v553_v40 = vpack.c.bf16 %v491_v30, %v487_v25  ;;  %v534_v51 = vmul.f32 0.125, %v378_v46 }
 0x110   : > { %v3875_v49 = vpack.c.bf16 %v493_v38, %v489_v36  ;;  %v1752_v55 = vmul.f32 0.125, %v380_v50 }
 0x111   : > { %1343 = vrot.lane.b32.xlu0 %v553_v40, %s3667_s10  ;;  %3205 = vmatmul.mubr.msk.bf16.vlgmr.msra.gmra.mrb[36].mxu1 %vm557_vm2, %v544_v24  ;;  %v750_v52 = vsel %vm557_vm2, %v553_v40, 0  ;;  %v545_v56 = vpack.c.bf16 %v534_v51, %v533_v43 }
 0x112   : > { %v496_v54 = vpop.f32.mrb[20].mxu1  ;;  %3209 = vmatpush3.bf16.xpose.msra.mxu0 %v750_v52  ;;  %3216 = vmatprep.mubr.msk.bf16.mxu1 %vm3666_vm1, %v3665_v33  ;;  %v3885_v60 = vpack.c.bf16 %v1752_v55, %v1751_v48  ;;  %v383_v61 = vpop.f32.mrb[20].mxu0 }
 0x113   : > { %v497_v57 = vadd.f32 %v496_v54, %v3787_v41  ;;  %v498_v58 = vpop.f32.mrb[21].mxu1  ;;  %3220 = vmatprep.subr.bf16.mxu0 %v3665_v33  ;;  %v384_v0 = vadd.f32 %v383_v61, %v3789_v42  ;;  %v385_v2 = vpop.f32.mrb[21].mxu0 }
 0x114   : > { %v500_v59 = vpop.f32.mrb[22].mxu1  ;;  %v499_v4 = vadd.f32 %v498_v58, %v3791_v44  ;;  %v386_v5 = vadd.f32 %v385_v2, %v3793_v45  ;;  %v387_v7 = vpop.f32.mrb[22].mxu0 }
 0x115   : > { %v501_v63 = vadd.f32 %v500_v59, %v3787_v41  ;;  %v502_v3 = vpop.f32.mrb[23].mxu1  ;;  %1340 = vrot.lane.b32.xlu0 %v545_v56, %s3667_s10  ;;  %v535_v10 = vmul.f32 0.125, %v384_v0  ;;  %v388_v11 = vadd.f32 %v387_v7, %v3789_v42  ;;  %v389_v12 = vpop.f32.mrb[23].mxu0 }
 0x116   : > { %v503_v6 = vadd.f32 %v502_v3, %v3791_v44  ;;  %v1753_v13 = vmul.f32 0.125, %v386_v5  ;;  %v390_v15 = vadd.f32 %v389_v12, %v3793_v45 }
 0x117   : > { %v554_v9 = vpack.c.bf16 %v501_v63, %v497_v57  ;;  %v536_v16 = vmul.f32 0.125, %v388_v11 }
 0x118   : > { %v3894_v14 = vpack.c.bf16 %v503_v6, %v499_v4  ;;  %v1754_v20 = vmul.f32 0.125, %v390_v15 }
 0x119   : > { %1396 = vrot.lane.b32.xlu1 %v554_v9, %s3667_s10  ;;  %3211 = vmatmul.mubr.msk.bf16.vlgmr.msra.gmra.mrb[40].mxu0 %vm557_vm2, %v545_v56  ;;  %v797_v18 = vsel %vm557_vm2, %v554_v9, 0  ;;  %v546_v21 = vpack.c.bf16 %v536_v16, %v535_v10 }
 0x11a   : > { %v506_v19 = vpop.f32.mrb[24].mxu1  ;;  %3215 = vmatpush3.bf16.xpose.msra.mxu1 %v797_v18  ;;  %3222 = vmatprep.mubr.msk.bf16.mxu0 %vm3666_vm1, %v3665_v33  ;;  %v3904_v25 = vpack.c.bf16 %v1754_v20, %v1753_v13  ;;  %v393_v26 = vpop.f32.mrb[24].mxu0 }
 0x11b   : > { %v507_v22 = vadd.f32 %v506_v19, %v3787_v41  ;;  %v508_v24 = vpop.f32.mrb[25].mxu1  ;;  %3226 = vmatprep.subr.bf16.mxu1 %v3665_v33  ;;  %v394_v29 = vadd.f32 %v393_v26, %v3789_v42  ;;  %v395_v31 = vpop.f32.mrb[25].mxu0 }
 0x11c   : > { %v510_v27 = vpop.f32.mrb[26].mxu1  ;;  %v509_v34 = vadd.f32 %v508_v24, %v3791_v44  ;;  %v396_v36 = vadd.f32 %v395_v31, %v3793_v45  ;;  %v397_v37 = vpop.f32.mrb[26].mxu0 }
 0x11d   : > { %v511_v30 = vadd.f32 %v510_v27, %v3787_v41  ;;  %v512_v32 = vpop.f32.mrb[27].mxu1  ;;  %1393 = vrot.lane.b32.xlu1 %v546_v21, %s3667_s10  ;;  %v537_v39 = vmul.f32 0.125, %v394_v29  ;;  %v398_v43 = vadd.f32 %v397_v37, %v3789_v42  ;;  %v399_v46 = vpop.f32.mrb[27].mxu0 }
 0x11e   : > { %v513_v38 = vadd.f32 %v512_v32, %v3791_v44  ;;  %v1755_v47 = vmul.f32 0.125, %v396_v36  ;;  %v400_v50 = vadd.f32 %v399_v46, %v3793_v45 }
 0x11f   : > { %v555_v40 = vpack.c.bf16 %v511_v30, %v507_v22  ;;  %v538_v51 = vmul.f32 0.125, %v398_v43 }
 0x120   : > { %v3913_v48 = vpack.c.bf16 %v513_v38, %v509_v34  ;;  %v1756_v55 = vmul.f32 0.125, %v400_v50 }
 0x121   : > { %1449 = vrot.lane.b32.xlu0 %v555_v40, %s3667_s10  ;;  %3217 = vmatmul.mubr.msk.bf16.vlgmr.msra.gmra.mrb[40].mxu1 %vm557_vm2, %v546_v21  ;;  %v844_v52 = vsel %vm557_vm2, %v555_v40, 0  ;;  %v547_v56 = vpack.c.bf16 %v538_v51, %v537_v39 }
 0x122   : > { %v516_v54 = vpop.f32.mrb[28].mxu1  ;;  %3221 = vmatpush3.bf16.xpose.msra.mxu0 %v844_v52  ;;  %3228 = vmatprep.mubr.msk.bf16.mxu1 %vm3666_vm1, %v3665_v33  ;;  %v3923_v59 = vpack.c.bf16 %v1756_v55, %v1755_v47  ;;  %v403_v63 = vpop.f32.mrb[28].mxu0  ;;  %v1779_v55 = vsel %vm557_vm2, %v3802_v62, 0 }
 0x123   : > { %v517_v57 = vadd.f32 %v516_v54, %v3787_v41  ;;  %v518_v58 = vpop.f32.mrb[29].mxu1  ;;  %3232 = vmatprep.subr.bf16.mxu0 %v3665_v33  ;;  %v404_v2 = vadd.f32 %v403_v63, %v3789_v42  ;;  %v405_v4 = vpop.f32.mrb[29].mxu0 }
 0x124   : > { %v519_v61 = vadd.f32 %v518_v58, %v3791_v44  ;;  %v520_v0 = vpop.f32.mrb[30].mxu1  ;;  %v406_v6 = vadd.f32 %v405_v4, %v3793_v45  ;;  %v407_v7 = vpop.f32.mrb[30].mxu0 }
 0x125   : > { %v521_v3 = vadd.f32 %v520_v0, %v3787_v41  ;;  %1446 = vrot.lane.b32.xlu0 %v547_v56, %s3667_s10  ;;  %v522_v5 = vpop.f32.mrb[31].mxu1  ;;  %v539_v10 = vmul.f32 0.125, %v404_v2  ;;  %v408_v12 = vadd.f32 %v407_v7, %v3789_v42  ;;  %v409_v13 = vpop.f32.mrb[31].mxu0 }
 0x126   : > { %v523_v9 = vadd.f32 %v522_v5, %v3791_v44  ;;  %v1757_v15 = vmul.f32 0.125, %v406_v6  ;;  %v410_v18 = vadd.f32 %v409_v13, %v3793_v45 }
 0x127   : > { %v556_v11 = vpack.c.bf16 %v521_v3, %v517_v57  ;;  %v540_v41 = vmul.f32 0.125, %v408_v12  ;;  %v1826_v57 = vsel %vm557_vm2, %v3818_v23, 0 }
 0x128   : > { %v3932_v16 = vpack.c.bf16 %v523_v9, %v519_v61  ;;  %v1758_v44 = vmul.f32 0.125, %v410_v18 }
 0x129   : > { %2347 = vrot.lane.b32.xlu0 %v3802_v62, %s3667_s10  ;;  %1502 = vrot.lane.b32.xlu1 %v556_v11, %s3667_s10  ;;  %v891_v19 = vsel %vm557_vm2, %v556_v11, 0  ;;  %v548_v20 = vpack.c.bf16 %v540_v41, %v539_v10  ;;  %v1873_v62 = vsel %vm557_vm2, %v3837_v53, 0 }
 0x12a   : > { %3223 = vmatmul.mubr.msk.bf16.vlgmr.msra.gmra.mrb[44].mxu0 %vm557_vm2, %v547_v56  ;;  %3227 = vmatpush3.bf16.xpose.msra.mxu1 %v891_v19  ;;  %v3943_v42 = vpack.c.bf16 %v1758_v44, %v1757_v15 }
 0x12b   : > { %3234 = vmatprep.mubr.msk.bf16.mxu0 %vm3666_vm1, %v3665_v33  ;;  %3238 = vmatprep.subr.bf16.mxu1 %v3665_v33 }
 0x12d   : > { %1499 = vrot.lane.b32.xlu1 %v548_v20, %s3667_s10  ;;  %2344 = vrot.lane.b32.xlu0 %v3808_v8, %s3667_s10 }
 0x131   : > { %3229 = vmatmul.mubr.msk.bf16.vlgmr.msra.gmra.mrb[44].mxu1 %vm557_vm2, %v548_v20  ;;  %2400 = vrot.lane.b32.xlu1 %v3818_v23, %s3667_s10  ;;  %v1967_v23 = vsel %vm557_vm2, %v3875_v49, 0 }
 0x132   : > { %2453 = vrot.lane.b32.xlu0 %v3837_v53, %s3667_s10  ;;  %3240 = vmatprep.mubr.msk.bf16.mxu1 %vm3666_vm1, %v3665_v33 }
 0x135   : > { %2397 = vrot.lane.b32.xlu1 %v3828_v35, %s3667_s10 }
 0x136   : > { %2450 = vrot.lane.b32.xlu0 %v3847_v1, %s3667_s10 }
 0x139   : > { %2506 = vrot.lane.b32.xlu1 %v3856_v17, %s3667_s10 }
 0x13a   : > { %2559 = vrot.lane.b32.xlu0 %v3875_v49, %s3667_s10 }
 0x13d   : > { %2503 = vrot.lane.b32.xlu1 %v3866_v28, %s3667_s10 }
 0x13e   : > { %2556 = vrot.lane.b32.xlu0 %v3885_v60, %s3667_s10 }
 0x141   : > { %2612 = vrot.lane.b32.xlu1 %v3894_v14, %s3667_s10 }
 0x142   : > { %2665 = vrot.lane.b32.xlu0 %v3913_v48, %s3667_s10 }
 0x145   : > { %2609 = vrot.lane.b32.xlu1 %v3904_v25, %s3667_s10 }
 0x146   : > { %2662 = vrot.lane.b32.xlu0 %v3923_v59, %s3667_s10 }
 0x149   : > { %2718 = vrot.lane.b32.xlu1 %v3932_v16, %s3667_s10 }
 0x14d   : > { %2715 = vrot.lane.b32.xlu1 %v3943_v42, %s3667_s10 }
 0x163   : > { %v1132_v45 = vpop.permute.xlu0 %1131 }
 0x164   : > { %v1137_v21 = vsel %vm557_vm2, %v1132_v45, 0 }
 0x165   : > { %3233 = vmatpush3.bf16.xpose.msra.mxu0 %v1137_v21  ;;  %v1129_v24 = vpop.permute.xlu1 %1128 }
 0x166   : > { %3244 = vmatprep.subr.bf16.mxu0 %v3665_v33 }
 0x16b   : > { %v1185_v22 = vpop.permute.xlu0 %1184 }
 0x16c   : > { %v1190_v26 = vsel %vm557_vm2, %v1185_v22, 0  ;;  %3235 = vmatmul.mubr.msk.bf16.vlgmr.msra.gmra.mrb[48].mxu0 %vm557_vm2, %v1129_v24 }
 0x16d   : > { %3239 = vmatpush3.bf16.xpose.msra.mxu1 %v1190_v26  ;;  %3246 = vmatprep.mubr.msk.bf16.mxu0 %vm3666_vm1, %v3665_v33  ;;  %v1182_v29 = vpop.permute.xlu1 %1181 }
 0x16e   : > { %3250 = vmatprep.subr.bf16.mxu1 %v3665_v33 }
 0x173   : > { %v1238_v27 = vpop.permute.xlu0 %1237 }
 0x174   : > { %v1243_v30 = vsel %vm557_vm2, %v1238_v27, 0  ;;  %3241 = vmatmul.mubr.msk.bf16.vlgmr.msra.gmra.mrb[48].mxu1 %vm557_vm2, %v1182_v29 }
 0x175   : > { %3245 = vmatpush3.bf16.xpose.msra.mxu0 %v1243_v30  ;;  %3252 = vmatprep.mubr.msk.bf16.mxu1 %vm3666_vm1, %v3665_v33 }
 0x176   : > { %3256 = vmatprep.subr.bf16.mxu0 %v3665_v33 }
 0x177   : > { %v1235_v31 = vpop.permute.xlu0 %1234 }
 0x17b   : > { %v1291_v32 = vpop.permute.xlu1 %1290 }
 0x17c   : > { %v1296_v34 = vsel %vm557_vm2, %v1291_v32, 0  ;;  %3247 = vmatmul.mubr.msk.bf16.vlgmr.msra.gmra.mrb[52].mxu0 %vm557_vm2, %v1235_v31 }
 0x17d   : > { %3251 = vmatpush3.bf16.xpose.msra.mxu1 %v1296_v34  ;;  %3258 = vmatprep.mubr.msk.bf16.mxu0 %vm3666_vm1, %v3665_v33 }
 0x17e   : > { %3262 = vmatprep.subr.bf16.mxu1 %v3665_v33 }
 0x17f   : > { %v1288_v36 = vpop.permute.xlu1 %1287 }
 0x183   : > { %v1344_v37 = vpop.permute.xlu0 %1343 }
 0x184   : > { %v1349_v38 = vsel %vm557_vm2, %v1344_v37, 0  ;;  %3253 = vmatmul.mubr.msk.bf16.vlgmr.msra.gmra.mrb[52].mxu1 %vm557_vm2, %v1288_v36 }
 0x185   : > { %3257 = vmatpush3.bf16.xpose.msra.mxu0 %v1349_v38  ;;  %3264 = vmatprep.mubr.msk.bf16.mxu1 %vm3666_vm1, %v3665_v33 }
 0x186   : > { %3268 = vmatprep.subr.bf16.mxu0 %v3665_v33 }
 0x187   : > { %v1341_v39 = vpop.permute.xlu0 %1340 }
 0x18b   : > { %v1397_v40 = vpop.permute.xlu1 %1396 }
 0x18c   : > { %v1402_v43 = vsel %vm557_vm2, %v1397_v40, 0  ;;  %3259 = vmatmul.mubr.msk.bf16.vlgmr.msra.gmra.mrb[56].mxu0 %vm557_vm2, %v1341_v39 }
 0x18d   : > { %3263 = vmatpush3.bf16.xpose.msra.mxu1 %v1402_v43  ;;  %3270 = vmatprep.mubr.msk.bf16.mxu0 %vm3666_vm1, %v3665_v33 }
 0x18e   : > { %3274 = vmatprep.subr.bf16.mxu1 %v3665_v33 }
 0x18f   : > { %v1394_v46 = vpop.permute.xlu1 %1393 }
 0x193   : > { %v1450_v47 = vpop.permute.xlu0 %1449 }
 0x194   : > { %v1455_v50 = vsel %vm557_vm2, %v1450_v47, 0  ;;  %3265 = vmatmul.mubr.msk.bf16.vlgmr.msra.gmra.mrb[56].mxu1 %vm557_vm2, %v1394_v46 }
 0x195   : > { %3269 = vmatpush3.bf16.xpose.msra.mxu0 %v1455_v50  ;;  %3276 = vmatprep.mubr.msk.bf16.mxu1 %vm3666_vm1, %v3665_v33 }
 0x196   : > { %3280 = vmatprep.subr.bf16.mxu0 %v3665_v33 }
 0x197   : > { %v1447_v51 = vpop.permute.xlu0 %1446 }
 0x19b   : > { %v1503_v52 = vpop.permute.xlu1 %1502  ;;  %v2348_v53 = vpop.permute.xlu0 %2347 }
 0x19c   : > { %v1508_v54 = vsel %vm557_vm2, %v1503_v52, 0  ;;  %3271 = vmatmul.mubr.msk.bf16.vlgmr.msra.gmra.mrb[60].mxu0 %vm557_vm2, %v1447_v51 }
 0x19d   : > { %3275 = vmatpush3.bf16.xpose.msra.mxu1 %v1508_v54  ;;  %3281 = vmatpush3.bf16.xpose.msra.mxu0 %v1779_v55 }
 0x19e   : > { %3282 = vmatprep.mubr.msk.bf16.mxu0 %vm3666_vm1, %v3665_v33  ;;  %3286 = vmatprep.subr.bf16.mxu1 %v3665_v33 }
 0x19f   : > { %3292 = vmatprep.subr.bf16.mxu0 %v3665_v33  ;;  %v1500_v56 = vpop.permute.xlu1 %1499 }
 0x1a3   : > { %v2401_v49 = vpop.permute.xlu1 %2400 }
 0x1a4   : > { %3277 = vmatmul.mubr.msk.bf16.vlgmr.msra.gmra.mrb[60].mxu1 %vm557_vm2, %v1500_v56  ;;  %3283 = vmatmul.mubr.msk.bf16.vlgmr.msra.gmra.mrb[64].mxu0 %vm557_vm2, %v3808_v8  ;;  %v1920_v8 = vsel %vm557_vm2, %v3856_v17, 0  ;;  %v2061_v17 = vsel %vm557_vm2, %v3913_v48, 0  ;;  %v2108_v48 = vsel %vm557_vm2, %v3932_v16, 0  ;;  %v2406_v61 = vsel %vm557_vm2, %v2401_v49, 0 }
 0x1a5   : > { %3287 = vmatpush3.bf16.xpose.msra.mxu1 %v1826_v57  ;;  %3293 = vmatpush3.bf16.xpose.msra.mxu0 %v1873_v62 }
 0x1a6   : > { %3288 = vmatprep.mubr.msk.bf16.mxu1 %vm3666_vm1, %v3665_v33  ;;  %3294 = vmatprep.mubr.msk.bf16.mxu0 %vm3666_vm1, %v3665_v33 }
 0x1a7   : > { %3298 = vmatprep.subr.bf16.mxu1 %v3665_v33  ;;  %3304 = vmatprep.subr.bf16.mxu0 %v3665_v33 }
 0x1ac   : > { %3289 = vmatmul.mubr.msk.bf16.vlgmr.msra.gmra.mrb[64].mxu1 %vm557_vm2, %v3828_v35  ;;  %3295 = vmatmul.mubr.msk.bf16.vlgmr.msra.gmra.mrb[68].mxu0 %vm557_vm2, %v3847_v1  ;;  %v2345_v35 = vpop.permute.xlu0 %2344  ;;  %v2014_v1 = vsel %vm557_vm2, %v3894_v14, 0  ;;  %v2353_v14 = vsel %vm557_vm2, %v2348_v53, 0 }
 0x1ad   : > { %3299 = vmatpush3.bf16.xpose.msra.mxu1 %v1920_v8  ;;  %3305 = vmatpush3.bf16.xpose.msra.mxu0 %v1967_v23 }
 0x1ae   : > { %3300 = vmatprep.mubr.msk.bf16.mxu1 %vm3666_vm1, %v3665_v33  ;;  %3306 = vmatprep.mubr.msk.bf16.mxu0 %vm3666_vm1, %v3665_v33 }
 0x1af   : > { %3310 = vmatprep.subr.bf16.mxu1 %v3665_v33  ;;  %3316 = vmatprep.subr.bf16.mxu0 %v3665_v33 }
 0x1b4   : > { %3301 = vmatmul.mubr.msk.bf16.vlgmr.msra.gmra.mrb[68].mxu1 %vm557_vm2, %v3866_v28  ;;  %3307 = vmatmul.mubr.msk.bf16.vlgmr.msra.gmra.mrb[72].mxu0 %vm557_vm2, %v3885_v60  ;;  %v2454_v28 = vpop.permute.xlu0 %2453  ;;  %v2398_v60 = vpop.permute.xlu1 %2397 }
 0x1b5   : > { %3311 = vmatpush3.bf16.xpose.msra.mxu1 %v2014_v1  ;;  %3317 = vmatpush3.bf16.xpose.msra.mxu0 %v2061_v17 }
 0x1b6   : > { %3312 = vmatprep.mubr.msk.bf16.mxu1 %vm3666_vm1, %v3665_v33  ;;  %3318 = vmatprep.mubr.msk.bf16.mxu0 %vm3666_vm1, %v3665_v33 }
 0x1b7   : > { %3322 = vmatprep.subr.bf16.mxu1 %v3665_v33  ;;  %3328 = vmatprep.subr.bf16.mxu0 %v3665_v33 }
 0x1b8   : > { %v2451_v58 = vpop.permute.xlu0 %2450 }
 0x1bc   : > { %3313 = vmatmul.mubr.msk.bf16.vlgmr.msra.gmra.mrb[72].mxu1 %vm557_vm2, %v3904_v25  ;;  %3319 = vmatmul.mubr.msk.bf16.vlgmr.msra.gmra.mrb[76].mxu0 %vm557_vm2, %v3923_v59  ;;  %v2507_v25 = vpop.permute.xlu1 %2506  ;;  %v2459_v59 = vsel %vm557_vm2, %v2454_v28, 0  ;;  %v2560_v63 = vpop.permute.xlu0 %2559 }
 0x1bd   : > { %3323 = vmatpush3.bf16.xpose.msra.mxu1 %v2108_v48  ;;  %3329 = vmatpush3.bf16.xpose.msra.mxu0 %v2353_v14  ;;  %v2512_v3 = vsel %vm557_vm2, %v2507_v25, 0  ;;  %v2565_v4 = vsel %vm557_vm2, %v2560_v63, 0 }
 0x1be   : > { %3324 = vmatprep.mubr.msk.bf16.mxu1 %vm3666_vm1, %v3665_v33  ;;  %3330 = vmatprep.mubr.msk.bf16.mxu0 %vm3666_vm1, %v3665_v33 }
 0x1bf   : > { %3334 = vmatprep.subr.bf16.mxu1 %v3665_v33  ;;  %3340 = vmatprep.subr.bf16.mxu0 %v3665_v33 }
 0x1c0   : > { %v2504_v0 = vpop.permute.xlu1 %2503  ;;  %v2557_v2 = vpop.permute.xlu0 %2556 }
 0x1c4   : > { %3325 = vmatmul.mubr.msk.bf16.vlgmr.msra.gmra.mrb[76].mxu1 %vm557_vm2, %v3943_v42  ;;  %3331 = vmatmul.mubr.msk.bf16.vlgmr.msra.gmra.mrb[80].mxu0 %vm557_vm2, %v2345_v35  ;;  %v2613_v6 = vpop.permute.xlu1 %2612  ;;  %v2666_v13 = vpop.permute.xlu0 %2665 }
 0x1c5   : > { %3335 = vmatpush3.bf16.xpose.msra.mxu1 %v2406_v61  ;;  %3341 = vmatpush3.bf16.xpose.msra.mxu0 %v2459_v59  ;;  %v2618_v16 = vsel %vm557_vm2, %v2613_v6, 0  ;;  %v2671_v18 = vsel %vm557_vm2, %v2666_v13, 0 }
 0x1c6   : > { %3336 = vmatprep.mubr.msk.bf16.mxu1 %vm3666_vm1, %v3665_v33  ;;  %3342 = vmatprep.mubr.msk.bf16.mxu0 %vm3666_vm1, %v3665_v33 }
 0x1c7   : > { %3346 = vmatprep.subr.bf16.mxu1 %v3665_v33  ;;  %3352 = vmatprep.subr.bf16.mxu0 %v3665_v33 }
 0x1c8   : > { %v2610_v15 = vpop.permute.xlu1 %2609  ;;  %v2663_v22 = vpop.permute.xlu0 %2662 }
 0x1cc   : > { %v4086_v5 = vpop.f32.mrb[32].mxu0  ;;  %3337 = vmatmul.mubr.msk.bf16.vlgmr.msra.gmra.mrb[80].mxu1 %vm557_vm2, %v2398_v60  ;;  %3343 = vmatmul.mubr.msk.bf16.vlgmr.msra.gmra.mrb[84].mxu0 %vm557_vm2, %v2451_v58  ;;  %v2719_v45 = vpop.permute.xlu1 %2718 }
 0x1cd   : > { %v3188_v7 = vpop.f32.mrb[33].mxu0  ;;  %3347 = vmatpush3.bf16.xpose.msra.mxu1 %v2512_v3  ;;  %3353 = vmatpush3.bf16.xpose.msra.mxu0 %v2565_v4  ;;  %v935_v9 = vsel %vm934_vm3, %v4086_v5, -inf  ;;  %v2724_v24 = vsel %vm557_vm2, %v2719_v45, 0 }
 0x1ce   : > { %936 = vmax.xlane.f32.xlu0 %v935_v9  ;;  %v4092_v10 = vpop.f32.mrb[34].mxu0  ;;  %3348 = vmatprep.mubr.msk.bf16.mxu1 %vm3666_vm1, %v3665_v33 }
 0x1cf   : > { %v938_v11 = vsel %vm934_vm3, %v4092_v10, -inf  ;;  %3354 = vmatprep.mubr.msk.bf16.mxu0 %vm3666_vm1, %v3665_v33  ;;  %3358 = vmatprep.subr.bf16.mxu1 %v3665_v33  ;;  %v3189_v12 = vpop.f32.mrb[35].mxu0 }
 0x1d0   : > { %939 = vmax.xlane.f32.xlu1 %v938_v11  ;;  %3364 = vmatprep.subr.bf16.mxu0 %v3665_v33  ;;  %v2716_v34 = vpop.permute.xlu1 %2715 }
 0x1d4   : > { %v4104_v41 = vpop.f32.mrb[32].mxu1  ;;  %3349 = vmatmul.mubr.msk.bf16.vlgmr.msra.gmra.mrb[84].mxu1 %vm557_vm2, %v2504_v0  ;;  %3355 = vmatmul.mubr.msk.bf16.vlgmr.msra.gmra.mrb[88].mxu0 %vm557_vm2, %v2557_v2 }
 0x1d5   : > { %3359 = vmatpush3.bf16.xpose.msra.mxu1 %v2618_v16  ;;  %3365 = vmatpush3.bf16.xpose.msra.mxu0 %v2671_v18  ;;  %v941_v19 = vsel %vm934_vm3, %v4104_v41, -inf  ;;  %v3194_v44 = vpop.f32.mrb[33].mxu1 }
 0x1d6   : > { %942 = vmax.xlane.f32.xlu0 %v941_v19  ;;  %v4110_v20 = vpop.f32.mrb[34].mxu1  ;;  %3360 = vmatprep.mubr.msk.bf16.mxu1 %vm3666_vm1, %v3665_v33 }
 0x1d7   : > { %3366 = vmatprep.mubr.msk.bf16.mxu0 %vm3666_vm1, %v3665_v33  ;;  %3370 = vmatprep.subr.bf16.mxu1 %v3665_v33  ;;  %v3195_v42 = vpop.f32.mrb[35].mxu1  ;;  %v944_v21 = vsel %vm934_vm3, %v4110_v20, -inf }
 0x1da   : > { %945 = vmax.xlane.f32.xlu0 %v944_v21 }
 0x1dc   : > { %v4120_v26 = vpop.f32.mrb[36].mxu0  ;;  %3361 = vmatmul.mubr.msk.bf16.vlgmr.msra.gmra.mrb[88].mxu1 %vm557_vm2, %v2610_v15  ;;  %3367 = vmatmul.mubr.msk.bf16.vlgmr.msra.gmra.mrb[92].mxu0 %vm557_vm2, %v2663_v22 }
 0x1dd   : > { %3371 = vmatpush3.bf16.xpose.msra.mxu1 %v2724_v24  ;;  %v3200_v27 = vpop.f32.mrb[37].mxu0  ;;  %v947_v29 = vsel %vm934_vm3, %v4120_v26, -inf  ;;  %3372 = vmatprep.mubr.msk.bf16.mxu1 %vm3666_vm1, %v3665_v33 }
 0x1de   : > { %948 = vmax.xlane.f32.xlu1 %v947_v29  ;;  %v4128_v30 = vpop.f32.mrb[38].mxu0 }
 0x1df   : > { %v950_v31 = vsel %vm934_vm3, %v4128_v30, -inf  ;;  %v3201_v32 = vpop.f32.mrb[39].mxu0 }
 0x1e0   : > { %951 = vmax.xlane.f32.xlu0 %v950_v31 }
 0x1e4   : > { %v4132_v36 = vpop.f32.mrb[36].mxu1  ;;  %3373 = vmatmul.mubr.msk.bf16.vlgmr.msra.gmra.mrb[92].mxu1 %vm557_vm2, %v2716_v34 }
 0x1e5   : > { %v3206_v37 = vpop.f32.mrb[37].mxu1  ;;  %v953_v38 = vsel %vm934_vm3, %v4132_v36, -inf }
 0x1e6   : > { %v4137_v39 = vpop.f32.mrb[38].mxu1  ;;  %954 = vmax.xlane.f32.xlu1 %v953_v38 }
 0x1e7   : > { %v956_v33 = vsel %vm934_vm3, %v4137_v39, -inf  ;;  %v3207_v40 = vpop.f32.mrb[39].mxu1 }
 0x1e8   : > { %957 = vmax.xlane.f32.xlu0 %v956_v33 }
 0x1ec   : > { %v4141_v43 = vpop.f32.mrb[40].mxu0 }
 0x1ed   : > { %v3212_v46 = vpop.f32.mrb[41].mxu0  ;;  %v959_v47 = vsel %vm934_vm3, %v4141_v43, -inf }
 0x1ee   : > { %960 = vmax.xlane.f32.xlu1 %v959_v47  ;;  %v4145_v50 = vpop.f32.mrb[42].mxu0 }
 0x1ef   : > { %v962_v51 = vsel %vm934_vm3, %v4145_v50, -inf  ;;  %v3213_v52 = vpop.f32.mrb[43].mxu0 }
 0x1f0   : > { %963 = vmax.xlane.f32.xlu0 %v962_v51 }
 0x1f4   : > { %v4149_v54 = vpop.f32.mrb[40].mxu1 }
 0x1f5   : > { %v3218_v55 = vpop.f32.mrb[41].mxu1  ;;  %v965_v56 = vsel %vm934_vm3, %v4149_v54, -inf }
 0x1f6   : > { %v4153_v57 = vpop.f32.mrb[42].mxu1  ;;  %966 = vmax.xlane.f32.xlu1 %v965_v56 }
 0x1f7   : > { %v968_v62 = vsel %vm934_vm3, %v4153_v57, -inf  ;;  %v3219_v8 = vpop.f32.mrb[43].mxu1 }
 0x1f8   : > { %969 = vmax.xlane.f32.xlu0 %v968_v62 }
 0x1fd   : > { %v4157_v23 = vpop.f32.mrb[44].mxu0 }
 0x1fe   : > { %v3224_v53 = vpop.f32.mrb[45].mxu0  ;;  %v971_v35 = vsel %vm934_vm3, %v4157_v23, -inf }
 0x1ff   : > { %972 = vmax.xlane.f32.xlu1 %v971_v35  ;;  %v4161_v1 = vpop.f32.mrb[46].mxu0 }
 0x200   : > { %v974_v17 = vsel %vm934_vm3, %v4161_v1, -inf  ;;  %v3225_v49 = vpop.f32.mrb[47].mxu0 }
 0x201   : > { %975 = vmax.xlane.f32.xlu0 %v974_v17 }
 0x204   : > { %v4165_v28 = vpop.f32.mrb[44].mxu1 }
 0x205   : > { %v3230_v60 = vpop.f32.mrb[45].mxu1  ;;  %v977_v14 = vsel %vm934_vm3, %v4165_v28, -inf }
 0x206   : > { %v4169_v48 = vpop.f32.mrb[46].mxu1  ;;  %978 = vmax.xlane.f32.xlu1 %v977_v14 }
 0x207   : > { %v980_v58 = vsel %vm934_vm3, %v4169_v48, -inf  ;;  %v3231_v25 = vpop.f32.mrb[47].mxu1 }
 0x208   : > { %981 = vmax.xlane.f32.xlu0 %v980_v58 }
 0x23f   : > { %v4173_v61 = vpop.f32.mrb[48].mxu0 }
 0x240   : > { %v3236_v59 = vpop.f32.mrb[49].mxu0  ;;  %v1551_v63 = vsel %vm934_vm3, %v4173_v61, -inf }
 0x241   : > { %1552 = vmax.xlane.f32.xlu1 %v1551_v63  ;;  %v4177_v0 = vpop.f32.mrb[50].mxu0 }
 0x242   : > { %v1554_v2 = vsel %vm934_vm3, %v4177_v0, -inf  ;;  %v3237_v3 = vpop.f32.mrb[51].mxu0 }
 0x243   : > { %1555 = vmax.xlane.f32.xlu0 %v1554_v2 }
 0x247   : > { %v4181_v4 = vpop.f32.mrb[48].mxu1 }
 0x248   : > { %v3242_v6 = vpop.f32.mrb[49].mxu1  ;;  %v1557_v7 = vsel %vm934_vm3, %v4181_v4, -inf }
 0x249   : > { %v4185_v9 = vpop.f32.mrb[50].mxu1  ;;  %1558 = vmax.xlane.f32.xlu1 %v1557_v7 }
 0x24a   : > { %v1560_v11 = vsel %vm934_vm3, %v4185_v9, -inf  ;;  %v3243_v12 = vpop.f32.mrb[51].mxu1 }
 0x24b   : > { %1561 = vmax.xlane.f32.xlu0 %v1560_v11 }
 0x24f   : > { %v4189_v13 = vpop.f32.mrb[52].mxu0 }
 0x250   : > { %v3248_v15 = vpop.f32.mrb[53].mxu0  ;;  %v1563_v16 = vsel %vm934_vm3, %v4189_v13, -inf }
 0x251   : > { %1564 = vmax.xlane.f32.xlu1 %v1563_v16  ;;  %v4193_v18 = vpop.f32.mrb[54].mxu0 }
 0x252   : > { %v1566_v19 = vsel %vm934_vm3, %v4193_v18, -inf  ;;  %v3249_v44 = vpop.f32.mrb[55].mxu0 }
 0x253   : > { %1567 = vmax.xlane.f32.xlu0 %v1566_v19 }
 0x257   : > { %v4197_v42 = vpop.f32.mrb[52].mxu1 }
 0x258   : > { %v3254_v45 = vpop.f32.mrb[53].mxu1  ;;  %v1569_v21 = vsel %vm934_vm3, %v4197_v42, -inf }
 0x259   : > { %v4201_v22 = vpop.f32.mrb[54].mxu1  ;;  %1570 = vmax.xlane.f32.xlu1 %v1569_v21 }
 0x25a   : > { %v1572_v24 = vsel %vm934_vm3, %v4201_v22, -inf  ;;  %v3255_v27 = vpop.f32.mrb[55].mxu1 }
 0x25b   : > { %v937_v29 = vpop.xlane.xlu0 %936  ;;  %1573 = vmax.xlane.f32.xlu0 %v1572_v24 }
 0x25c   : > { %v983_v31 = vsub.f32 %v4086_v5, %v937_v29 }
 0x25d   : > { %v940_v32 = vpop.xlane.xlu1 %939 }
 0x25e   : > { %v999_v34 = vmul.f32 1.442695, %v983_v31  ;;  %v984_v37 = vsub.f32 %v4092_v10, %v940_v32 }
 0x25f   : > { %v4207_v38 = vpop.f32.mrb[56].mxu0 }
 0x260   : > { %3400 = vpow2.f32 %v999_v34  ;;  %v1001_v33 = vmul.f32 1.442695, %v984_v37  ;;  %v3260_v40 = vpop.f32.mrb[57].mxu0  ;;  %v1575_v46 = vsel %vm934_vm3, %v4207_v38, -inf }
 0x261   : > { %1576 = vmax.xlane.f32.xlu1 %v1575_v46  ;;  %v4211_v47 = vpop.f32.mrb[58].mxu0 }
 0x262   : > { %3402 = vpow2.f32 %v1001_v33  ;;  %v1578_v51 = vsel %vm934_vm3, %v4211_v47, -inf  ;;  %v3261_v5 = vpop.f32.mrb[59].mxu0 }
 0x263   : > { %v943_v52 = vpop.xlane.xlu0 %942  ;;  %1579 = vmax.xlane.f32.xlu0 %v1578_v51 }
 0x264   : > { %v985_v10 = vsub.f32 %v4104_v41, %v943_v52 }
 0x266   : > { %v1003_v55 = vmul.f32 1.442695, %v985_v10 }
 0x267   : > { %v4216_v56 = vpop.f32.mrb[56].mxu1  ;;  %v946_v62 = vpop.xlane.xlu0 %945 }
 0x268   : > { %3404 = vpow2.f32 %v1003_v55  ;;  %v986_v8 = vsub.f32 %v4110_v20, %v946_v62  ;;  %v3266_v53 = vpop.f32.mrb[57].mxu1  ;;  %v1581_v35 = vsel %vm934_vm3, %v4216_v56, -inf }
 0x269   : > { %v4221_v17 = vpop.f32.mrb[58].mxu1  ;;  %1582 = vmax.xlane.f32.xlu1 %v1581_v35 }
 0x26a   : > { %v4223_v49 = vpop.eup %3400  ;;  %v1005_v60 = vmul.f32 1.442695, %v986_v8  ;;  %v1584_v41 = vsel %vm934_vm3, %v4221_v17, -inf  ;;  %v3267_v14 = vpop.f32.mrb[59].mxu1 }
 0x26b   : > { %4941 = vst [vmem:[#allocation2_spill] sm:$0xff] %v4223_v49  ;;  %v949_v58 = vpop.xlane.xlu1 %948  ;;  %1585 = vmax.xlane.f32.xlu0 %v1584_v41  ;;  %v1031_v25 = vsel %vm934_vm3, %v4223_v49, 0.0 }
 0x26c   : > { %v4229_v20 = vpop.eup %3402  ;;  %3406 = vpow2.f32 %v1005_v60  ;;  %v987_v59 = vsub.f32 %v4120_v26, %v949_v58 }
 0x26d   : > { %4942 = vst [vmem:[#allocation3_spill] sm:$0xff] %v4229_v20  ;;  %v952_v63 = vpop.xlane.xlu0 %951  ;;  %1032 = vadd.xlane.f32.xlu1 %v1031_v25  ;;  %v1034_v2 = vsel %vm934_vm3, %v4229_v20, 0.0 }
 0x26e   : > { %v988_v3 = vsub.f32 %v4128_v30, %v952_v63  ;;  %v1007_v6 = vmul.f32 1.442695, %v987_v59 }
 0x26f   : > { %1035 = vadd.xlane.f32.xlu0 %v1034_v2  ;;  %v4235_v7 = vpop.f32.mrb[60].mxu0 }
 0x270   : > { %v3272_v11 = vpop.f32.mrb[61].mxu0  ;;  %v1587_v12 = vsel %vm934_vm3, %v4235_v7, -inf  ;;  %v1009_v26 = vmul.f32 1.442695, %v988_v3  ;;  %3408 = vpow2.f32 %v1007_v6 }
 0x271   : > { %1588 = vmax.xlane.f32.xlu1 %v1587_v12  ;;  %v4239_v15 = vpop.f32.mrb[62].mxu0 }
 0x272   : > { %v4241_v16 = vpop.eup %3404  ;;  %v1590_v19 = vsel %vm934_vm3, %v4239_v15, -inf  ;;  %v3273_v44 = vpop.f32.mrb[63].mxu0  ;;  %3410 = vpow2.f32 %v1009_v26 }
 0x273   : > { %1591 = vmax.xlane.f32.xlu0 %v1590_v19  ;;  %v1037_v30 = vsel %vm934_vm3, %v4241_v16, 0.0  ;;  %v955_v45 = vpop.xlane.xlu1 %954 }
 0x274   : > { %v989_v27 = vsub.f32 %v4132_v36, %v955_v45 }
 0x275   : > { %1038 = vadd.xlane.f32.xlu1 %v1037_v30  ;;  %v958_v24 = vpop.xlane.xlu0 %957 }
 0x276   : > { %v4247_v21 = vpop.eup %3406  ;;  %v990_v36 = vsub.f32 %v4137_v39, %v958_v24  ;;  %v1011_v52 = vmul.f32 1.442695, %v989_v27 }
 0x277   : > { %v4250_v29 = vpop.f32.mrb[60].mxu1  ;;  %v4252_v31 = vpop.f32.mrb[64].mxu0  ;;  %v1040_v32 = vsel %vm934_vm3, %v4247_v21, 0.0 }
 0x278   : > { %1041 = vadd.xlane.f32.xlu0 %v1040_v32  ;;  %v3284_v34 = vpop.f32.mrb[65].mxu0  ;;  %v1593_v37 = vsel %vm934_vm3, %v4250_v29, -inf  ;;  %v3278_v33 = vpop.f32.mrb[61].mxu1  ;;  %v2151_v10 = vsel %vm934_vm3, %v4252_v31, -inf  ;;  %v1013_v8 = vmul.f32 1.442695, %v990_v36  ;;  %3412 = vpow2.f32 %v1011_v52 }
 0x279   : > { %1594 = vmax.xlane.f32.xlu1 %v1593_v37  ;;  %v4258_v40 = vpop.f32.mrb[66].mxu0  ;;  %v4260_v46 = vpop.f32.mrb[62].mxu1 }
 0x27a   : > { %v3285_v51 = vpop.f32.mrb[67].mxu0  ;;  %v3279_v5 = vpop.f32.mrb[63].mxu1  ;;  %v2154_v55 = vsel %vm934_vm3, %v4258_v40, -inf  ;;  %v1596_v39 = vsel %vm934_vm3, %v4260_v46, -inf  ;;  %3414 = vpow2.f32 %v1013_v8 }
 0x27b   : > { %v4267_v62 = vpop.eup %3408  ;;  %v961_v53 = vpop.xlane.xlu1 %960 }
 0x27c   : > { %2152 = vmax.xlane.f32.xlu0 %v2151_v10  ;;  %v4275_v41 = vpop.eup %3410  ;;  %v1043_v25 = vsel %vm934_vm3, %v4267_v62, 0.0  ;;  %v991_v6 = vsub.f32 %v4141_v43, %v961_v53 }
 0x27d   : > { %2155 = vmax.xlane.f32.xlu1 %v2154_v55  ;;  %v964_v11 = vpop.xlane.xlu0 %963  ;;  %v1046_v12 = vsel %vm934_vm3, %v4275_v41, 0.0 }
 0x27e   : > { %v992_v19 = vsub.f32 %v4145_v50, %v964_v11  ;;  %v1015_v44 = vmul.f32 1.442695, %v991_v6 }
 0x27f   : > { %v4269_v35 = vpop.f32.mrb[64].mxu1  ;;  %v4271_v60 = vpop.f32.mrb[68].mxu0 }
 0x280   : > { %v3290_v14 = vpop.f32.mrb[65].mxu1  ;;  %1597 = vmax.xlane.f32.xlu0 %v1596_v39  ;;  %v3296_v58 = vpop.f32.mrb[69].mxu0  ;;  %v2157_v24 = vsel %vm934_vm3, %v4269_v35, -inf  ;;  %v1017_v33 = vmul.f32 1.442695, %v992_v19  ;;  %3416 = vpow2.f32 %v1015_v44  ;;  %v2163_v5 = vsel %vm934_vm3, %v4271_v60, -inf }
 0x281   : > { %v4279_v59 = vpop.f32.mrb[66].mxu1  ;;  %1044 = vadd.xlane.f32.xlu1 %v1043_v25  ;;  %v4281_v63 = vpop.f32.mrb[70].mxu0 }
 0x282   : > { %v3291_v2 = vpop.f32.mrb[67].mxu1  ;;  %v3297_v3 = vpop.f32.mrb[71].mxu0  ;;  %v2160_v26 = vsel %vm934_vm3, %v4279_v59, -inf  ;;  %v2166_v32 = vsel %vm934_vm3, %v4281_v63, -inf  ;;  %3418 = vpow2.f32 %v1017_v33 }
 0x283   : > { %v4297_v34 = vpop.eup %3412  ;;  %v967_v10 = vpop.xlane.xlu1 %966 }
 0x284   : > { %1047 = vadd.xlane.f32.xlu0 %v1046_v12  ;;  %4943 = vst [vmem:[#allocation4_spill] sm:$0xff] %v4297_v34  ;;  %v4305_v52 = vpop.eup %3414  ;;  %v1049_v55 = vsel %vm934_vm3, %v4297_v34, 0.0  ;;  %v993_v53 = vsub.f32 %v4149_v54, %v967_v10 }
 0x285   : > { %2161 = vmax.xlane.f32.xlu1 %v2160_v26  ;;  %4944 = vst [vmem:[#allocation5_spill] sm:$0xff] %v4305_v52  ;;  %v970_v8 = vpop.xlane.xlu0 %969  ;;  %v1052_v58 = vsel %vm934_vm3, %v4305_v52, 0.0 }
 0x286   : > { %v994_v54 = vsub.f32 %v4153_v57, %v970_v8  ;;  %v1019_v19 = vmul.f32 1.442695, %v993_v53 }
 0x287   : > { %v4289_v30 = vpop.f32.mrb[68].mxu1  ;;  %v4291_v45 = vpop.f32.mrb[72].mxu0 }
 0x288   : > { %v3302_v43 = vpop.f32.mrb[69].mxu1  ;;  %2158 = vmax.xlane.f32.xlu0 %v2157_v24  ;;  %v3308_v27 = vpop.f32.mrb[73].mxu0  ;;  %v2169_v44 = vsel %vm934_vm3, %v4289_v30, -inf  ;;  %3420 = vpow2.f32 %v1019_v19  ;;  %v2175_v57 = vsel %vm934_vm3, %v4291_v45, -inf }
 0x289   : > { %v4299_v37 = vpop.f32.mrb[70].mxu1  ;;  %2167 = vmax.xlane.f32.xlu1 %v2166_v32  ;;  %v4301_v50 = vpop.f32.mrb[74].mxu0  ;;  %v1021_v27 = vmul.f32 1.442695, %v994_v54 }
 0x28a   : > { %v3303_v36 = vpop.f32.mrb[71].mxu1  ;;  %v3309_v51 = vpop.f32.mrb[75].mxu0  ;;  %v2172_v3 = vsel %vm934_vm3, %v4299_v37, -inf  ;;  %v2178_v24 = vsel %vm934_vm3, %v4301_v50, -inf }
 0x28b   : > { %v4327_v43 = vpop.eup %3416  ;;  %3422 = vpow2.f32 %v1021_v27 }
 0x28c   : > { %2164 = vmax.xlane.f32.xlu0 %v2163_v5  ;;  %4945 = vst [vmem:[#allocation6_spill] sm:$0xff] %v4327_v43  ;;  %v973_v32 = vpop.xlane.xlu1 %972  ;;  %v4335_v51 = vpop.eup %3418 }
 0x28d   : > { %1050 = vadd.xlane.f32.xlu1 %v1049_v55  ;;  %4946 = vst [vmem:[#allocation7_spill] sm:$0xff] %v4335_v51  ;;  %v1055_v55 = vsel %vm934_vm3, %v4327_v43, 0.0  ;;  %v1058_v54 = vsel %vm934_vm3, %v4335_v51, 0.0 }
 0x28f   : > { %v4310_v39 = vpop.f32.mrb[72].mxu1  ;;  %v4312_v14 = vpop.f32.mrb[76].mxu0 }
 0x290   : > { %v3314_v25 = vpop.f32.mrb[73].mxu1  ;;  %1053 = vadd.xlane.f32.xlu0 %v1052_v58  ;;  %v3320_v2 = vpop.f32.mrb[77].mxu0  ;;  %v2181_v27 = vsel %vm934_vm3, %v4310_v39, -inf }
 0x291   : > { %v4318_v6 = vpop.f32.mrb[74].mxu1  ;;  %2173 = vmax.xlane.f32.xlu1 %v2172_v3  ;;  %v4320_v11 = vpop.f32.mrb[78].mxu0  ;;  %v995_v2 = vsub.f32 %v4157_v23, %v973_v32 }
 0x292   : > { %v3315_v12 = vpop.f32.mrb[75].mxu1  ;;  %v3321_v26 = vpop.f32.mrb[79].mxu0 }
 0x293   : > { %v976_v3 = vpop.xlane.xlu0 %975  ;;  %v2184_v12 = vsel %vm934_vm3, %v4318_v6, -inf  ;;  %v1023_v19 = vmul.f32 1.442695, %v995_v2  ;;  %v2187_v2 = vsel %vm934_vm3, %v4312_v14, -inf }
 0x294   : > { %2170 = vmax.xlane.f32.xlu0 %v2169_v44  ;;  %v996_v26 = vsub.f32 %v4161_v1, %v976_v3 }
 0x295   : > { %2179 = vmax.xlane.f32.xlu1 %v2178_v24  ;;  %3424 = vpow2.f32 %v1023_v19 }
 0x297   : > { %v4329_v33 = vpop.f32.mrb[76].mxu1  ;;  %v4331_v36 = vpop.f32.mrb[80].mxu0 }
 0x298   : > { %v3326_v5 = vpop.f32.mrb[77].mxu1  ;;  %2176 = vmax.xlane.f32.xlu0 %v2175_v57  ;;  %v3332_v10 = vpop.f32.mrb[81].mxu0  ;;  %v2190_v57 = vsel %vm934_vm3, %v4320_v11, -inf  ;;  %v2193_v20 = vsel %vm934_vm3, %v4329_v33, -inf }
 0x299   : > { %v4339_v8 = vpop.f32.mrb[78].mxu1  ;;  %1056 = vadd.xlane.f32.xlu1 %v1055_v55  ;;  %v4341_v53 = vpop.f32.mrb[82].mxu0  ;;  %v1025_v55 = vmul.f32 1.442695, %v996_v26 }
 0x29a   : > { %v3327_v58 = vpop.f32.mrb[79].mxu1  ;;  %v3333_v25 = vpop.f32.mrb[83].mxu0 }
 0x29b   : > { %v4357_v5 = vpop.eup %3420  ;;  %3426 = vpow2.f32 %v1025_v55 }
 0x29c   : > { %1059 = vadd.xlane.f32.xlu0 %v1058_v54  ;;  %4947 = vst [vmem:[#allocation8_spill] sm:$0xff] %v4357_v5  ;;  %v4365_v3 = vpop.eup %3422  ;;  %v979_v54 = vpop.xlane.xlu1 %978 }
 0x29d   : > { %2185 = vmax.xlane.f32.xlu1 %v2184_v12  ;;  %4948 = vst [vmem:[#allocation9_spill] sm:$0xff] %v4365_v3  ;;  %v1061_v12 = vsel %vm934_vm3, %v4357_v5, 0.0  ;;  %v1064_v19 = vsel %vm934_vm3, %v4365_v3, 0.0 }
 0x29f   : > { %v4349_v44 = vpop.f32.mrb[80].mxu1  ;;  %v4351_v24 = vpop.f32.mrb[84].mxu0 }
 0x2a0   : > { %v3338_v23 = vpop.f32.mrb[81].mxu1  ;;  %2182 = vmax.xlane.f32.xlu0 %v2181_v27  ;;  %v3344_v32 = vpop.f32.mrb[85].mxu0 }
 0x2a1   : > { %v4359_v10 = vpop.f32.mrb[82].mxu1  ;;  %2191 = vmax.xlane.f32.xlu1 %v2190_v57  ;;  %v4361_v1 = vpop.f32.mrb[86].mxu0  ;;  %v997_v23 = vsub.f32 %v4165_v28, %v979_v54 }
 0x2a2   : > { %v3339_v58 = vpop.f32.mrb[83].mxu1  ;;  %v3345_v25 = vpop.f32.mrb[87].mxu0 }
 0x2a3   : > { %v982_v27 = vpop.xlane.xlu0 %981  ;;  %v2196_v25 = vsel %vm934_vm3, %v4339_v8, -inf  ;;  %v1027_v49 = vmul.f32 1.442695, %v997_v23 }
 0x2a4   : > { %2188 = vmax.xlane.f32.xlu0 %v2187_v2  ;;  %v998_v28 = vsub.f32 %v4169_v48, %v982_v27  ;;  %v2767_v48 = vsel %vm934_vm3, %v4331_v36, -inf }
 0x2a5   : > { %1062 = vadd.xlane.f32.xlu1 %v1061_v12  ;;  %3428 = vpow2.f32 %v1027_v49 }
 0x2a7   : > { %v4370_v32 = vpop.f32.mrb[84].mxu1  ;;  %v4372_v26 = vpop.f32.mrb[88].mxu0 }
 0x2a8   : > { %v3350_v57 = vpop.f32.mrb[85].mxu1  ;;  %1065 = vadd.xlane.f32.xlu0 %v1064_v19  ;;  %v3356_v58 = vpop.f32.mrb[89].mxu0  ;;  %v2770_v19 = vsel %vm934_vm3, %v4341_v53, -inf }
 0x2a9   : > { %v4378_v2 = vpop.f32.mrb[86].mxu1  ;;  %2197 = vmax.xlane.f32.xlu1 %v2196_v25  ;;  %v4380_v55 = vpop.f32.mrb[90].mxu0  ;;  %v1029_v58 = vmul.f32 1.442695, %v998_v28 }
 0x2aa   : > { %v3351_v54 = vpop.f32.mrb[87].mxu1  ;;  %v3357_v12 = vpop.f32.mrb[91].mxu0 }
 0x2ab   : > { %v4387_v57 = vpop.eup %3424  ;;  %3430 = vpow2.f32 %v1029_v58  ;;  %v2782_v58 = vsel %vm934_vm3, %v4361_v1, -inf }
 0x2ac   : > { %2194 = vmax.xlane.f32.xlu0 %v2193_v20  ;;  %4949 = vst [vmem:[#allocation10_spill] sm:$0xff] %v4387_v57  ;;  %v4395_v27 = vpop.eup %3426  ;;  %v1067_v54 = vsel %vm934_vm3, %v4387_v57, 0.0 }
 0x2ad   : > { %2771 = vmax.xlane.f32.xlu1 %v2770_v19  ;;  %4950 = vst [vmem:[#allocation11_spill] sm:$0xff] %v4395_v27  ;;  %v1070_v5 = vsel %vm934_vm3, %v4395_v27, 0.0 }
 0x2af   : > { %v4389_v25 = vpop.f32.mrb[88].mxu1  ;;  %v4391_v3 = vpop.f32.mrb[92].mxu0 }
 0x2b0   : > { %v3362_v23 = vpop.f32.mrb[89].mxu1  ;;  %2768 = vmax.xlane.f32.xlu0 %v2767_v48  ;;  %v3368_v20 = vpop.f32.mrb[93].mxu0 }
 0x2b1   : > { %v4399_v12 = vpop.f32.mrb[90].mxu1  ;;  %1068 = vadd.xlane.f32.xlu1 %v1067_v54  ;;  %v4401_v28 = vpop.f32.mrb[94].mxu0  ;;  %v2776_v23 = vsel %vm934_vm3, %v4359_v10, -inf  ;;  %v2773_v20 = vsel %vm934_vm3, %v4349_v44, -inf }
 0x2b2   : > { %v3363_v49 = vpop.f32.mrb[91].mxu1  ;;  %v3369_v19 = vpop.f32.mrb[95].mxu0 }
 0x2b3   : > { %v4413_v54 = vpop.eup %3428  ;;  %v2779_v19 = vsel %vm934_vm3, %v4351_v24, -inf }
 0x2b4   : > { %1071 = vadd.xlane.f32.xlu0 %v1070_v5  ;;  %4951 = vst [vmem:[#allocation12_spill] sm:$0xff] %v4413_v54  ;;  %v1073_v27 = vsel %vm934_vm3, %v4413_v54, 0.0 }
 0x2b5   : > { %2777 = vmax.xlane.f32.xlu1 %v2776_v23  ;;  %v4419_v23 = vpop.eup %3430 }
 0x2b6   : > { %4952 = vst [vmem:[#allocation13_spill] sm:$0xff] %v4419_v23 }
 0x2b7   : > { %v4407_v48 = vpop.f32.mrb[92].mxu1 }
 0x2b8   : > { %v3374_v57 = vpop.f32.mrb[93].mxu1  ;;  %2774 = vmax.xlane.f32.xlu0 %v2773_v20  ;;  %v2788_v20 = vsel %vm934_vm3, %v4378_v2, -inf }
 0x2b9   : > { %v4415_v49 = vpop.f32.mrb[94].mxu1  ;;  %2783 = vmax.xlane.f32.xlu1 %v2782_v58  ;;  %v1076_v57 = vsel %vm934_vm3, %v4419_v23, 0.0  ;;  %v2785_v58 = vsel %vm934_vm3, %v4370_v32, -inf }
 0x2ba   : > { %v3375_v5 = vpop.f32.mrb[95].mxu1 }
 0x2bb   : > { %v2794_v5 = vsel %vm934_vm3, %v4380_v55, -inf }
 0x2bc   : > { %2780 = vmax.xlane.f32.xlu0 %v2779_v19  ;;  %v2791_v19 = vsel %vm934_vm3, %v4372_v26, -inf }
 0x2bd   : > { %1074 = vadd.xlane.f32.xlu1 %v1073_v27  ;;  %v2800_v27 = vsel %vm934_vm3, %v4399_v12, -inf }
 0x2c0   : > { %1077 = vadd.xlane.f32.xlu0 %v1076_v57  ;;  %v2797_v57 = vsel %vm934_vm3, %v4389_v25, -inf }
 0x2c1   : > { %2789 = vmax.xlane.f32.xlu1 %v2788_v20  ;;  %v2806_v20 = vsel %vm934_vm3, %v4401_v28, -inf }
 0x2c4   : > { %2786 = vmax.xlane.f32.xlu0 %v2785_v58 }
 0x2c5   : > { %2795 = vmax.xlane.f32.xlu1 %v2794_v5  ;;  %v2803_v5 = vsel %vm934_vm3, %v4391_v3, -inf }
 0x2c8   : > { %2792 = vmax.xlane.f32.xlu0 %v2791_v19  ;;  %v2812_v19 = vsel %vm934_vm3, %v4415_v49, -inf }
 0x2c9   : > { %2801 = vmax.xlane.f32.xlu1 %v2800_v27 }
 0x2cc   : > { %2798 = vmax.xlane.f32.xlu0 %v2797_v57 }
 0x2cd   : > { %2807 = vmax.xlane.f32.xlu1 %v2806_v20  ;;  %v2809_v20 = vsel %vm934_vm3, %v4407_v48, -inf }
 0x2ce   : > { %v1553_v58 = vpop.xlane.xlu1 %1552 }
 0x2cf   : > { %v1599_v23 = vsub.f32 %v4173_v61, %v1553_v58 }
 0x2d0   : > { %v1556_v54 = vpop.xlane.xlu0 %1555  ;;  %2804 = vmax.xlane.f32.xlu0 %v2803_v5 }
 0x2d1   : > { %v1615_v27 = vmul.f32 1.442695, %v1599_v23  ;;  %v1600_v51 = vsub.f32 %v4177_v0, %v1556_v54  ;;  %2813 = vmax.xlane.f32.xlu1 %v2812_v19 }
 0x2d3   : > { %3432 = vpow2.f32 %v1615_v27  ;;  %v1617_v57 = vmul.f32 1.442695, %v1600_v51 }
 0x2d4   : > { %2810 = vmax.xlane.f32.xlu0 %v2809_v20 }
 0x2d5   : > { %3434 = vpow2.f32 %v1617_v57 }
 0x2d6   : > { %v1559_v61 = vpop.xlane.xlu1 %1558 }
 0x2d7   : > { %v1601_v58 = vsub.f32 %v4181_v4, %v1559_v61 }
 0x2d8   : > { %v1562_v43 = vpop.xlane.xlu0 %1561 }
 0x2d9   : > { %v1619_v52 = vmul.f32 1.442695, %v1601_v58  ;;  %v1602_v5 = vsub.f32 %v4185_v9, %v1562_v43 }
 0x2db   : > { %3436 = vpow2.f32 %v1619_v52  ;;  %v1621_v34 = vmul.f32 1.442695, %v1602_v5 }
 0x2dd   : > { %v4449_v23 = vpop.eup %3432  ;;  %3438 = vpow2.f32 %v1621_v34 }
 0x2de   : > { %4953 = vst [vmem:[#allocation14_spill] sm:$0xff] %v4449_v23  ;;  %v1565_v0 = vpop.xlane.xlu1 %1564  ;;  %v1647_v51 = vsel %vm934_vm3, %v4449_v23, 0.0 }
 0x2df   : > { %v4453_v54 = vpop.eup %3434  ;;  %v1603_v19 = vsub.f32 %v4189_v13, %v1565_v0  ;;  %1648 = vadd.xlane.f32.xlu1 %v1647_v51 }
 0x2e0   : > { %4954 = vst [vmem:[#allocation15_spill] sm:$0xff] %v4453_v54  ;;  %v1568_v27 = vpop.xlane.xlu0 %1567  ;;  %v1650_v4 = vsel %vm934_vm3, %v4453_v54, 0.0 }
 0x2e1   : > { %v1623_v57 = vmul.f32 1.442695, %v1603_v19  ;;  %v1604_v9 = vsub.f32 %v4193_v18, %v1568_v27  ;;  %1651 = vadd.xlane.f32.xlu0 %v1650_v4 }
 0x2e3   : > { %3440 = vpow2.f32 %v1623_v57  ;;  %v1625_v52 = vmul.f32 1.442695, %v1604_v9 }
 0x2e5   : > { %v4459_v34 = vpop.eup %3436  ;;  %3442 = vpow2.f32 %v1625_v52 }
 0x2e6   : > { %v1571_v43 = vpop.xlane.xlu1 %1570  ;;  %v1653_v20 = vsel %vm934_vm3, %v4459_v34, 0.0 }
 0x2e7   : > { %v4463_v61 = vpop.eup %3438  ;;  %v1605_v13 = vsub.f32 %v4197_v42, %v1571_v43  ;;  %1654 = vadd.xlane.f32.xlu1 %v1653_v20 }
 0x2e8   : > { %v1574_v58 = vpop.xlane.xlu0 %1573  ;;  %v1656_v5 = vsel %vm934_vm3, %v4463_v61, 0.0 }
 0x2e9   : > { %v1627_v18 = vmul.f32 1.442695, %v1605_v13  ;;  %v1606_v0 = vsub.f32 %v4201_v22, %v1574_v58  ;;  %1657 = vadd.xlane.f32.xlu0 %v1656_v5 }
 0x2eb   : > { %3444 = vpow2.f32 %v1627_v18  ;;  %v1629_v51 = vmul.f32 1.442695, %v1606_v0 }
 0x2ed   : > { %v4469_v19 = vpop.eup %3440  ;;  %3446 = vpow2.f32 %v1629_v51 }
 0x2ee   : > { %v1577_v27 = vpop.xlane.xlu1 %1576  ;;  %v1659_v4 = vsel %vm934_vm3, %v4469_v19, 0.0 }
 0x2ef   : > { %v4473_v57 = vpop.eup %3442  ;;  %v1607_v42 = vsub.f32 %v4207_v38, %v1577_v27  ;;  %1660 = vadd.xlane.f32.xlu1 %v1659_v4 }
 0x2f0   : > { %v1580_v9 = vpop.xlane.xlu0 %1579  ;;  %v1662_v52 = vsel %vm934_vm3, %v4473_v57, 0.0 }
 0x2f1   : > { %v1631_v22 = vmul.f32 1.442695, %v1607_v42  ;;  %v1608_v43 = vsub.f32 %v4211_v47, %v1580_v9  ;;  %1663 = vadd.xlane.f32.xlu0 %v1662_v52 }
 0x2f3   : > { %3448 = vpow2.f32 %v1631_v22  ;;  %v1633_v20 = vmul.f32 1.442695, %v1608_v43 }
 0x2f5   : > { %v4479_v13 = vpop.eup %3444  ;;  %3450 = vpow2.f32 %v1633_v20 }
 0x2f6   : > { %v1583_v58 = vpop.xlane.xlu1 %1582  ;;  %v1665_v5 = vsel %vm934_vm3, %v4479_v13, 0.0 }
 0x2f7   : > { %v4483_v18 = vpop.eup %3446  ;;  %v1609_v38 = vsub.f32 %v4216_v56, %v1583_v58  ;;  %1666 = vadd.xlane.f32.xlu1 %v1665_v5 }
 0x2f8   : > { %v1586_v0 = vpop.xlane.xlu0 %1585  ;;  %v1668_v51 = vsel %vm934_vm3, %v4483_v18, 0.0 }
 0x2f9   : > { %v1635_v47 = vmul.f32 1.442695, %v1609_v38  ;;  %v1610_v27 = vsub.f32 %v4221_v17, %v1586_v0  ;;  %1669 = vadd.xlane.f32.xlu0 %v1668_v51 }
 0x2fa   : > { %v4489_v4 = vpop.xlane.xlu1 %1032 }
 0x2fb   : > { %4955 = vst [vmem:[#allocation16_spill] sm:$0xff] %v4489_v4  ;;  %3452 = vpow2.f32 %v1635_v47  ;;  %v1637_v42 = vmul.f32 1.442695, %v1610_v27 }
 0x2fc   : > { %v4491_v9 = vpop.xlane.xlu0 %1035 }
 0x2fd   : > { %4956 = vst [vmem:[#allocation17_spill] sm:$0xff] %v4491_v9  ;;  %v4493_v52 = vpop.eup %3448  ;;  %3454 = vpow2.f32 %v1637_v42 }
 0x2fe   : > { %v1589_v22 = vpop.xlane.xlu1 %1588  ;;  %v1671_v56 = vsel %vm934_vm3, %v4493_v52, 0.0 }
 0x2ff   : > { %v4497_v43 = vpop.eup %3450  ;;  %v1611_v20 = vsub.f32 %v4235_v7, %v1589_v22  ;;  %1672 = vadd.xlane.f32.xlu1 %v1671_v56 }
 0x300   : > { %v1592_v17 = vpop.xlane.xlu0 %1591  ;;  %v1674_v58 = vsel %vm934_vm3, %v4497_v43, 0.0 }
 0x301   : > { %v1639_v5 = vmul.f32 1.442695, %v1611_v20  ;;  %v1612_v38 = vsub.f32 %v4239_v15, %v1592_v17  ;;  %1675 = vadd.xlane.f32.xlu0 %v1674_v58 }
 0x302   : > { %v4503_v0 = vpop.xlane.xlu1 %1038 }
 0x303   : > { %3456 = vpow2.f32 %v1639_v5  ;;  %v1641_v51 = vmul.f32 1.442695, %v1612_v38 }
 0x305   : > { %v4505_v47 = vpop.eup %3452  ;;  %3458 = vpow2.f32 %v1641_v51  ;;  %v4507_v27 = vpop.xlane.xlu0 %1041 }
 0x306   : > { %v1595_v42 = vpop.xlane.xlu1 %1594  ;;  %v1677_v7 = vsel %vm934_vm3, %v4505_v47, 0.0 }
 0x307   : > { %v4511_v22 = vpop.eup %3454  ;;  %v1613_v56 = vsub.f32 %v4250_v29, %v1595_v42  ;;  %1678 = vadd.xlane.f32.xlu1 %v1677_v7 }
 0x308   : > { %v1680_v15 = vsel %vm934_vm3, %v4511_v22, 0.0 }
 0x309   : > { %v1643_v20 = vmul.f32 1.442695, %v1613_v56  ;;  %v2153_v17 = vpop.xlane.xlu0 %2152  ;;  %1681 = vadd.xlane.f32.xlu0 %v1680_v15 }
 0x30a   : > { %v2199_v58 = vsub.f32 %v4252_v31, %v2153_v17  ;;  %v2156_v5 = vpop.xlane.xlu1 %2155 }
 0x30b   : > { %3460 = vpow2.f32 %v1643_v20  ;;  %v2200_v51 = vsub.f32 %v4258_v40, %v2156_v5 }
 0x30c   : > { %v2215_v38 = vmul.f32 1.442695, %v2199_v58 }
 0x30d   : > { %v4518_v23 = vpop.eup %3456  ;;  %v1598_v54 = vpop.xlane.xlu0 %1597  ;;  %v2217_v31 = vmul.f32 1.442695, %v2200_v51 }
 0x30e   : > { %3462 = vpow2.f32 %v2215_v38  ;;  %v1614_v29 = vsub.f32 %v4260_v46, %v1598_v54  ;;  %v4521_v42 = vpop.xlane.xlu1 %1044  ;;  %v1683_v7 = vsel %vm934_vm3, %v4518_v23, 0.0 }
 0x30f   : > { %v4525_v56 = vpop.eup %3458  ;;  %1684 = vadd.xlane.f32.xlu1 %v1683_v7 }
 0x310   : > { %v1645_v15 = vmul.f32 1.442695, %v1614_v29  ;;  %v1686_v20 = vsel %vm934_vm3, %v4525_v56, 0.0 }
 0x311   : > { %v4529_v40 = vpop.xlane.xlu0 %1047  ;;  %1687 = vadd.xlane.f32.xlu0 %v1686_v20 }
 0x312   : > { %3464 = vpow2.f32 %v1645_v15  ;;  %v2162_v17 = vpop.xlane.xlu1 %2161 }
 0x313   : > { %v2202_v46 = vsub.f32 %v4279_v59, %v2162_v17  ;;  %3466 = vpow2.f32 %v2217_v31 }
 0x315   : > { %v4532_v54 = vpop.eup %3460  ;;  %v2221_v58 = vmul.f32 1.442695, %v2202_v46  ;;  %v2159_v5 = vpop.xlane.xlu0 %2158 }
 0x316   : > { %v2201_v38 = vsub.f32 %v4269_v35, %v2159_v5  ;;  %v2168_v7 = vpop.xlane.xlu1 %2167  ;;  %v1689_v51 = vsel %vm934_vm3, %v4532_v54, 0.0 }
 0x317   : > { %v2204_v29 = vsub.f32 %v4281_v63, %v2168_v7  ;;  %1690 = vadd.xlane.f32.xlu1 %v1689_v51  ;;  %3468 = vpow2.f32 %v2221_v58 }
 0x318   : > { %v4538_v4 = vpop.eup %3462  ;;  %v2219_v15 = vmul.f32 1.442695, %v2201_v38 }
 0x319   : > { %4957 = vst [vmem:[#allocation18_spill] sm:$0xff] %v4538_v4  ;;  %v2225_v20 = vmul.f32 1.442695, %v2204_v29  ;;  %v2165_v59 = vpop.xlane.xlu0 %2164  ;;  %v2247_v31 = vsel %vm934_vm3, %v4538_v4, 0.0 }
 0x31a   : > { %3470 = vpow2.f32 %v2219_v15  ;;  %v2203_v17 = vsub.f32 %v4271_v60, %v2165_v59  ;;  %v4543_v35 = vpop.xlane.xlu1 %1050 }
 0x31b   : > { %2248 = vadd.xlane.f32.xlu1 %v2247_v31  ;;  %3472 = vpow2.f32 %v2225_v20 }
 0x31c   : > { %v4545_v46 = vpop.eup %3464  ;;  %v2223_v63 = vmul.f32 1.442695, %v2203_v17 }
 0x31d   : > { %v4547_v5 = vpop.xlane.xlu0 %1053  ;;  %v1692_v58 = vsel %vm934_vm3, %v4545_v46, 0.0  ;;  %v4551_v38 = vpop.eup %3466 }
 0x31e   : > { %3474 = vpow2.f32 %v2223_v63  ;;  %v2174_v7 = vpop.xlane.xlu1 %2173  ;;  %1693 = vadd.xlane.f32.xlu0 %v1692_v58  ;;  %v2250_v15 = vsel %vm934_vm3, %v4551_v38, 0.0 }
 0x31f   : > { %v2206_v51 = vsub.f32 %v4299_v37, %v2174_v7 }
 0x321   : > { %v2229_v60 = vmul.f32 1.442695, %v2206_v51  ;;  %v2171_v29 = vpop.xlane.xlu0 %2170  ;;  %v4556_v59 = vpop.eup %3468 }
 0x322   : > { %v2205_v20 = vsub.f32 %v4289_v30, %v2171_v29  ;;  %v2180_v31 = vpop.xlane.xlu1 %2179  ;;  %2251 = vadd.xlane.f32.xlu0 %v2250_v15  ;;  %v2256_v37 = vsel %vm934_vm3, %v4556_v59, 0.0 }
 0x323   : > { %3476 = vpow2.f32 %v2229_v60  ;;  %v2208_v17 = vsub.f32 %v4301_v50, %v2180_v31 }
 0x324   : > { %v4560_v4 = vpop.eup %3470  ;;  %v2227_v63 = vmul.f32 1.442695, %v2205_v20 }
 0x325   : > { %v2233_v58 = vmul.f32 1.442695, %v2208_v17  ;;  %v2177_v9 = vpop.xlane.xlu0 %2176  ;;  %v2253_v7 = vsel %vm934_vm3, %v4560_v4, 0.0  ;;  %v4566_v51 = vpop.eup %3472 }
 0x326   : > { %4958 = vst [vmem:[#allocation19_spill] sm:$0xff] %v4566_v51  ;;  %3478 = vpow2.f32 %v2227_v63  ;;  %v2207_v30 = vsub.f32 %v4291_v45, %v2177_v9  ;;  %v4569_v29 = vpop.xlane.xlu1 %1056  ;;  %2257 = vadd.xlane.f32.xlu0 %v2256_v37  ;;  %2254 = vadd.xlane.f32.xlu1 %v2253_v7  ;;  %v2262_v20 = vsel %vm934_vm3, %v4566_v51, 0.0 }
 0x327   : > { %3480 = vpow2.f32 %v2233_v58 }
 0x328   : > { %v4571_v50 = vpop.eup %3474  ;;  %v2231_v60 = vmul.f32 1.442695, %v2207_v30 }
 0x329   : > { %v4573_v15 = vpop.xlane.xlu0 %1059  ;;  %v2259_v31 = vsel %vm934_vm3, %v4571_v50, 0.0 }
 0x32a   : > { %3482 = vpow2.f32 %v2231_v60  ;;  %v2186_v17 = vpop.xlane.xlu1 %2185  ;;  %2263 = vadd.xlane.f32.xlu0 %v2262_v20  ;;  %2260 = vadd.xlane.f32.xlu1 %v2259_v31 }
 0x32b   : > { %v2210_v45 = vsub.f32 %v4318_v6, %v2186_v17 }
 0x32d   : > { %v4580_v9 = vpop.eup %3476  ;;  %v2237_v63 = vmul.f32 1.442695, %v2210_v45  ;;  %v2183_v58 = vpop.xlane.xlu0 %2182 }
 0x32e   : > { %v2209_v37 = vsub.f32 %v4310_v39, %v2183_v58  ;;  %v2192_v7 = vpop.xlane.xlu1 %2191  ;;  %v2268_v30 = vsel %vm934_vm3, %v4580_v9, 0.0 }
 0x32f   : > { %3484 = vpow2.f32 %v2237_v63  ;;  %v2212_v51 = vsub.f32 %v4320_v11, %v2192_v7  ;;  %2269 = vadd.xlane.f32.xlu0 %v2268_v30 }
 0x330   : > { %v4586_v60 = vpop.eup %3478  ;;  %v2235_v20 = vmul.f32 1.442695, %v2209_v37 }
 0x331   : > { %v4588_v31 = vpop.eup %3480  ;;  %v2241_v6 = vmul.f32 1.442695, %v2212_v51  ;;  %v2189_v17 = vpop.xlane.xlu0 %2188  ;;  %v2265_v45 = vsel %vm934_vm3, %v4586_v60, 0.0 }
 0x332   : > { %4959 = vst [vmem:[#allocation20_spill] sm:$0xff] %v4588_v31  ;;  %3486 = vpow2.f32 %v2235_v20  ;;  %v2211_v39 = vsub.f32 %v4312_v14, %v2189_v17  ;;  %v4593_v58 = vpop.xlane.xlu1 %1062  ;;  %2266 = vadd.xlane.f32.xlu1 %v2265_v45  ;;  %v2274_v11 = vsel %vm934_vm3, %v4588_v31, 0.0 }
 0x333   : > { %3488 = vpow2.f32 %v2241_v6  ;;  %2275 = vadd.xlane.f32.xlu0 %v2274_v11 }
 0x334   : > { %v4597_v63 = vpop.eup %3482  ;;  %v2239_v37 = vmul.f32 1.442695, %v2211_v39 }
 0x335   : > { %4960 = vst [vmem:[#allocation21_spill] sm:$0xff] %v4597_v63  ;;  %v4599_v7 = vpop.xlane.xlu0 %1065  ;;  %v2271_v51 = vsel %vm934_vm3, %v4597_v63, 0.0 }
 0x336   : > { %3490 = vpow2.f32 %v2239_v37  ;;  %v2198_v30 = vpop.xlane.xlu1 %2197  ;;  %2272 = vadd.xlane.f32.xlu1 %v2271_v51 }
 0x337   : > { %v2214_v14 = vsub.f32 %v4339_v8, %v2198_v30 }
 0x339   : > { %v4604_v20 = vpop.eup %3484  ;;  %v2245_v17 = vmul.f32 1.442695, %v2214_v14  ;;  %v2195_v45 = vpop.xlane.xlu0 %2194 }
 0x33a   : > { %v2213_v6 = vsub.f32 %v4329_v33, %v2195_v45  ;;  %v2772_v11 = vpop.xlane.xlu1 %2771  ;;  %v2280_v39 = vsel %vm934_vm3, %v4604_v20, 0.0 }
 0x33b   : > { %3492 = vpow2.f32 %v2245_v17  ;;  %v2816_v31 = vsub.f32 %v4341_v53, %v2772_v11  ;;  %2281 = vadd.xlane.f32.xlu0 %v2280_v39 }
 0x33c   : > { %v4610_v63 = vpop.eup %3486  ;;  %v2243_v37 = vmul.f32 1.442695, %v2213_v6 }
 0x33d   : > { %4961 = vst [vmem:[#allocation22_spill] sm:$0xff] %v4610_v63  ;;  %v4612_v51 = vpop.eup %3488  ;;  %v2833_v8 = vmul.f32 1.442695, %v2816_v31  ;;  %v2769_v30 = vpop.xlane.xlu0 %2768  ;;  %v2277_v14 = vsel %vm934_vm3, %v4610_v63, 0.0 }
 0x33e   : > { %4962 = vst [vmem:[#allocation23_spill] sm:$0xff] %v4612_v51  ;;  %3494 = vpow2.f32 %v2243_v37  ;;  %v2815_v33 = vsub.f32 %v4331_v36, %v2769_v30  ;;  %v4617_v45 = vpop.xlane.xlu1 %1068  ;;  %2278 = vadd.xlane.f32.xlu1 %v2277_v14  ;;  %v2286_v53 = vsel %vm934_vm3, %v4612_v51, 0.0 }
 0x33f   : > { %3496 = vpow2.f32 %v2833_v8  ;;  %2287 = vadd.xlane.f32.xlu0 %v2286_v53 }
 0x340   : > { %v4621_v17 = vpop.eup %3490  ;;  %v2831_v6 = vmul.f32 1.442695, %v2815_v33 }
 0x341   : > { %4963 = vst [vmem:[#allocation24_spill] sm:$0xff] %v4621_v17  ;;  %v4623_v11 = vpop.xlane.xlu0 %1071  ;;  %v2283_v31 = vsel %vm934_vm3, %v4621_v17, 0.0 }
 0x342   : > { %3498 = vpow2.f32 %v2831_v6  ;;  %v2778_v39 = vpop.xlane.xlu1 %2777  ;;  %2284 = vadd.xlane.f32.xlu1 %v2283_v31 }
 0x343   : > { %v2818_v36 = vsub.f32 %v4359_v10, %v2778_v39 }
 0x345   : > { %v4628_v37 = vpop.eup %3492  ;;  %v2837_v30 = vmul.f32 1.442695, %v2818_v36  ;;  %v2775_v14 = vpop.xlane.xlu0 %2774 }
 0x346   : > { %4964 = vst [vmem:[#allocation25_spill] sm:$0xff] %v4628_v37  ;;  %v2817_v8 = vsub.f32 %v4349_v44, %v2775_v14  ;;  %v2784_v53 = vpop.xlane.xlu1 %2783  ;;  %v2292_v33 = vsel %vm934_vm3, %v4628_v37, 0.0 }
 0x347   : > { %3500 = vpow2.f32 %v2837_v30  ;;  %v2820_v51 = vsub.f32 %v4361_v1, %v2784_v53  ;;  %2293 = vadd.xlane.f32.xlu0 %v2292_v33 }
 0x348   : > { %v4634_v17 = vpop.eup %3494  ;;  %v2835_v6 = vmul.f32 1.442695, %v2817_v8 }
 0x349   : > { %4965 = vst [vmem:[#allocation26_spill] sm:$0xff] %v4634_v17  ;;  %v4636_v31 = vpop.eup %3496  ;;  %v2841_v10 = vmul.f32 1.442695, %v2820_v51  ;;  %v2781_v39 = vpop.xlane.xlu0 %2780  ;;  %v2289_v36 = vsel %vm934_vm3, %v4634_v17, 0.0 }
 0x34a   : > { %3502 = vpow2.f32 %v2835_v6  ;;  %v2819_v44 = vsub.f32 %v4351_v24, %v2781_v39  ;;  %v4641_v14 = vpop.xlane.xlu1 %1074  ;;  %2290 = vadd.xlane.f32.xlu1 %v2289_v36  ;;  %v2866_v1 = vsel %vm934_vm3, %v4636_v31, 0.0 }
 0x34b   : > { %3504 = vpow2.f32 %v2841_v10  ;;  %2867 = vadd.xlane.f32.xlu0 %v2866_v1 }
 0x34c   : > { %v4645_v30 = vpop.eup %3498  ;;  %v2839_v8 = vmul.f32 1.442695, %v2819_v44 }
 0x34d   : > { %v4647_v53 = vpop.xlane.xlu0 %1077  ;;  %v2863_v51 = vsel %vm934_vm3, %v4645_v30, 0.0 }
 0x34e   : > { %3506 = vpow2.f32 %v2839_v8  ;;  %v2790_v33 = vpop.xlane.xlu1 %2789  ;;  %2864 = vadd.xlane.f32.xlu1 %v2863_v51 }
 0x34f   : > { %v2822_v24 = vsub.f32 %v4378_v2, %v2790_v33 }
 0x351   : > { %v4652_v6 = vpop.eup %3500  ;;  %v2845_v39 = vmul.f32 1.442695, %v2822_v24  ;;  %v2787_v36 = vpop.xlane.xlu0 %2786 }
 0x352   : > { %v2821_v10 = vsub.f32 %v4370_v32, %v2787_v36  ;;  %v2796_v1 = vpop.xlane.xlu1 %2795  ;;  %v2872_v44 = vsel %vm934_vm3, %v4652_v6, 0.0 }
 0x353   : > { %3508 = vpow2.f32 %v2845_v39  ;;  %v2824_v17 = vsub.f32 %v4380_v55, %v2796_v1  ;;  %2873 = vadd.xlane.f32.xlu0 %v2872_v44 }
 0x354   : > { %v4658_v37 = vpop.eup %3502  ;;  %v2843_v8 = vmul.f32 1.442695, %v2821_v10 }
 0x355   : > { %v4660_v51 = vpop.eup %3504  ;;  %v2849_v2 = vmul.f32 1.442695, %v2824_v17  ;;  %v2793_v33 = vpop.xlane.xlu0 %2792  ;;  %v2869_v24 = vsel %vm934_vm3, %v4658_v37, 0.0 }
 0x356   : > { %3510 = vpow2.f32 %v2843_v8  ;;  %v2823_v32 = vsub.f32 %v4372_v26, %v2793_v33  ;;  %v2802_v36 = vpop.xlane.xlu1 %2801  ;;  %2870 = vadd.xlane.f32.xlu1 %v2869_v24  ;;  %v2878_v39 = vsel %vm934_vm3, %v4660_v51, 0.0 }
 0x357   : > { %3512 = vpow2.f32 %v2849_v2  ;;  %v2826_v55 = vsub.f32 %v4399_v12, %v2802_v36  ;;  %2879 = vadd.xlane.f32.xlu0 %v2878_v39 }
 0x358   : > { %v4668_v10 = vpop.eup %3506  ;;  %v2847_v1 = vmul.f32 1.442695, %v2823_v32 }
 0x359   : > { %v2853_v17 = vmul.f32 1.442695, %v2826_v55  ;;  %v2799_v44 = vpop.xlane.xlu0 %2798  ;;  %v2875_v63 = vsel %vm934_vm3, %v4668_v10, 0.0 }
 0x35a   : > { %3514 = vpow2.f32 %v2847_v1  ;;  %v2825_v26 = vsub.f32 %v4389_v25, %v2799_v44  ;;  %2876 = vadd.xlane.f32.xlu1 %v2875_v63  ;;  %v2808_v8 = vpop.xlane.xlu1 %2807 }
 0x35b   : > { %3516 = vpow2.f32 %v2853_v17  ;;  %v2828_v33 = vsub.f32 %v4401_v28, %v2808_v8 }
 0x35c   : > { %v2851_v2 = vmul.f32 1.442695, %v2825_v26 }
 0x35d   : > { %v4674_v24 = vpop.eup %3508  ;;  %v2857_v12 = vmul.f32 1.442695, %v2828_v33  ;;  %v2805_v36 = vpop.xlane.xlu0 %2804 }
 0x35e   : > { %3518 = vpow2.f32 %v2851_v2  ;;  %v2827_v32 = vsub.f32 %v4391_v3, %v2805_v36  ;;  %v2814_v39 = vpop.xlane.xlu1 %2813  ;;  %v2884_v55 = vsel %vm934_vm3, %v4674_v24, 0.0 }
 0x35f   : > { %3520 = vpow2.f32 %v2857_v12  ;;  %v2830_v25 = vsub.f32 %v4415_v49, %v2814_v39  ;;  %2885 = vadd.xlane.f32.xlu0 %v2884_v55 }
 0x360   : > { %v4680_v63 = vpop.eup %3510  ;;  %v2855_v1 = vmul.f32 1.442695, %v2827_v32 }
 0x361   : > { %v4682_v28 = vpop.eup %3512  ;;  %v2861_v17 = vmul.f32 1.442695, %v2830_v25  ;;  %v2811_v44 = vpop.xlane.xlu0 %2810  ;;  %v2881_v26 = vsel %vm934_vm3, %v4680_v63, 0.0 }
 0x362   : > { %3522 = vpow2.f32 %v2855_v1  ;;  %v2829_v3 = vsub.f32 %v4407_v48, %v2811_v44  ;;  %2882 = vadd.xlane.f32.xlu1 %v2881_v26  ;;  %v2890_v8 = vsel %vm934_vm3, %v4682_v28, 0.0 }
 0x363   : > { %3524 = vpow2.f32 %v2861_v17  ;;  %2891 = vadd.xlane.f32.xlu0 %v2890_v8 }
 0x364   : > { %v4689_v49 = vpop.eup %3514  ;;  %v2859_v33 = vmul.f32 1.442695, %v2829_v3 }
 0x365   : > { %v4691_v2 = vpop.eup %3516  ;;  %v2887_v12 = vsel %vm934_vm3, %v4689_v49, 0.0 }
 0x366   : > { %3526 = vpow2.f32 %v2859_v33  ;;  %2888 = vadd.xlane.f32.xlu1 %v2887_v12  ;;  %v2896_v36 = vsel %vm934_vm3, %v4691_v2, 0.0 }
 0x367   : > { %2897 = vadd.xlane.f32.xlu0 %v2896_v36  ;;  %3528 = vrcp.f32 %v4503_v0 }
 0x368   : > { %v4697_v48 = vpop.eup %3518  ;;  %3530 = vrcp.f32 %v4507_v27 }
 0x369   : > { %v4699_v32 = vpop.eup %3520  ;;  %v2893_v39 = vsel %vm934_vm3, %v4697_v48, 0.0 }
 0x36a   : > { %2894 = vadd.xlane.f32.xlu1 %v2893_v39  ;;  %v2902_v55 = vsel %vm934_vm3, %v4699_v32, 0.0 }
 0x36b   : > { %2903 = vadd.xlane.f32.xlu0 %v2902_v55 }
 0x36c   : > { %v4705_v25 = vpop.eup %3522  ;;  %v4715_v3 = vpop.xlane.xlu1 %1648 }
 0x36d   : > { %4966 = vst [vmem:[#allocation27_spill] sm:$0xff] %v4705_v25  ;;  %v4707_v1 = vpop.eup %3524  ;;  %v2899_v17 = vsel %vm934_vm3, %v4705_v25, 0.0  ;;  %v4987_v25 = vld [vmem:[#allocation18_spill] sm:$0xff] }
 0x36e   : > { %4967 = vst [vmem:[#allocation28_spill] sm:$0xff] %v4707_v1  ;;  %2900 = vadd.xlane.f32.xlu1 %v2899_v17  ;;  %v2908_v44 = vsel %vm934_vm3, %v4707_v1, 0.0  ;;  %v4719_v33 = vpop.xlane.xlu0 %1651 }
 0x36f   : > { %2909 = vadd.xlane.f32.xlu0 %v2908_v44 }
 0x370   : > { %v4713_v26 = vpop.eup %3526 }
 0x371   : > { %4968 = vst [vmem:[#allocation29_spill] sm:$0xff] %v4713_v26  ;;  %v2905_v8 = vsel %vm934_vm3, %v4713_v26, 0.0  ;;  %v3529_v55 = vpop.eup %3528 }
 0x372   : > { %2906 = vadd.xlane.f32.xlu1 %v2905_v8  ;;  %v3531_v17 = vpop.eup %3530  ;;  %v1084_v8 = vmul.f32 %v3529_v55, %v4241_v16 }
 0x374   : > { %v1655_v12 = vpop.xlane.xlu1 %1654 }
 0x375   : > { %3532 = vrcp.f32 %v1655_v12  ;;  %v1086_v12 = vmul.f32 %v3531_v17, %v4247_v21 }
 0x376   : > { %v1658_v36 = vpop.xlane.xlu0 %1657 }
 0x377   : > { %3534 = vrcp.f32 %v1658_v36 }
 0x378   : > { %3536 = vrcp.f32 %v4521_v42 }
 0x379   : > { %3538 = vrcp.f32 %v4529_v40 }
 0x37c   : > { %v1661_v39 = vpop.xlane.xlu1 %1660 }
 0x37d   : > { %3540 = vrcp.f32 %v1661_v39 }
 0x37e   : > { %v1664_v44 = vpop.xlane.xlu0 %1663 }
 0x37f   : > { %v3533_v26 = vpop.eup %3532  ;;  %3542 = vrcp.f32 %v1664_v44 }
 0x380   : > { %v1700_v0 = vmul.f32 %v3533_v26, %v4459_v34  ;;  %3544 = vrcp.f32 %v4543_v35 }
 0x381   : > { %v3535_v27 = vpop.eup %3534  ;;  %3546 = vrcp.f32 %v4547_v5 }
 0x382   : > { %v4728_v1 = vadd.f32 %v1700_v0, %v1084_v8  ;;  %v1702_v42 = vmul.f32 %v3535_v27, %v4463_v61  ;;  %v3537_v39 = vpop.eup %3536 }
 0x383   : > { %v3539_v44 = vpop.eup %3538  ;;  %v1088_v34 = vmul.f32 %v3537_v39, %v4267_v62  ;;  %v4970_v39 = vld [vmem:[#allocation5_spill] sm:$0xff] }
 0x384   : > { %v4733_v40 = vadd.f32 %v1702_v42, %v1086_v12  ;;  %v1667_v36 = vpop.xlane.xlu1 %1666  ;;  %v1090_v61 = vmul.f32 %v3539_v44, %v4275_v41 }
 0x385   : > { %3548 = vrcp.f32 %v1667_v36 }
 0x386   : > { %v1670_v16 = vpop.xlane.xlu0 %1669 }
 0x387   : > { %v3541_v55 = vpop.eup %3540  ;;  %3550 = vrcp.f32 %v1670_v16 }
 0x388   : > { %v1704_v21 = vmul.f32 %v3541_v55, %v4469_v19  ;;  %3552 = vrcp.f32 %v4569_v29  ;;  %v4969_v19 = vld [vmem:[#allocation4_spill] sm:$0xff] }
 0x389   : > { %v3543_v26 = vpop.eup %3542  ;;  %3554 = vrcp.f32 %v4573_v15 }
 0x38a   : > { %v4738_v17 = vadd.f32 %v1704_v21, %v1088_v34  ;;  %v1706_v35 = vmul.f32 %v3543_v26, %v4473_v57  ;;  %v3545_v0 = vpop.eup %3544 }
 0x38b   : > { %v3547_v27 = vpop.eup %3546  ;;  %v1092_v42 = vmul.f32 %v3545_v0, %v4969_v19  ;;  %v4972_v0 = vld [vmem:[#allocation7_spill] sm:$0xff] }
 0x38c   : > { %v4743_v5 = vadd.f32 %v1706_v35, %v1090_v61  ;;  %v1673_v8 = vpop.xlane.xlu1 %1672  ;;  %v1094_v57 = vmul.f32 %v3547_v27, %v4970_v39 }
 0x38d   : > { %3556 = vrcp.f32 %v1673_v8 }
 0x38e   : > { %v1676_v62 = vpop.xlane.xlu0 %1675 }
 0x38f   : > { %v3549_v12 = vpop.eup %3548  ;;  %3558 = vrcp.f32 %v1676_v62 }
 0x390   : > { %v1708_v41 = vmul.f32 %v3549_v12, %v4479_v13  ;;  %3560 = vrcp.f32 %v4593_v58  ;;  %v4971_v13 = vld [vmem:[#allocation6_spill] sm:$0xff] }
 0x391   : > { %v3551_v36 = vpop.eup %3550  ;;  %3562 = vrcp.f32 %v4599_v7 }
 0x392   : > { %v4748_v44 = vadd.f32 %v1708_v41, %v1092_v42  ;;  %v1710_v29 = vmul.f32 %v3551_v36, %v4483_v18  ;;  %v3553_v55 = vpop.eup %3552 }
 0x393   : > { %v3555_v34 = vpop.eup %3554  ;;  %v1096_v61 = vmul.f32 %v3553_v55, %v4971_v13  ;;  %v4975_v13 = vld [vmem:[#allocation10_spill] sm:$0xff] }
 0x394   : > { %v4753_v15 = vadd.f32 %v1710_v29, %v1094_v57  ;;  %v1679_v16 = vpop.xlane.xlu1 %1678  ;;  %v1098_v18 = vmul.f32 %v3555_v34, %v4972_v0  ;;  %v4974_v29 = vld [vmem:[#allocation9_spill] sm:$0xff] }
 0x395   : > { %3564 = vrcp.f32 %v1679_v16 }
 0x396   : > { %v1682_v21 = vpop.xlane.xlu0 %1681 }
 0x397   : > { %v3557_v26 = vpop.eup %3556  ;;  %3566 = vrcp.f32 %v1682_v21 }
 0x398   : > { %v1712_v35 = vmul.f32 %v3557_v26, %v4493_v52  ;;  %3568 = vrcp.f32 %v4617_v45  ;;  %v4973_v52 = vld [vmem:[#allocation8_spill] sm:$0xff] }
 0x399   : > { %v3559_v8 = vpop.eup %3558  ;;  %3570 = vrcp.f32 %v4623_v11 }
 0x39a   : > { %v4758_v27 = vadd.f32 %v1712_v35, %v1096_v61  ;;  %v1714_v58 = vmul.f32 %v3559_v8, %v4497_v43  ;;  %v3561_v12 = vpop.eup %3560  ;;  %v4976_v8 = vld [vmem:[#allocation11_spill] sm:$0xff] }
 0x39b   : > { %v3563_v19 = vpop.eup %3562  ;;  %v1100_v36 = vmul.f32 %v3561_v12, %v4973_v52 }
 0x39c   : > { %v4763_v7 = vadd.f32 %v1714_v58, %v1098_v18  ;;  %v1685_v62 = vpop.xlane.xlu1 %1684  ;;  %v1102_v43 = vmul.f32 %v3563_v19, %v4974_v29  ;;  %v4979_v29 = vld [vmem:[#allocation13_spill] sm:$0xff] }
 0x39d   : > { %3572 = vrcp.f32 %v1685_v62 }
 0x39e   : > { %v1688_v42 = vpop.xlane.xlu0 %1687 }
 0x39f   : > { %v3565_v41 = vpop.eup %3564  ;;  %3574 = vrcp.f32 %v1688_v42  ;;  %v4977_v42 = vld [vmem:[#allocation12_spill] sm:$0xff] }
 0x3a0   : > { %v1716_v39 = vmul.f32 %v3565_v41, %v4505_v47  ;;  %3576 = vrcp.f32 %v4641_v14 }
 0x3a1   : > { %v3567_v57 = vpop.eup %3566 }
 0x3a2   : > { %v4768_v16 = vadd.f32 %v1716_v39, %v1100_v36  ;;  %v1718_v45 = vmul.f32 %v3567_v57, %v4511_v22  ;;  %v3569_v34 = vpop.eup %3568 }
 0x3a3   : > { %v3571_v21 = vpop.eup %3570  ;;  %v1104_v61 = vmul.f32 %v3569_v34, %v4975_v13 }
 0x3a4   : > { %v4772_v11 = vadd.f32 %v1718_v45, %v1102_v43  ;;  %v1691_v55 = vpop.xlane.xlu1 %1690  ;;  %v1106_v0 = vmul.f32 %v3571_v21, %v4976_v8 }
 0x3a5   : > { %3578 = vrcp.f32 %v1691_v55 }
 0x3a6   : > { %3580 = vrcp.f32 %v4647_v53 }
 0x3a7   : > { %v3573_v26 = vpop.eup %3572 }
 0x3a8   : > { %v1720_v47 = vmul.f32 %v3573_v26, %v4518_v23  ;;  %v2249_v53 = vpop.xlane.xlu1 %2248 }
 0x3a9   : > { %v3575_v35 = vpop.eup %3574 }
 0x3aa   : > { %v4778_v18 = vadd.f32 %v1720_v47, %v1104_v61  ;;  %v1722_v22 = vmul.f32 %v3575_v35, %v4525_v56  ;;  %v3577_v62 = vpop.eup %3576 }
 0x3ab   : > { %v1694_v14 = vpop.xlane.xlu0 %1693  ;;  %v1108_v41 = vmul.f32 %v3577_v62, %v4977_v42 }
 0x3ac   : > { %v4781_v58 = vadd.f32 %v1722_v22, %v1106_v0  ;;  %3582 = vrcp.f32 %v1694_v14  ;;  %v4982_v14 = vld [vmem:[#allocation16_spill] sm:$0xff] }
 0x3ad   : > { %3584 = vrcp.f32 %v4719_v33 }
 0x3af   : > { %v3579_v12 = vpop.eup %3578  ;;  %v2252_v19 = vpop.xlane.xlu0 %2251 }
 0x3b0   : > { %v1724_v23 = vmul.f32 %v3579_v12, %v4532_v54  ;;  %v3581_v36 = vpop.eup %3580 }
 0x3b1   : > { %v1110_v43 = vmul.f32 %v3581_v36, %v4979_v29  ;;  %v4983_v36 = vld [vmem:[#allocation15_spill] sm:$0xff] }
 0x3b2   : > { %v4785_v52 = vadd.f32 %v1724_v23, %v1108_v41 }
 0x3b3   : > { %v2258_v39 = vpop.xlane.xlu0 %2257  ;;  %v2255_v55 = vpop.xlane.xlu1 %2254 }
 0x3b4   : > { %4978 = vst [vmem:[#allocation4_spill] sm:$0xff] %v4785_v52  ;;  %v4986_v52 = vld [vmem:[#allocation2_spill] sm:$0xff] }
 0x3b6   : > { %v3583_v57 = vpop.eup %3582 }
 0x3b7   : > { %v1726_v56 = vmul.f32 %v3583_v57, %v4545_v46  ;;  %v2264_v34 = vpop.xlane.xlu0 %2263  ;;  %v2261_v21 = vpop.xlane.xlu1 %2260  ;;  %v4981_v46 = vld [vmem:[#allocation17_spill] sm:$0xff] }
 0x3b8   : > { %3586 = vrcp.f32 %v4981_v46  ;;  %v3585_v42 = vpop.eup %3584 }
 0x3b9   : > { %v4789_v45 = vadd.f32 %v1726_v56, %v1110_v43  ;;  %3588 = vrcp.f32 %v2252_v19  ;;  %v1698_v57 = vmul.f32 %v3585_v42, %v4983_v36  ;;  %v4984_v43 = vld [vmem:[#allocation3_spill] sm:$0xff] }
 0x3ba   : > { %3590 = vrcp.f32 %v4715_v3 }
 0x3bb   : > { %4980 = vst [vmem:[#allocation5_spill] sm:$0xff] %v4789_v45  ;;  %3592 = vrcp.f32 %v4982_v14  ;;  %v4985_v14 = vld [vmem:[#allocation14_spill] sm:$0xff] }
 0x3bc   : > { %v2270_v26 = vpop.xlane.xlu0 %2269  ;;  %3594 = vrcp.f32 %v2249_v53 }
 0x3bf   : > { %v2267_v13 = vpop.xlane.xlu1 %2266 }
 0x3c0   : > { %v4791_v61 = vpop.xlane.xlu0 %2275 }
 0x3c2   : > { %v3587_v33 = vpop.eup %3586 }
 0x3c3   : > { %v4793_v54 = vpop.xlane.xlu1 %2272  ;;  %v3589_v23 = vpop.eup %3588  ;;  %v1082_v56 = vmul.f32 %v3587_v33, %v4984_v43 }
 0x3c4   : > { %v3591_v19 = vpop.eup %3590  ;;  %v2298_v53 = vmul.f32 %v3589_v23, %v4551_v38 }
 0x3c5   : > { %v3593_v3 = vpop.eup %3592 }
 0x3c6   : > { %v3595_v29 = vpop.eup %3594  ;;  %v1080_v45 = vmul.f32 %v3593_v3, %v4986_v52 }
 0x3c7   : > { %v2296_v42 = vmul.f32 %v3595_v29, %v4987_v25 }
 0x3c8   : > { %v4795_v47 = vpop.xlane.xlu0 %2281 }
 0x3cb   : > { %v4797_v35 = vpop.xlane.xlu1 %2278 }
 0x3cc   : > { %v4799_v8 = vpop.xlane.xlu0 %2287 }
 0x3cf   : > { %v4803_v0 = vpop.xlane.xlu1 %2284 }
 0x3d4   : > { %v4806_v22 = vpop.xlane.xlu0 %2293 }
 0x3d7   : > { %v4809_v62 = vpop.xlane.xlu1 %2290 }
 0x3d8   : > { %v2868_v12 = vpop.xlane.xlu0 %2867 }
 0x3d9   : > { %3596 = vrcp.f32 %v2868_v12  ;;  %v1696_v12 = vmul.f32 %v3591_v19, %v4985_v14  ;;  %v4988_v14 = vld [vmem:[#allocation19_spill] sm:$0xff] }
 0x3da   : > { %3598 = vrcp.f32 %v2258_v39  ;;  %v1728_v39 = vadd.f32 %v1698_v57, %v1082_v56 }
 0x3db   : > { %v2865_v41 = vpop.xlane.xlu1 %2864  ;;  %v1727_v38 = vadd.f32 %v1696_v12, %v1080_v45 }
 0x3dc   : > { %3600 = vrcp.f32 %v2865_v41  ;;  %v2328_v36 = vadd.f32 %v2298_v53, %v1728_v39 }
 0x3dd   : > { %3602 = vrcp.f32 %v2255_v55  ;;  %v2327_v52 = vadd.f32 %v2296_v42, %v1727_v38 }
 0x3de   : > { %3604 = vrcp.f32 %v2264_v34 }
 0x3e0   : > { %v2874_v46 = vpop.xlane.xlu0 %2873 }
 0x3e1   : > { %3606 = vrcp.f32 %v2874_v46 }
 0x3e2   : > { %3608 = vrcp.f32 %v2261_v21 }
 0x3e3   : > { %v3597_v41 = vpop.eup %3596  ;;  %v2871_v55 = vpop.xlane.xlu1 %2870 }
 0x3e4   : > { %v2914_v34 = vmul.f32 %v3597_v41, %v4636_v31  ;;  %3610 = vrcp.f32 %v2871_v55  ;;  %v2880_v33 = vpop.xlane.xlu0 %2879  ;;  %v3599_v43 = vpop.eup %3598 }
 0x3e5   : > { %3612 = vrcp.f32 %v2880_v33  ;;  %v2302_v57 = vmul.f32 %v3599_v43, %v4556_v59 }
 0x3e6   : > { %v3601_v23 = vpop.eup %3600  ;;  %v2944_v19 = vadd.f32 %v2914_v34, %v2328_v36  ;;  %3614 = vrcp.f32 %v2270_v26 }
 0x3e7   : > { %v2912_v25 = vmul.f32 %v3601_v23, %v4645_v30  ;;  %v2877_v21 = vpop.xlane.xlu1 %2876  ;;  %v3603_v31 = vpop.eup %3602  ;;  %v2330_v30 = vadd.f32 %v2302_v57, %v4733_v40 }
 0x3e8   : > { %v2960_v3 = vmul.f32 0.25, %v2944_v19  ;;  %3616 = vrcp.f32 %v2877_v21  ;;  %v3605_v45 = vpop.eup %3604  ;;  %v2300_v53 = vmul.f32 %v3603_v31, %v4560_v4 }
 0x3e9   : > { %v2943_v29 = vadd.f32 %v2912_v25, %v2327_v52  ;;  %3618 = vrcp.f32 %v2267_v13  ;;  %v2306_v12 = vmul.f32 %v3605_v45, %v4988_v14 }
 0x3ea   : > { %2976 = vst.msk [vmem:[%s4823_s14 + $0x8] sm:$0xff] %vm934_vm3, %v2960_v3  ;;  %3620 = vrcp.f32 %v4791_v61  ;;  %v2329_v41 = vadd.f32 %v2300_v53, %v4728_v1  ;;  %v4989_v3 = vld [vmem:[#allocation20_spill] sm:$0xff]  ;;  %v4990_v53 = vld [vmem:[#allocation21_spill] sm:$0xff] }
 0x3eb   : > { %v3607_v56 = vpop.eup %3606  ;;  %v2959_v26 = vmul.f32 0.25, %v2943_v29  ;;  %3622 = vrcp.f32 %v4793_v54  ;;  %v2332_v54 = vadd.f32 %v2306_v12, %v4743_v5 }
 0x3ec   : > { %v3609_v46 = vpop.eup %3608  ;;  %v2918_v59 = vmul.f32 %v3607_v56, %v4652_v6  ;;  %v2886_v39 = vpop.xlane.xlu0 %2885 }
 0x3ed   : > { %2975 = vst.msk [vmem:[%s4823_s14] sm:$0xff] %vm934_vm3, %v2959_v26  ;;  %3624 = vrcp.f32 %v2886_v39  ;;  %v2304_v40 = vmul.f32 %v3609_v46, %v4571_v50 }
 0x3ee   : > { %v3611_v13 = vpop.eup %3610  ;;  %3626 = vrcp.f32 %v4795_v47  ;;  %v2946_v4 = vadd.f32 %v2918_v59, %v2330_v30 }
 0x3ef   : > { %v3613_v61 = vpop.eup %3612  ;;  %v2916_v42 = vmul.f32 %v3611_v13, %v4658_v37  ;;  %v2883_v55 = vpop.xlane.xlu1 %2882  ;;  %v2331_v37 = vadd.f32 %v2304_v40, %v4738_v17 }
 0x3f0   : > { %v2962_v6 = vmul.f32 0.25, %v2946_v4  ;;  %v2922_v36 = vmul.f32 %v3613_v61, %v4660_v51  ;;  %3628 = vrcp.f32 %v2883_v55  ;;  %v2892_v34 = vpop.xlane.xlu0 %2891  ;;  %v3615_v33 = vpop.eup %3614 }
 0x3f1   : > { %v2945_v43 = vadd.f32 %v2916_v42, %v2329_v41  ;;  %3630 = vrcp.f32 %v2892_v34  ;;  %v2310_v23 = vmul.f32 %v3615_v33, %v4580_v9 }
 0x3f2   : > { %v3617_v47 = vpop.eup %3616  ;;  %3632 = vrcp.f32 %v4797_v35  ;;  %2978 = vst.msk [vmem:[%s4823_s14 + $0x18] sm:$0xff] %vm934_vm3, %v2962_v6  ;;  %v2948_v50 = vadd.f32 %v2922_v36, %v2332_v54  ;;  %v4992_v6 = vld [vmem:[#allocation23_spill] sm:$0xff] }
 0x3f3   : > { %3634 = vrcp.f32 %v4799_v8  ;;  %v2961_v1 = vmul.f32 0.25, %v2945_v43  ;;  %v2920_v51 = vmul.f32 %v3617_v47, %v4668_v10  ;;  %v2889_v5 = vpop.xlane.xlu1 %2888  ;;  %v3619_v38 = vpop.eup %3618  ;;  %v2334_v57 = vadd.f32 %v2310_v23, %v4753_v15  ;;  %v4994_v23 = vld [vmem:[#allocation25_spill] sm:$0xff] }
 0x3f4   : > { %v2964_v19 = vmul.f32 0.25, %v2948_v50  ;;  %3636 = vrcp.f32 %v2889_v5  ;;  %v2898_v52 = vpop.xlane.xlu0 %2897  ;;  %v3621_v25 = vpop.eup %3620  ;;  %v2308_v10 = vmul.f32 %v3619_v38, %v4586_v60 }
 0x3f5   : > { %2977 = vst.msk [vmem:[%s4823_s14 + $0x10] sm:$0xff] %vm934_vm3, %v2961_v1  ;;  %v2947_v35 = vadd.f32 %v2920_v51, %v2331_v37  ;;  %3638 = vrcp.f32 %v2898_v52  ;;  %v3623_v17 = vpop.eup %3622  ;;  %v2314_v45 = vmul.f32 %v3621_v25, %v4989_v3  ;;  %v4993_v37 = vld [vmem:[#allocation24_spill] sm:$0xff] }
 0x3f6   : > { %3640 = vrcp.f32 %v4803_v0  ;;  %2980 = vst.msk [vmem:[%s4823_s14 + $0x28] sm:$0xff] %vm934_vm3, %v2964_v19  ;;  %v2312_v26 = vmul.f32 %v3623_v17, %v4990_v53  ;;  %v2333_v46 = vadd.f32 %v2308_v10, %v4748_v44  ;;  %v4995_v10 = vld [vmem:[#allocation26_spill] sm:$0xff]  ;;  %v4999_v53 = vld [vmem:[#allocation4_spill] sm:$0xff] }
 0x3f7   : > { %v3625_v8 = vpop.eup %3624  ;;  %3642 = vrcp.f32 %v4806_v22  ;;  %v2963_v9 = vmul.f32 0.25, %v2947_v35  ;;  %v2895_v21 = vpop.xlane.xlu1 %2894  ;;  %v2336_v12 = vadd.f32 %v2314_v45, %v4763_v7  ;;  %v4991_v7 = vld [vmem:[#allocation22_spill] sm:$0xff]  ;;  %v4998_v45 = vld [vmem:[#allocation28_spill] sm:$0xff] }
 0x3f8   : > { %v3627_v31 = vpop.eup %3626  ;;  %v2926_v29 = vmul.f32 %v3625_v8, %v4674_v24  ;;  %3644 = vrcp.f32 %v2895_v21  ;;  %v2904_v56 = vpop.xlane.xlu0 %2903  ;;  %v2335_v44 = vadd.f32 %v2312_v26, %v4758_v27  ;;  %v4996_v21 = vld [vmem:[#allocation27_spill] sm:$0xff] }
 0x3f9   : > { %2979 = vst.msk [vmem:[%s4823_s14 + $0x20] sm:$0xff] %vm934_vm3, %v2963_v9  ;;  %3646 = vrcp.f32 %v2904_v56  ;;  %v2318_v15 = vmul.f32 %v3627_v31, %v4604_v20 }
 0x3fa   : > { %v3629_v0 = vpop.eup %3628  ;;  %3648 = vrcp.f32 %v4809_v62  ;;  %v2950_v60 = vadd.f32 %v2926_v29, %v2334_v57  ;;  %v4997_v57 = vld [vmem:[#allocation5_spill] sm:$0xff] }
 0x3fb   : > { %v3631_v22 = vpop.eup %3630  ;;  %v2924_v30 = vmul.f32 %v3629_v0, %v4680_v63  ;;  %v2901_v24 = vpop.xlane.xlu1 %2900  ;;  %v2338_v41 = vadd.f32 %v2318_v15, %v4772_v11 }
 0x3fc   : > { %v3633_v14 = vpop.eup %3632  ;;  %v2966_v59 = vmul.f32 0.25, %v2950_v60  ;;  %v2930_v39 = vmul.f32 %v3631_v22, %v4682_v28  ;;  %3650 = vrcp.f32 %v2901_v24  ;;  %v2910_v13 = vpop.xlane.xlu0 %2909  ;;  %v5000_v22 = vld [vmem:[#allocation29_spill] sm:$0xff] }
 0x3fd   : > { %v3635_v4 = vpop.eup %3634  ;;  %v2949_v62 = vadd.f32 %v2924_v30, %v2333_v46  ;;  %3652 = vrcp.f32 %v2910_v13  ;;  %v2316_v40 = vmul.f32 %v3633_v14, %v4991_v7 }
 0x3fe   : > { %v3637_v61 = vpop.eup %3636  ;;  %2982 = vst.msk [vmem:[%s4823_s14 + $0x38] sm:$0xff] %vm934_vm3, %v2966_v59  ;;  %v2952_v20 = vadd.f32 %v2930_v39, %v2336_v12  ;;  %v2322_v36 = vmul.f32 %v3635_v4, %v4992_v6 }
 0x3ff   : > { %v3639_v63 = vpop.eup %3638  ;;  %v2965_v42 = vmul.f32 0.25, %v2949_v62  ;;  %v2928_v28 = vmul.f32 %v3637_v61, %v4689_v49  ;;  %v2907_v55 = vpop.xlane.xlu1 %2906  ;;  %v2337_v49 = vadd.f32 %v2316_v40, %v4768_v16 }
 0x400   : > { %v3641_v54 = vpop.eup %3640  ;;  %v2968_v34 = vmul.f32 0.25, %v2952_v20  ;;  %v2934_v33 = vmul.f32 %v3639_v63, %v4691_v2  ;;  %3654 = vrcp.f32 %v2907_v55  ;;  %v2340_v38 = vadd.f32 %v2322_v36, %v4781_v58 }
 0x401   : > { %v3643_v27 = vpop.eup %3642  ;;  %2981 = vst.msk [vmem:[%s4823_s14 + $0x30] sm:$0xff] %vm934_vm3, %v2965_v42  ;;  %v2951_v43 = vadd.f32 %v2928_v28, %v2335_v44  ;;  %v2320_v1 = vmul.f32 %v3641_v54, %v4993_v37 }
 0x402   : > { %v3645_v47 = vpop.eup %3644  ;;  %2984 = vst.msk [vmem:[%s4823_s14 + $0x48] sm:$0xff] %vm934_vm3, %v2968_v34  ;;  %v2954_v11 = vadd.f32 %v2934_v33, %v2338_v41  ;;  %v2326_v19 = vmul.f32 %v3643_v27, %v4994_v23 }
 0x403   : > { %v3647_v50 = vpop.eup %3646  ;;  %v2967_v51 = vmul.f32 0.25, %v2951_v43  ;;  %v2932_v5 = vmul.f32 %v3645_v47, %v4697_v48  ;;  %v2339_v48 = vadd.f32 %v2320_v1, %v4778_v18 }
 0x404   : > { %v3649_v2 = vpop.eup %3648  ;;  %v2970_v52 = vmul.f32 0.25, %v2954_v11  ;;  %v2938_v25 = vmul.f32 %v3647_v50, %v4699_v32  ;;  %v2342_v32 = vadd.f32 %v2326_v19, %v4997_v57 }
 0x405   : > { %2983 = vst.msk [vmem:[%s4823_s14 + $0x40] sm:$0xff] %vm934_vm3, %v2967_v51  ;;  %v2953_v35 = vadd.f32 %v2932_v5, %v2337_v49  ;;  %v2324_v58 = vmul.f32 %v3649_v2, %v4995_v10 }
 0x406   : > { %v3651_v17 = vpop.eup %3650  ;;  %2986 = vst.msk [vmem:[%s4823_s14 + $0x58] sm:$0xff] %vm934_vm3, %v2970_v52  ;;  %v2956_v16 = vadd.f32 %v2938_v25, %v2340_v38 }
 0x407   : > { %v3653_v8 = vpop.eup %3652  ;;  %v2969_v9 = vmul.f32 0.25, %v2953_v35  ;;  %v2936_v31 = vmul.f32 %v3651_v17, %v4996_v21  ;;  %v2341_v26 = vadd.f32 %v2324_v58, %v4999_v53 }
 0x408   : > { %v2972_v3 = vmul.f32 0.25, %v2956_v16  ;;  %v2942_v29 = vmul.f32 %v3653_v8, %v4998_v45 }
 0x409   : > { %2985 = vst.msk [vmem:[%s4823_s14 + $0x50] sm:$0xff] %vm934_vm3, %v2969_v9  ;;  %v2955_v56 = vadd.f32 %v2936_v31, %v2339_v48 }
 0x40a   : > { %v3655_v0 = vpop.eup %3654  ;;  %2988 = vst.msk [vmem:[%s4823_s14 + $0x68] sm:$0xff] %vm934_vm3, %v2972_v3  ;;  %v2958_v18 = vadd.f32 %v2942_v29, %v2342_v32 }
 0x40b   : > { %v2971_v60 = vmul.f32 0.25, %v2955_v56  ;;  %v2940_v46 = vmul.f32 %v3655_v0, %v5000_v22 }
 0x40c   : > { %v2974_v15 = vmul.f32 0.25, %v2958_v18 }
 0x40d   : > { %2987 = vst.msk [vmem:[%s4823_s14 + $0x60] sm:$0xff] %vm934_vm3, %v2971_v60  ;;  %v2957_v30 = vadd.f32 %v2940_v46, %v2341_v26 }
 0x40e   : > { %2990 = vst.msk [vmem:[%s4823_s14 + $0x78] sm:$0xff] %vm934_vm3, %v2974_v15 }
 0x40f   : > { %v2973_v24 = vmul.f32 0.25, %v2957_v30 }
 0x411   : > { %2989 = vst.msk [vmem:[%s4823_s14 + $0x70] sm:$0xff] %vm934_vm3, %v2973_v24 }
 0x412 PF: > { %s13_s12 = sadd.s32 1, %s3662_s12  }
 0x413   : > { %p10_p4 = scmp.ge.s32.totalorder %s13_s12, 4  }
 0x415   :  { %12 = sbr.rel (!%p10_p4) target bundleno = 1 (0x1), region = 62 }

</bundles_post_ra>
